<compile_context>
chip_gen: v6e
topology: v6e:2x2x1
jax: 0.10.0
libtpu: 0.0.40
codegen_flags: <defaults>
</compile_context>

<pallas_src>
import functools

import jax
import jax.numpy as jnp
from jax import lax
from jax.experimental import pallas as pl
from jax.experimental.pallas import tpu as pltpu


NCLS_PAD = 128   # final logits padded to a full 128-lane store (lane-dense vst)


# --------------------------------------------------------------------------
# In-kernel helpers (operate on values already resident in vregs)
# --------------------------------------------------------------------------

def _layernorm(x, g, b):
    # nn.LayerNorm, eps=1e-5 (default), row-wise over the feature axis.
    mu = jnp.mean(x, axis=-1, keepdims=True)
    var = jnp.mean((x - mu) ** 2, axis=-1, keepdims=True)
    return (x - mu) * lax.rsqrt(var + 1e-5) * g + b


def _exact_gelu(x):
    # torch.nn.GELU() default is the exact erf form.  lax.erf is not a
    # guaranteed Mosaic lowering and the tanh-form GELU changes numerics by
    # ~1e-3, so we keep an f32-exact rational erf (A&S 7.1.26, |err|<1.5e-7).
    # The dozen VPU ops on a (17,128) tile are negligible in this fused kernel.
    a1, a2, a3, a4, a5 = 0.254829592, -0.284496736, 1.421413741, -1.453152027, 1.061405429
    p = 0.3275911
    z = x * 0.7071067811865475
    s = jnp.where(z >= 0.0, 1.0, -1.0)
    az = jnp.abs(z)
    t = 1.0 / (1.0 + p * az)
    poly = ((((a5 * t + a4) * t + a3) * t + a2) * t + a1) * t
    erf = s * (1.0 - poly * jnp.exp(-az * az))
    return 0.5 * x * (1.0 + erf)


# --------------------------------------------------------------------------
# Fused forward kernel: one grid step == one batch element's full forward
# --------------------------------------------------------------------------

def _discriminator_kernel(
        patches_ref,                     # (1, num_patches, C*p*p)
        pw_ref, pb_ref,                  # patch embedding
        cls_ref, pos_ref,                # class / positional embeddings
        ln1g_ref, ln1b_ref, ln2g_ref, ln2b_ref,     # (depth, 1, dim)
        f1w_ref, f1b_ref, f2w_ref, f2b_ref,         # (depth, ...) MLP weights
        ng_ref, nb_ref,                  # final LayerNorm
        ow_ref, ob_ref,                  # classifier head (lane-padded to 128)
        o_ref,                           # (1, 1, NCLS_PAD)
        buf,                             # VMEM scratch (n_tok, dim)
        *, depth, heads, scale):
    dim = buf.shape[1]
    hd = dim // heads

    # --- patch embedding + cls token + positional embedding (all fused) -----
    emb = jnp.dot(patches_ref[0], pw_ref[...],
                  preferred_element_type=jnp.float32) + pb_ref[...]
    buf[0:1, :] = cls_ref[...]           # cls token assembled via scratch
    buf[1:, :] = emb                     # (no concat needed)
    x = buf[...] + pos_ref[...]          # dropout(p=0) == identity

    # --- TransformerEncoder: depth x Encoder_Block, statically unrolled -----
    for d in range(depth):
        # TODO(synk): the QuantumLayer q/k/v + output maps in Attention and the
        # QuantumLayer inside MLP have no Pallas equivalent -> identity.
        x1 = _layernorm(x, ln1g_ref[d], ln1b_ref[d])

        # Multi-head self-attention with q = k = v = x1.  Each head reads its
        # lane range straight from the in-register value x1; the head outputs
        # are written into disjoint lane ranges of `buf`, which is then read
        # exactly once for the residual.
        for h in range(heads):
            lo, hi = h * hd, (h + 1) * hd
            xh = x1[:, lo:hi]                                # (n_tok, hd)
            # q @ k^T without an explicit transpose: contract last dims.
            s = lax.dot_general(xh, xh, (((1,), (1,)), ((), ())),
                                preferred_element_type=jnp.float32) * scale
            s = s - jnp.max(s, axis=-1, keepdims=True)       # softmax(dim=-1)
            p = jnp.exp(s)
            p = p * pl.reciprocal(jnp.sum(p, axis=-1, keepdims=True),
                                  approx=True)               # divide -> EUP
            buf[:, lo:hi] = jnp.dot(p, xh, preferred_element_type=jnp.float32)
        x = x + buf[...]                                     # residual (fused)

        # MLP: fc1 -> GELU -> fc2, plus residual, all in-register.
        x2 = _layernorm(x, ln2g_ref[d], ln2b_ref[d])
        h1 = jnp.dot(x2, f1w_ref[d], preferred_element_type=jnp.float32) + f1b_ref[d]
        h1 = _exact_gelu(h1)
        x = x + (jnp.dot(h1, f2w_ref[d], preferred_element_type=jnp.float32)
                 + f2b_ref[d])

    # --- final LayerNorm + classifier head on the cls token -----------------
    # LayerNorm is row-wise, so LN(x)[0] == LN(x[0:1]); only the cls row is
    # needed for the output.
    xf = _layernorm(x[0:1, :], ng_ref[...], nb_ref[...])
    o_ref[0] = (jnp.dot(xf, ow_ref[...], preferred_element_type=jnp.float32)
                + ob_ref[...])                               # (1, 128) lane-dense


# --------------------------------------------------------------------------
# Wrapper: only pure layout glue (patch im2col, final slice) stays in XLA
# --------------------------------------------------------------------------

def _const_spec(shape):
    zeros = (0,) * len(shape)
    return pl.BlockSpec(shape, lambda i, _z=zeros: _z)


def discriminator_forward(params, img, *, patch_size, heads, num_classes):
    # TODO(synk): DiffAugment depends on an external augmentation policy
    # string; with the empty policy it is the identity (implemented here).
    b, c, h, w = img.shape
    p = patch_size
    hp, wp = h // p, w // p
    n_patch = hp * wp
    cpp = c * p * p
    dim = params['patch_w'].shape[1]
    depth = params['fc1_w'].shape[0]
    hid = params['fc1_w'].shape[2]
    n_tok = n_patch + 1

    # Patch extraction (pure layout, == Conv2d(k=p, stride=p) as im2col matmul).
    patches = (img.reshape(b, c, hp, p, wp, p)
                  .transpose(0, 2, 4, 1, 3, 5)
                  .reshape(b, n_patch, cpp))

    scale = 1.0 / (dim ** 0.5)            # Attention.scale = 1/dim**0.5

    kernel = functools.partial(_discriminator_kernel,
                               depth=depth, heads=heads, scale=scale)

    out = pl.pallas_call(
        kernel,
        out_shape=jax.ShapeDtypeStruct((b, 1, NCLS_PAD), jnp.float32),
        grid=(b,),
        in_specs=[
            pl.BlockSpec((1, n_patch, cpp), lambda i: (i, 0, 0)),   # patches
            _const_spec((cpp, dim)), _const_spec((1, dim)),         # patch emb
            _const_spec((1, dim)), _const_spec((n_tok, dim)),       # cls, pos
            _const_spec((depth, 1, dim)), _const_spec((depth, 1, dim)),   # ln1
            _const_spec((depth, 1, dim)), _const_spec((depth, 1, dim)),   # ln2
            _const_spec((depth, dim, hid)), _const_spec((depth, 1, hid)), # fc1
            _const_spec((depth, hid, dim)), _const_spec((depth, 1, dim)), # fc2
            _const_spec((1, dim)), _const_spec((1, dim)),           # final norm
            _const_spec((dim, NCLS_PAD)), _const_spec((1, NCLS_PAD)),  # head
        ],
        out_specs=pl.BlockSpec((1, 1, NCLS_PAD), lambda i: (i, 0, 0)),
        scratch_shapes=[pltpu.VMEM((n_tok, dim), jnp.float32)],
        compiler_params=pltpu.CompilerParams(
            dimension_semantics=("parallel",)),   # batch across v7x's 2 TCs
    )(patches,
      params['patch_w'], params['patch_b'],
      params['cls_emb'], params['pos_emb'],
      params['ln1_g'], params['ln1_b'], params['ln2_g'], params['ln2_b'],
      params['fc1_w'], params['fc1_b'], params['fc2_w'], params['fc2_b'],
      params['norm_g'], params['norm_b'],
      params['out_w_pad'], params['out_b_pad'])

    # Drop the lane padding of the classifier head.
    return out[:, 0, :num_classes]


# --------------------------------------------------------------------------
# Parameter construction (kernel-friendly layout: stacked per-depth weights,
# (1, D) biases, lane-padded classifier head)
# --------------------------------------------------------------------------

def init_params(key, c_in, dim, patch_size, image_size, depth, mlp_ratio, num_classes):
    num_patches = (image_size // patch_size) ** 2
    n_tok = num_patches + 1
    hid = dim * mlp_ratio
    cpp = c_in * patch_size * patch_size
    keys = jax.random.split(key, 4 + 2 * depth)

    def tn(k_, shape, std):
        return std * jax.random.truncated_normal(k_, -2.0, 2.0, shape, jnp.float32)

    out_w = tn(keys[3], (dim, num_classes), 0.02)

    return {
        'patch_w': tn(keys[0], (cpp, dim), 0.02),
        'patch_b': jnp.zeros((1, dim), jnp.float32),
        'cls_emb': tn(keys[1], (1, dim), 0.2),
        'pos_emb': tn(keys[2], (n_tok, dim), 0.2),
        'norm_g': jnp.ones((1, dim), jnp.float32),
        'norm_b': jnp.zeros((1, dim), jnp.float32),
        # classifier head zero-padded to 128 lanes -> unmasked lane-dense store
        'out_w_pad': jnp.zeros((dim, NCLS_PAD), jnp.float32).at[:, :num_classes].set(out_w),
        'out_b_pad': jnp.zeros((1, NCLS_PAD), jnp.float32),
        # per-block params stacked over depth (single fused pallas_call)
        'ln1_g': jnp.ones((depth, 1, dim), jnp.float32),
        'ln1_b': jnp.zeros((depth, 1, dim), jnp.float32),
        'ln2_g': jnp.ones((depth, 1, dim), jnp.float32),
        'ln2_b': jnp.zeros((depth, 1, dim), jnp.float32),
        'fc1_w': jnp.stack([tn(keys[4 + 2 * i], (dim, hid), 0.02) for i in range(depth)]),
        'fc1_b': jnp.zeros((depth, 1, hid), jnp.float32),
        'fc2_w': jnp.stack([tn(keys[5 + 2 * i], (hid, dim), 0.02) for i in range(depth)]),
        'fc2_b': jnp.zeros((depth, 1, dim), jnp.float32),
    }


if __name__ == "__main__":
    key = jax.random.PRNGKey(0)
    kp, kx = jax.random.split(key)

    # Small config consistent with the module: image 16x16, patch 4 -> 16
    # patches (+1 cls = 17 tokens), dim=32, heads=4 (head_dim=8), depth=2,
    # mlp_ratio=4 (hidden=128), num_classes=1, batch=2.
    B, C, H, W = 2, 3, 16, 16
    DIM, DEPTH, HEADS, MLP_RATIO, PATCH, NCLS = 32, 2, 4, 4, 4, 1

    params = init_params(kp, C, DIM, PATCH, H, DEPTH, MLP_RATIO, NCLS)
    img = jax.random.normal(kx, (B, C, H, W), dtype=jnp.float32)

    fwd = jax.jit(functools.partial(discriminator_forward,
                                    patch_size=PATCH, heads=HEADS,
                                    num_classes=NCLS))
    out = jax.block_until_ready(fwd(params, img))
    assert out.shape == (B, NCLS), out.shape
    print("KERNEL_OK")
</pallas_src>

<mosaic_0001>
module attributes {stable_mosaic.version = 11 : i64} {
  func.func @_discriminator_kernel(%arg0: i32, %arg1: memref<1x16x48xf32, #tpu.memory_space<vmem>>, %arg2: memref<48x32xf32, #tpu.memory_space<vmem>>, %arg3: memref<1x32xf32, #tpu.memory_space<vmem>>, %arg4: memref<1x32xf32, #tpu.memory_space<vmem>>, %arg5: memref<17x32xf32, #tpu.memory_space<vmem>>, %arg6: memref<2x1x32xf32, #tpu.memory_space<vmem>>, %arg7: memref<2x1x32xf32, #tpu.memory_space<vmem>>, %arg8: memref<2x1x32xf32, #tpu.memory_space<vmem>>, %arg9: memref<2x1x32xf32, #tpu.memory_space<vmem>>, %arg10: memref<2x32x128xf32, #tpu.memory_space<vmem>>, %arg11: memref<2x1x128xf32, #tpu.memory_space<vmem>>, %arg12: memref<2x128x32xf32, #tpu.memory_space<vmem>>, %arg13: memref<2x1x32xf32, #tpu.memory_space<vmem>>, %arg14: memref<1x32xf32, #tpu.memory_space<vmem>>, %arg15: memref<1x32xf32, #tpu.memory_space<vmem>>, %arg16: memref<32x128xf32, #tpu.memory_space<vmem>>, %arg17: memref<1x128xf32, #tpu.memory_space<vmem>>, %arg18: memref<1x1x128xf32, #tpu.memory_space<vmem>>, %arg19: memref<17x32xf32, #tpu.memory_space<vmem>>) attributes {dimension_semantics = [#tpu.dimension_semantics<parallel>], iteration_bounds = array<i64: 2>, scalar_prefetch = 0 : i64, scratch_operands = 1 : i64, tpu.core_type = #tpu.core_type<tc>, window_params = [{transform_indices = @transform_0, window_bounds = array<i64: 1, 16, 48>}, {pipeline_mode = #tpu.pipeline_mode<synchronous>, transform_indices = @transform_1, window_bounds = array<i64: 48, 32>}, {pipeline_mode = #tpu.pipeline_mode<synchronous>, transform_indices = @transform_2, window_bounds = array<i64: 1, 32>}, {pipeline_mode = #tpu.pipeline_mode<synchronous>, transform_indices = @transform_3, window_bounds = array<i64: 1, 32>}, {pipeline_mode = #tpu.pipeline_mode<synchronous>, transform_indices = @transform_4, window_bounds = array<i64: 17, 32>}, {pipeline_mode = #tpu.pipeline_mode<synchronous>, transform_indices = @transform_5, window_bounds = array<i64: 2, 1, 32>}, {pipeline_mode = #tpu.pipeline_mode<synchronous>, transform_indices = @transform_6, window_bounds = array<i64: 2, 1, 32>}, {pipeline_mode = #tpu.pipeline_mode<synchronous>, transform_indices = @transform_7, window_bounds = array<i64: 2, 1, 32>}, {pipeline_mode = #tpu.pipeline_mode<synchronous>, transform_indices = @transform_8, window_bounds = array<i64: 2, 1, 32>}, {pipeline_mode = #tpu.pipeline_mode<synchronous>, transform_indices = @transform_9, window_bounds = array<i64: 2, 32, 128>}, {pipeline_mode = #tpu.pipeline_mode<synchronous>, transform_indices = @transform_10, window_bounds = array<i64: 2, 1, 128>}, {pipeline_mode = #tpu.pipeline_mode<synchronous>, transform_indices = @transform_11, window_bounds = array<i64: 2, 128, 32>}, {pipeline_mode = #tpu.pipeline_mode<synchronous>, transform_indices = @transform_12, window_bounds = array<i64: 2, 1, 32>}, {pipeline_mode = #tpu.pipeline_mode<synchronous>, transform_indices = @transform_13, window_bounds = array<i64: 1, 32>}, {pipeline_mode = #tpu.pipeline_mode<synchronous>, transform_indices = @transform_14, window_bounds = array<i64: 1, 32>}, {pipeline_mode = #tpu.pipeline_mode<synchronous>, transform_indices = @transform_15, window_bounds = array<i64: 32, 128>}, {pipeline_mode = #tpu.pipeline_mode<synchronous>, transform_indices = @transform_16, window_bounds = array<i64: 1, 128>}, {transform_indices = @transform_17, window_bounds = array<i64: 1, 1, 128>}]} {
    %c0 = arith.constant 0 : index
    %c0_0 = arith.constant 0 : index
    %c0_1 = arith.constant 0 : index
    %0 = vector.load %arg1[%c0, %c0_0, %c0_1] : memref<1x16x48xf32, #tpu.memory_space<vmem>>, vector<1x16x48xf32>
    %1 = vector.shape_cast %0 : vector<1x16x48xf32> to vector<16x48xf32>
    %c0_2 = arith.constant 0 : index
    %c0_3 = arith.constant 0 : index
    %2 = vector.load %arg2[%c0_2, %c0_3] : memref<48x32xf32, #tpu.memory_space<vmem>>, vector<48x32xf32>
    %cst = arith.constant dense<0.000000e+00> : vector<16x32xf32>
    %3 = tpu.matmul %1, %2, %cst {dimension_numbers = #tpu.dot_dimension_numbers<[1], [0], [0], [1], [0, 0, 1, 1], [], []>} : vector<16x48xf32>, vector<48x32xf32>, vector<16x32xf32> -> vector<16x32xf32>
    %c0_4 = arith.constant 0 : index
    %c0_5 = arith.constant 0 : index
    %4 = vector.load %arg3[%c0_4, %c0_5] : memref<1x32xf32, #tpu.memory_space<vmem>>, vector<1x32xf32>
    %5 = vector.broadcast %4 : vector<1x32xf32> to vector<16x32xf32>
    %6 = arith.addf %3, %5 : vector<16x32xf32>
    %c0_6 = arith.constant 0 : index
    %c0_7 = arith.constant 0 : index
    %7 = vector.load %arg4[%c0_6, %c0_7] : memref<1x32xf32, #tpu.memory_space<vmem>>, vector<1x32xf32>
    %c0_8 = arith.constant 0 : index
    %c0_9 = arith.constant 0 : index
    %8 = vector.load %arg19[%c0_8, %c0_9] : memref<17x32xf32, #tpu.memory_space<vmem>>, vector<1x32xf32>
    tpu.vector_store %arg19[%c0_8, %c0_9], %7 {strides = array<i32>} : memref<17x32xf32, #tpu.memory_space<vmem>>, vector<1x32xf32>,
    %c1 = arith.constant 1 : index
    %c0_10 = arith.constant 0 : index
    %9 = vector.load %arg19[%c1, %c0_10] : memref<17x32xf32, #tpu.memory_space<vmem>>, vector<16x32xf32>
    tpu.vector_store %arg19[%c1, %c0_10], %6 {strides = array<i32>} : memref<17x32xf32, #tpu.memory_space<vmem>>, vector<16x32xf32>,
    %c0_11 = arith.constant 0 : index
    %c0_12 = arith.constant 0 : index
    %10 = vector.load %arg19[%c0_11, %c0_12] : memref<17x32xf32, #tpu.memory_space<vmem>>, vector<17x32xf32>
    %c0_13 = arith.constant 0 : index
    %c0_14 = arith.constant 0 : index
    %11 = vector.load %arg5[%c0_13, %c0_14] : memref<17x32xf32, #tpu.memory_space<vmem>>, vector<17x32xf32>
    %12 = arith.addf %10, %11 : vector<17x32xf32>
    %c0_15 = arith.constant 0 : index
    %c0_16 = arith.constant 0 : index
    %c0_17 = arith.constant 0 : index
    %13 = vector.load %arg6[%c0_15, %c0_16, %c0_17] : memref<2x1x32xf32, #tpu.memory_space<vmem>>, vector<1x1x32xf32>
    %14 = vector.shape_cast %13 : vector<1x1x32xf32> to vector<1x32xf32>
    %c0_18 = arith.constant 0 : index
    %c0_19 = arith.constant 0 : index
    %c0_20 = arith.constant 0 : index
    %15 = vector.load %arg7[%c0_18, %c0_19, %c0_20] : memref<2x1x32xf32, #tpu.memory_space<vmem>>, vector<1x1x32xf32>
    %16 = vector.shape_cast %15 : vector<1x1x32xf32> to vector<1x32xf32>
    %cst_21 = arith.constant dense<0.000000e+00> : vector<17xf32>
    %17 = vector.multi_reduction <add>, %12, %cst_21 [1] : vector<17x32xf32> to vector<17xf32>
    %18 = vector.shape_cast %17 : vector<17xf32> to vector<17x1xf32>
    %cst_22 = arith.constant 3.200000e+01 : f32
    %19 = vector.broadcast %cst_22 : f32 to vector<17x1xf32>
    %20 = arith.divf %18, %19 : vector<17x1xf32>
    %21 = vector.broadcast %20 : vector<17x1xf32> to vector<17x32xf32>
    %22 = arith.subf %12, %21 : vector<17x32xf32>
    %23 = arith.mulf %22, %22 : vector<17x32xf32>
    %cst_23 = arith.constant dense<0.000000e+00> : vector<17xf32>
    %24 = vector.multi_reduction <add>, %23, %cst_23 [1] : vector<17x32xf32> to vector<17xf32>
    %25 = vector.shape_cast %24 : vector<17xf32> to vector<17x1xf32>
    %cst_24 = arith.constant 3.200000e+01 : f32
    %26 = vector.broadcast %cst_24 : f32 to vector<17x1xf32>
    %27 = arith.divf %25, %26 : vector<17x1xf32>
    %28 = vector.broadcast %20 : vector<17x1xf32> to vector<17x32xf32>
    %29 = arith.subf %12, %28 : vector<17x32xf32>
    %cst_25 = arith.constant 9.99999974E-6 : f32
    %30 = vector.broadcast %cst_25 : f32 to vector<17x1xf32>
    %31 = arith.addf %27, %30 : vector<17x1xf32>
    %32 = math.rsqrt %31 : vector<17x1xf32>
    %33 = vector.broadcast %32 : vector<17x1xf32> to vector<17x32xf32>
    %34 = arith.mulf %29, %33 : vector<17x32xf32>
    %35 = vector.broadcast %14 : vector<1x32xf32> to vector<17x32xf32>
    %36 = arith.mulf %34, %35 : vector<17x32xf32>
    %37 = vector.broadcast %16 : vector<1x32xf32> to vector<17x32xf32>
    %38 = arith.addf %36, %37 : vector<17x32xf32>
    %39 = vector.extract_strided_slice %38 {offsets = [0, 0], sizes = [17, 8], strides = [1, 1]} : vector<17x32xf32> to vector<17x8xf32>
    %cst_26 = arith.constant dense<0.000000e+00> : vector<17x17xf32>
    %40 = tpu.matmul %39, %39, %cst_26 {dimension_numbers = #tpu.dot_dimension_numbers<[1], [1], [0], [0], [0, 0, 1, 0], [], []>} : vector<17x8xf32>, vector<17x8xf32>, vector<17x17xf32> -> vector<17x17xf32>
    %cst_27 = arith.constant 0.176776692 : f32
    %41 = vector.broadcast %cst_27 : f32 to vector<17x17xf32>
    %42 = arith.mulf %40, %41 : vector<17x17xf32>
    %cst_28 = arith.constant dense<0xFF800000> : vector<17xf32>
    %43 = vector.multi_reduction <maximumf>, %42, %cst_28 [1] : vector<17x17xf32> to vector<17xf32>
    %44 = vector.shape_cast %43 : vector<17xf32> to vector<17x1xf32>
    %45 = vector.broadcast %44 : vector<17x1xf32> to vector<17x17xf32>
    %46 = arith.subf %42, %45 : vector<17x17xf32>
    %47 = math.exp %46 : vector<17x17xf32>
    %cst_29 = arith.constant dense<0.000000e+00> : vector<17xf32>
    %48 = vector.multi_reduction <add>, %47, %cst_29 [1] : vector<17x17xf32> to vector<17xf32>
    %49 = vector.shape_cast %48 : vector<17xf32> to vector<17x1xf32>
    %50 = tpu.reciprocal %49 {approx = true} : vector<17x1xf32> -> vector<17x1xf32>
    %51 = vector.broadcast %50 : vector<17x1xf32> to vector<17x17xf32>
    %52 = arith.mulf %47, %51 : vector<17x17xf32>
    %cst_30 = arith.constant dense<0.000000e+00> : vector<17x8xf32>
    %53 = tpu.matmul %52, %39, %cst_30 {dimension_numbers = #tpu.dot_dimension_numbers<[1], [0], [0], [1], [0, 0, 1, 1], [], []>} : vector<17x17xf32>, vector<17x8xf32>, vector<17x8xf32> -> vector<17x8xf32>
    %c0_31 = arith.constant 0 : index
    %c0_32 = arith.constant 0 : index
    %54 = vector.load %arg19[%c0_31, %c0_32] : memref<17x32xf32, #tpu.memory_space<vmem>>, vector<17x8xf32>
    tpu.vector_store %arg19[%c0_31, %c0_32], %53 {strides = array<i32>} : memref<17x32xf32, #tpu.memory_space<vmem>>, vector<17x8xf32>,
    %55 = vector.extract_strided_slice %38 {offsets = [0, 8], sizes = [17, 8], strides = [1, 1]} : vector<17x32xf32> to vector<17x8xf32>
    %cst_33 = arith.constant dense<0.000000e+00> : vector<17x17xf32>
    %56 = tpu.matmul %55, %55, %cst_33 {dimension_numbers = #tpu.dot_dimension_numbers<[1], [1], [0], [0], [0, 0, 1, 0], [], []>} : vector<17x8xf32>, vector<17x8xf32>, vector<17x17xf32> -> vector<17x17xf32>
    %cst_34 = arith.constant 0.176776692 : f32
    %57 = vector.broadcast %cst_34 : f32 to vector<17x17xf32>
    %58 = arith.mulf %56, %57 : vector<17x17xf32>
    %cst_35 = arith.constant dense<0xFF800000> : vector<17xf32>
    %59 = vector.multi_reduction <maximumf>, %58, %cst_35 [1] : vector<17x17xf32> to vector<17xf32>
    %60 = vector.shape_cast %59 : vector<17xf32> to vector<17x1xf32>
    %61 = vector.broadcast %60 : vector<17x1xf32> to vector<17x17xf32>
    %62 = arith.subf %58, %61 : vector<17x17xf32>
    %63 = math.exp %62 : vector<17x17xf32>
    %cst_36 = arith.constant dense<0.000000e+00> : vector<17xf32>
    %64 = vector.multi_reduction <add>, %63, %cst_36 [1] : vector<17x17xf32> to vector<17xf32>
    %65 = vector.shape_cast %64 : vector<17xf32> to vector<17x1xf32>
    %66 = tpu.reciprocal %65 {approx = true} : vector<17x1xf32> -> vector<17x1xf32>
    %67 = vector.broadcast %66 : vector<17x1xf32> to vector<17x17xf32>
    %68 = arith.mulf %63, %67 : vector<17x17xf32>
    %cst_37 = arith.constant dense<0.000000e+00> : vector<17x8xf32>
    %69 = tpu.matmul %68, %55, %cst_37 {dimension_numbers = #tpu.dot_dimension_numbers<[1], [0], [0], [1], [0, 0, 1, 1], [], []>} : vector<17x17xf32>, vector<17x8xf32>, vector<17x8xf32> -> vector<17x8xf32>
    %c0_38 = arith.constant 0 : index
    %c8 = arith.constant 8 : index
    %70 = vector.load %arg19[%c0_38, %c8] : memref<17x32xf32, #tpu.memory_space<vmem>>, vector<17x8xf32>
    tpu.vector_store %arg19[%c0_38, %c8], %69 {strides = array<i32>} : memref<17x32xf32, #tpu.memory_space<vmem>>, vector<17x8xf32>,
    %71 = vector.extract_strided_slice %38 {offsets = [0, 16], sizes = [17, 8], strides = [1, 1]} : vector<17x32xf32> to vector<17x8xf32>
    %cst_39 = arith.constant dense<0.000000e+00> : vector<17x17xf32>
    %72 = tpu.matmul %71, %71, %cst_39 {dimension_numbers = #tpu.dot_dimension_numbers<[1], [1], [0], [0], [0, 0, 1, 0], [], []>} : vector<17x8xf32>, vector<17x8xf32>, vector<17x17xf32> -> vector<17x17xf32>
    %cst_40 = arith.constant 0.176776692 : f32
    %73 = vector.broadcast %cst_40 : f32 to vector<17x17xf32>
    %74 = arith.mulf %72, %73 : vector<17x17xf32>
    %cst_41 = arith.constant dense<0xFF800000> : vector<17xf32>
    %75 = vector.multi_reduction <maximumf>, %74, %cst_41 [1] : vector<17x17xf32> to vector<17xf32>
    %76 = vector.shape_cast %75 : vector<17xf32> to vector<17x1xf32>
    %77 = vector.broadcast %76 : vector<17x1xf32> to vector<17x17xf32>
    %78 = arith.subf %74, %77 : vector<17x17xf32>
    %79 = math.exp %78 : vector<17x17xf32>
    %cst_42 = arith.constant dense<0.000000e+00> : vector<17xf32>
    %80 = vector.multi_reduction <add>, %79, %cst_42 [1] : vector<17x17xf32> to vector<17xf32>
    %81 = vector.shape_cast %80 : vector<17xf32> to vector<17x1xf32>
    %82 = tpu.reciprocal %81 {approx = true} : vector<17x1xf32> -> vector<17x1xf32>
    %83 = vector.broadcast %82 : vector<17x1xf32> to vector<17x17xf32>
    %84 = arith.mulf %79, %83 : vector<17x17xf32>
    %cst_43 = arith.constant dense<0.000000e+00> : vector<17x8xf32>
    %85 = tpu.matmul %84, %71, %cst_43 {dimension_numbers = #tpu.dot_dimension_numbers<[1], [0], [0], [1], [0, 0, 1, 1], [], []>} : vector<17x17xf32>, vector<17x8xf32>, vector<17x8xf32> -> vector<17x8xf32>
    %c0_44 = arith.constant 0 : index
    %c16 = arith.constant 16 : index
    %86 = vector.load %arg19[%c0_44, %c16] : memref<17x32xf32, #tpu.memory_space<vmem>>, vector<17x8xf32>
    tpu.vector_store %arg19[%c0_44, %c16], %85 {strides = array<i32>} : memref<17x32xf32, #tpu.memory_space<vmem>>, vector<17x8xf32>,
    %87 = vector.extract_strided_slice %38 {offsets = [0, 24], sizes = [17, 8], strides = [1, 1]} : vector<17x32xf32> to vector<17x8xf32>
    %cst_45 = arith.constant dense<0.000000e+00> : vector<17x17xf32>
    %88 = tpu.matmul %87, %87, %cst_45 {dimension_numbers = #tpu.dot_dimension_numbers<[1], [1], [0], [0], [0, 0, 1, 0], [], []>} : vector<17x8xf32>, vector<17x8xf32>, vector<17x17xf32> -> vector<17x17xf32>
    %cst_46 = arith.constant 0.176776692 : f32
    %89 = vector.broadcast %cst_46 : f32 to vector<17x17xf32>
    %90 = arith.mulf %88, %89 : vector<17x17xf32>
    %cst_47 = arith.constant dense<0xFF800000> : vector<17xf32>
    %91 = vector.multi_reduction <maximumf>, %90, %cst_47 [1] : vector<17x17xf32> to vector<17xf32>
    %92 = vector.shape_cast %91 : vector<17xf32> to vector<17x1xf32>
    %93 = vector.broadcast %92 : vector<17x1xf32> to vector<17x17xf32>
    %94 = arith.subf %90, %93 : vector<17x17xf32>
    %95 = math.exp %94 : vector<17x17xf32>
    %cst_48 = arith.constant dense<0.000000e+00> : vector<17xf32>
    %96 = vector.multi_reduction <add>, %95, %cst_48 [1] : vector<17x17xf32> to vector<17xf32>
    %97 = vector.shape_cast %96 : vector<17xf32> to vector<17x1xf32>
    %98 = tpu.reciprocal %97 {approx = true} : vector<17x1xf32> -> vector<17x1xf32>
    %99 = vector.broadcast %98 : vector<17x1xf32> to vector<17x17xf32>
    %100 = arith.mulf %95, %99 : vector<17x17xf32>
    %cst_49 = arith.constant dense<0.000000e+00> : vector<17x8xf32>
    %101 = tpu.matmul %100, %87, %cst_49 {dimension_numbers = #tpu.dot_dimension_numbers<[1], [0], [0], [1], [0, 0, 1, 1], [], []>} : vector<17x17xf32>, vector<17x8xf32>, vector<17x8xf32> -> vector<17x8xf32>
    %c0_50 = arith.constant 0 : index
    %c24 = arith.constant 24 : index
    %102 = vector.load %arg19[%c0_50, %c24] : memref<17x32xf32, #tpu.memory_space<vmem>>, vector<17x8xf32>
    tpu.vector_store %arg19[%c0_50, %c24], %101 {strides = array<i32>} : memref<17x32xf32, #tpu.memory_space<vmem>>, vector<17x8xf32>,
    %c0_51 = arith.constant 0 : index
    %c0_52 = arith.constant 0 : index
    %103 = vector.load %arg19[%c0_51, %c0_52] : memref<17x32xf32, #tpu.memory_space<vmem>>, vector<17x32xf32>
    %104 = arith.addf %12, %103 : vector<17x32xf32>
    %c0_53 = arith.constant 0 : index
    %c0_54 = arith.constant 0 : index
    %c0_55 = arith.constant 0 : index
    %105 = vector.load %arg8[%c0_53, %c0_54, %c0_55] : memref<2x1x32xf32, #tpu.memory_space<vmem>>, vector<1x1x32xf32>
    %106 = vector.shape_cast %105 : vector<1x1x32xf32> to vector<1x32xf32>
    %c0_56 = arith.constant 0 : index
    %c0_57 = arith.constant 0 : index
    %c0_58 = arith.constant 0 : index
    %107 = vector.load %arg9[%c0_56, %c0_57, %c0_58] : memref<2x1x32xf32, #tpu.memory_space<vmem>>, vector<1x1x32xf32>
    %108 = vector.shape_cast %107 : vector<1x1x32xf32> to vector<1x32xf32>
    %cst_59 = arith.constant dense<0.000000e+00> : vector<17xf32>
    %109 = vector.multi_reduction <add>, %104, %cst_59 [1] : vector<17x32xf32> to vector<17xf32>
    %110 = vector.shape_cast %109 : vector<17xf32> to vector<17x1xf32>
    %cst_60 = arith.constant 3.200000e+01 : f32
    %111 = vector.broadcast %cst_60 : f32 to vector<17x1xf32>
    %112 = arith.divf %110, %111 : vector<17x1xf32>
    %113 = vector.broadcast %112 : vector<17x1xf32> to vector<17x32xf32>
    %114 = arith.subf %104, %113 : vector<17x32xf32>
    %115 = arith.mulf %114, %114 : vector<17x32xf32>
    %cst_61 = arith.constant dense<0.000000e+00> : vector<17xf32>
    %116 = vector.multi_reduction <add>, %115, %cst_61 [1] : vector<17x32xf32> to vector<17xf32>
    %117 = vector.shape_cast %116 : vector<17xf32> to vector<17x1xf32>
    %cst_62 = arith.constant 3.200000e+01 : f32
    %118 = vector.broadcast %cst_62 : f32 to vector<17x1xf32>
    %119 = arith.divf %117, %118 : vector<17x1xf32>
    %120 = vector.broadcast %112 : vector<17x1xf32> to vector<17x32xf32>
    %121 = arith.subf %104, %120 : vector<17x32xf32>
    %cst_63 = arith.constant 9.99999974E-6 : f32
    %122 = vector.broadcast %cst_63 : f32 to vector<17x1xf32>
    %123 = arith.addf %119, %122 : vector<17x1xf32>
    %124 = math.rsqrt %123 : vector<17x1xf32>
    %125 = vector.broadcast %124 : vector<17x1xf32> to vector<17x32xf32>
    %126 = arith.mulf %121, %125 : vector<17x32xf32>
    %127 = vector.broadcast %106 : vector<1x32xf32> to vector<17x32xf32>
    %128 = arith.mulf %126, %127 : vector<17x32xf32>
    %129 = vector.broadcast %108 : vector<1x32xf32> to vector<17x32xf32>
    %130 = arith.addf %128, %129 : vector<17x32xf32>
    %c0_64 = arith.constant 0 : index
    %c0_65 = arith.constant 0 : index
    %c0_66 = arith.constant 0 : index
    %131 = vector.load %arg10[%c0_64, %c0_65, %c0_66] : memref<2x32x128xf32, #tpu.memory_space<vmem>>, vector<1x32x128xf32>
    %132 = vector.shape_cast %131 : vector<1x32x128xf32> to vector<32x128xf32>
    %cst_67 = arith.constant dense<0.000000e+00> : vector<17x128xf32>
    %133 = tpu.matmul %130, %132, %cst_67 {dimension_numbers = #tpu.dot_dimension_numbers<[1], [0], [0], [1], [0, 0, 1, 1], [], []>} : vector<17x32xf32>, vector<32x128xf32>, vector<17x128xf32> -> vector<17x128xf32>
    %c0_68 = arith.constant 0 : index
    %c0_69 = arith.constant 0 : index
    %c0_70 = arith.constant 0 : index
    %134 = vector.load %arg11[%c0_68, %c0_69, %c0_70] : memref<2x1x128xf32, #tpu.memory_space<vmem>>, vector<1x1x128xf32>
    %135 = vector.shape_cast %134 : vector<1x1x128xf32> to vector<1x128xf32>
    %136 = vector.broadcast %135 : vector<1x128xf32> to vector<17x128xf32>
    %137 = arith.addf %133, %136 : vector<17x128xf32>
    %cst_71 = arith.constant 0.707106769 : f32
    %138 = vector.broadcast %cst_71 : f32 to vector<17x128xf32>
    %139 = arith.mulf %137, %138 : vector<17x128xf32>
    %cst_72 = arith.constant 0.000000e+00 : f32
    %140 = vector.broadcast %cst_72 : f32 to vector<17x128xf32>
    %141 = arith.cmpf oge, %139, %140 : vector<17x128xf32>
    %cst_73 = arith.constant 1.000000e+00 : f32
    %cst_74 = arith.constant -1.000000e+00 : f32
    %142 = vector.broadcast %cst_73 : f32 to vector<17x128xf32>
    %143 = vector.broadcast %cst_74 : f32 to vector<17x128xf32>
    %144 = arith.select %141, %142, %143 : vector<17x128xi1>, vector<17x128xf32>
    %145 = math.absf %139 : vector<17x128xf32>
    %cst_75 = arith.constant 0.327591091 : f32
    %146 = vector.broadcast %cst_75 : f32 to vector<17x128xf32>
    %147 = arith.mulf %146, %145 : vector<17x128xf32>
    %cst_76 = arith.constant 1.000000e+00 : f32
    %148 = vector.broadcast %cst_76 : f32 to vector<17x128xf32>
    %149 = arith.addf %148, %147 : vector<17x128xf32>
    %cst_77 = arith.constant 1.000000e+00 : f32
    %150 = vector.broadcast %cst_77 : f32 to vector<17x128xf32>
    %151 = arith.divf %150, %149 : vector<17x128xf32>
    %cst_78 = arith.constant 1.06140542 : f32
    %152 = vector.broadcast %cst_78 : f32 to vector<17x128xf32>
    %153 = arith.mulf %152, %151 : vector<17x128xf32>
    %cst_79 = arith.constant -1.45315206 : f32
    %154 = vector.broadcast %cst_79 : f32 to vector<17x128xf32>
    %155 = arith.addf %153, %154 : vector<17x128xf32>
    %156 = arith.mulf %155, %151 : vector<17x128xf32>
    %cst_80 = arith.constant 1.42141378 : f32
    %157 = vector.broadcast %cst_80 : f32 to vector<17x128xf32>
    %158 = arith.addf %156, %157 : vector<17x128xf32>
    %159 = arith.mulf %158, %151 : vector<17x128xf32>
    %cst_81 = arith.constant -0.284496725 : f32
    %160 = vector.broadcast %cst_81 : f32 to vector<17x128xf32>
    %161 = arith.addf %159, %160 : vector<17x128xf32>
    %162 = arith.mulf %161, %151 : vector<17x128xf32>
    %cst_82 = arith.constant 0.254829586 : f32
    %163 = vector.broadcast %cst_82 : f32 to vector<17x128xf32>
    %164 = arith.addf %162, %163 : vector<17x128xf32>
    %165 = arith.mulf %164, %151 : vector<17x128xf32>
    %cst_83 = arith.constant 0.000000e+00 : f32
    %166 = vector.broadcast %cst_83 : f32 to vector<17x128xf32>
    %167 = arith.subf %166, %145 : vector<17x128xf32>
    %168 = arith.mulf %167, %145 : vector<17x128xf32>
    %169 = math.exp %168 : vector<17x128xf32>
    %170 = arith.mulf %165, %169 : vector<17x128xf32>
    %cst_84 = arith.constant 1.000000e+00 : f32
    %171 = vector.broadcast %cst_84 : f32 to vector<17x128xf32>
    %172 = arith.subf %171, %170 : vector<17x128xf32>
    %173 = arith.mulf %144, %172 : vector<17x128xf32>
    %cst_85 = arith.constant 5.000000e-01 : f32
    %174 = vector.broadcast %cst_85 : f32 to vector<17x128xf32>
    %175 = arith.mulf %174, %137 : vector<17x128xf32>
    %cst_86 = arith.constant 1.000000e+00 : f32
    %176 = vector.broadcast %cst_86 : f32 to vector<17x128xf32>
    %177 = arith.addf %176, %173 : vector<17x128xf32>
    %178 = arith.mulf %175, %177 : vector<17x128xf32>
    %c0_87 = arith.constant 0 : index
    %c0_88 = arith.constant 0 : index
    %c0_89 = arith.constant 0 : index
    %179 = vector.load %arg12[%c0_87, %c0_88, %c0_89] : memref<2x128x32xf32, #tpu.memory_space<vmem>>, vector<1x128x32xf32>
    %180 = vector.shape_cast %179 : vector<1x128x32xf32> to vector<128x32xf32>
    %cst_90 = arith.constant dense<0.000000e+00> : vector<17x32xf32>
    %181 = tpu.matmul %178, %180, %cst_90 {dimension_numbers = #tpu.dot_dimension_numbers<[1], [0], [0], [1], [0, 0, 1, 1], [], []>} : vector<17x128xf32>, vector<128x32xf32>, vector<17x32xf32> -> vector<17x32xf32>
    %c0_91 = arith.constant 0 : index
    %c0_92 = arith.constant 0 : index
    %c0_93 = arith.constant 0 : index
    %182 = vector.load %arg13[%c0_91, %c0_92, %c0_93] : memref<2x1x32xf32, #tpu.memory_space<vmem>>, vector<1x1x32xf32>
    %183 = vector.shape_cast %182 : vector<1x1x32xf32> to vector<1x32xf32>
    %184 = vector.broadcast %183 : vector<1x32xf32> to vector<17x32xf32>
    %185 = arith.addf %181, %184 : vector<17x32xf32>
    %186 = arith.addf %104, %185 : vector<17x32xf32>
    %c1_94 = arith.constant 1 : index
    %c0_95 = arith.constant 0 : index
    %c0_96 = arith.constant 0 : index
    %187 = vector.load %arg6[%c1_94, %c0_95, %c0_96] : memref<2x1x32xf32, #tpu.memory_space<vmem>>, vector<1x1x32xf32>
    %188 = vector.shape_cast %187 : vector<1x1x32xf32> to vector<1x32xf32>
    %c1_97 = arith.constant 1 : index
    %c0_98 = arith.constant 0 : index
    %c0_99 = arith.constant 0 : index
    %189 = vector.load %arg7[%c1_97, %c0_98, %c0_99] : memref<2x1x32xf32, #tpu.memory_space<vmem>>, vector<1x1x32xf32>
    %190 = vector.shape_cast %189 : vector<1x1x32xf32> to vector<1x32xf32>
    %cst_100 = arith.constant dense<0.000000e+00> : vector<17xf32>
    %191 = vector.multi_reduction <add>, %186, %cst_100 [1] : vector<17x32xf32> to vector<17xf32>
    %192 = vector.shape_cast %191 : vector<17xf32> to vector<17x1xf32>
    %cst_101 = arith.constant 3.200000e+01 : f32
    %193 = vector.broadcast %cst_101 : f32 to vector<17x1xf32>
    %194 = arith.divf %192, %193 : vector<17x1xf32>
    %195 = vector.broadcast %194 : vector<17x1xf32> to vector<17x32xf32>
    %196 = arith.subf %186, %195 : vector<17x32xf32>
    %197 = arith.mulf %196, %196 : vector<17x32xf32>
    %cst_102 = arith.constant dense<0.000000e+00> : vector<17xf32>
    %198 = vector.multi_reduction <add>, %197, %cst_102 [1] : vector<17x32xf32> to vector<17xf32>
    %199 = vector.shape_cast %198 : vector<17xf32> to vector<17x1xf32>
    %cst_103 = arith.constant 3.200000e+01 : f32
    %200 = vector.broadcast %cst_103 : f32 to vector<17x1xf32>
    %201 = arith.divf %199, %200 : vector<17x1xf32>
    %202 = vector.broadcast %194 : vector<17x1xf32> to vector<17x32xf32>
    %203 = arith.subf %186, %202 : vector<17x32xf32>
    %cst_104 = arith.constant 9.99999974E-6 : f32
    %204 = vector.broadcast %cst_104 : f32 to vector<17x1xf32>
    %205 = arith.addf %201, %204 : vector<17x1xf32>
    %206 = math.rsqrt %205 : vector<17x1xf32>
    %207 = vector.broadcast %206 : vector<17x1xf32> to vector<17x32xf32>
    %208 = arith.mulf %203, %207 : vector<17x32xf32>
    %209 = vector.broadcast %188 : vector<1x32xf32> to vector<17x32xf32>
    %210 = arith.mulf %208, %209 : vector<17x32xf32>
    %211 = vector.broadcast %190 : vector<1x32xf32> to vector<17x32xf32>
    %212 = arith.addf %210, %211 : vector<17x32xf32>
    %213 = vector.extract_strided_slice %212 {offsets = [0, 0], sizes = [17, 8], strides = [1, 1]} : vector<17x32xf32> to vector<17x8xf32>
    %cst_105 = arith.constant dense<0.000000e+00> : vector<17x17xf32>
    %214 = tpu.matmul %213, %213, %cst_105 {dimension_numbers = #tpu.dot_dimension_numbers<[1], [1], [0], [0], [0, 0, 1, 0], [], []>} : vector<17x8xf32>, vector<17x8xf32>, vector<17x17xf32> -> vector<17x17xf32>
    %cst_106 = arith.constant 0.176776692 : f32
    %215 = vector.broadcast %cst_106 : f32 to vector<17x17xf32>
    %216 = arith.mulf %214, %215 : vector<17x17xf32>
    %cst_107 = arith.constant dense<0xFF800000> : vector<17xf32>
    %217 = vector.multi_reduction <maximumf>, %216, %cst_107 [1] : vector<17x17xf32> to vector<17xf32>
    %218 = vector.shape_cast %217 : vector<17xf32> to vector<17x1xf32>
    %219 = vector.broadcast %218 : vector<17x1xf32> to vector<17x17xf32>
    %220 = arith.subf %216, %219 : vector<17x17xf32>
    %221 = math.exp %220 : vector<17x17xf32>
    %cst_108 = arith.constant dense<0.000000e+00> : vector<17xf32>
    %222 = vector.multi_reduction <add>, %221, %cst_108 [1] : vector<17x17xf32> to vector<17xf32>
    %223 = vector.shape_cast %222 : vector<17xf32> to vector<17x1xf32>
    %224 = tpu.reciprocal %223 {approx = true} : vector<17x1xf32> -> vector<17x1xf32>
    %225 = vector.broadcast %224 : vector<17x1xf32> to vector<17x17xf32>
    %226 = arith.mulf %221, %225 : vector<17x17xf32>
    %cst_109 = arith.constant dense<0.000000e+00> : vector<17x8xf32>
    %227 = tpu.matmul %226, %213, %cst_109 {dimension_numbers = #tpu.dot_dimension_numbers<[1], [0], [0], [1], [0, 0, 1, 1], [], []>} : vector<17x17xf32>, vector<17x8xf32>, vector<17x8xf32> -> vector<17x8xf32>
    %c0_110 = arith.constant 0 : index
    %c0_111 = arith.constant 0 : index
    %228 = vector.load %arg19[%c0_110, %c0_111] : memref<17x32xf32, #tpu.memory_space<vmem>>, vector<17x8xf32>
    tpu.vector_store %arg19[%c0_110, %c0_111], %227 {strides = array<i32>} : memref<17x32xf32, #tpu.memory_space<vmem>>, vector<17x8xf32>,
    %229 = vector.extract_strided_slice %212 {offsets = [0, 8], sizes = [17, 8], strides = [1, 1]} : vector<17x32xf32> to vector<17x8xf32>
    %cst_112 = arith.constant dense<0.000000e+00> : vector<17x17xf32>
    %230 = tpu.matmul %229, %229, %cst_112 {dimension_numbers = #tpu.dot_dimension_numbers<[1], [1], [0], [0], [0, 0, 1, 0], [], []>} : vector<17x8xf32>, vector<17x8xf32>, vector<17x17xf32> -> vector<17x17xf32>
    %cst_113 = arith.constant 0.176776692 : f32
    %231 = vector.broadcast %cst_113 : f32 to vector<17x17xf32>
    %232 = arith.mulf %230, %231 : vector<17x17xf32>
    %cst_114 = arith.constant dense<0xFF800000> : vector<17xf32>
    %233 = vector.multi_reduction <maximumf>, %232, %cst_114 [1] : vector<17x17xf32> to vector<17xf32>
    %234 = vector.shape_cast %233 : vector<17xf32> to vector<17x1xf32>
    %235 = vector.broadcast %234 : vector<17x1xf32> to vector<17x17xf32>
    %236 = arith.subf %232, %235 : vector<17x17xf32>
    %237 = math.exp %236 : vector<17x17xf32>
    %cst_115 = arith.constant dense<0.000000e+00> : vector<17xf32>
    %238 = vector.multi_reduction <add>, %237, %cst_115 [1] : vector<17x17xf32> to vector<17xf32>
    %239 = vector.shape_cast %238 : vector<17xf32> to vector<17x1xf32>
    %240 = tpu.reciprocal %239 {approx = true} : vector<17x1xf32> -> vector<17x1xf32>
    %241 = vector.broadcast %240 : vector<17x1xf32> to vector<17x17xf32>
    %242 = arith.mulf %237, %241 : vector<17x17xf32>
    %cst_116 = arith.constant dense<0.000000e+00> : vector<17x8xf32>
    %243 = tpu.matmul %242, %229, %cst_116 {dimension_numbers = #tpu.dot_dimension_numbers<[1], [0], [0], [1], [0, 0, 1, 1], [], []>} : vector<17x17xf32>, vector<17x8xf32>, vector<17x8xf32> -> vector<17x8xf32>
    %c0_117 = arith.constant 0 : index
    %c8_118 = arith.constant 8 : index
    %244 = vector.load %arg19[%c0_117, %c8_118] : memref<17x32xf32, #tpu.memory_space<vmem>>, vector<17x8xf32>
    tpu.vector_store %arg19[%c0_117, %c8_118], %243 {strides = array<i32>} : memref<17x32xf32, #tpu.memory_space<vmem>>, vector<17x8xf32>,
    %245 = vector.extract_strided_slice %212 {offsets = [0, 16], sizes = [17, 8], strides = [1, 1]} : vector<17x32xf32> to vector<17x8xf32>
    %cst_119 = arith.constant dense<0.000000e+00> : vector<17x17xf32>
    %246 = tpu.matmul %245, %245, %cst_119 {dimension_numbers = #tpu.dot_dimension_numbers<[1], [1], [0], [0], [0, 0, 1, 0], [], []>} : vector<17x8xf32>, vector<17x8xf32>, vector<17x17xf32> -> vector<17x17xf32>
    %cst_120 = arith.constant 0.176776692 : f32
    %247 = vector.broadcast %cst_120 : f32 to vector<17x17xf32>
    %248 = arith.mulf %246, %247 : vector<17x17xf32>
    %cst_121 = arith.constant dense<0xFF800000> : vector<17xf32>
    %249 = vector.multi_reduction <maximumf>, %248, %cst_121 [1] : vector<17x17xf32> to vector<17xf32>
    %250 = vector.shape_cast %249 : vector<17xf32> to vector<17x1xf32>
    %251 = vector.broadcast %250 : vector<17x1xf32> to vector<17x17xf32>
    %252 = arith.subf %248, %251 : vector<17x17xf32>
    %253 = math.exp %252 : vector<17x17xf32>
    %cst_122 = arith.constant dense<0.000000e+00> : vector<17xf32>
    %254 = vector.multi_reduction <add>, %253, %cst_122 [1] : vector<17x17xf32> to vector<17xf32>
    %255 = vector.shape_cast %254 : vector<17xf32> to vector<17x1xf32>
    %256 = tpu.reciprocal %255 {approx = true} : vector<17x1xf32> -> vector<17x1xf32>
    %257 = vector.broadcast %256 : vector<17x1xf32> to vector<17x17xf32>
    %258 = arith.mulf %253, %257 : vector<17x17xf32>
    %cst_123 = arith.constant dense<0.000000e+00> : vector<17x8xf32>
    %259 = tpu.matmul %258, %245, %cst_123 {dimension_numbers = #tpu.dot_dimension_numbers<[1], [0], [0], [1], [0, 0, 1, 1], [], []>} : vector<17x17xf32>, vector<17x8xf32>, vector<17x8xf32> -> vector<17x8xf32>
    %c0_124 = arith.constant 0 : index
    %c16_125 = arith.constant 16 : index
    %260 = vector.load %arg19[%c0_124, %c16_125] : memref<17x32xf32, #tpu.memory_space<vmem>>, vector<17x8xf32>
    tpu.vector_store %arg19[%c0_124, %c16_125], %259 {strides = array<i32>} : memref<17x32xf32, #tpu.memory_space<vmem>>, vector<17x8xf32>,
    %261 = vector.extract_strided_slice %212 {offsets = [0, 24], sizes = [17, 8], strides = [1, 1]} : vector<17x32xf32> to vector<17x8xf32>
    %cst_126 = arith.constant dense<0.000000e+00> : vector<17x17xf32>
    %262 = tpu.matmul %261, %261, %cst_126 {dimension_numbers = #tpu.dot_dimension_numbers<[1], [1], [0], [0], [0, 0, 1, 0], [], []>} : vector<17x8xf32>, vector<17x8xf32>, vector<17x17xf32> -> vector<17x17xf32>
    %cst_127 = arith.constant 0.176776692 : f32
    %263 = vector.broadcast %cst_127 : f32 to vector<17x17xf32>
    %264 = arith.mulf %262, %263 : vector<17x17xf32>
    %cst_128 = arith.constant dense<0xFF800000> : vector<17xf32>
    %265 = vector.multi_reduction <maximumf>, %264, %cst_128 [1] : vector<17x17xf32> to vector<17xf32>
    %266 = vector.shape_cast %265 : vector<17xf32> to vector<17x1xf32>
    %267 = vector.broadcast %266 : vector<17x1xf32> to vector<17x17xf32>
    %268 = arith.subf %264, %267 : vector<17x17xf32>
    %269 = math.exp %268 : vector<17x17xf32>
    %cst_129 = arith.constant dense<0.000000e+00> : vector<17xf32>
    %270 = vector.multi_reduction <add>, %269, %cst_129 [1] : vector<17x17xf32> to vector<17xf32>
    %271 = vector.shape_cast %270 : vector<17xf32> to vector<17x1xf32>
    %272 = tpu.reciprocal %271 {approx = true} : vector<17x1xf32> -> vector<17x1xf32>
    %273 = vector.broadcast %272 : vector<17x1xf32> to vector<17x17xf32>
    %274 = arith.mulf %269, %273 : vector<17x17xf32>
    %cst_130 = arith.constant dense<0.000000e+00> : vector<17x8xf32>
    %275 = tpu.matmul %274, %261, %cst_130 {dimension_numbers = #tpu.dot_dimension_numbers<[1], [0], [0], [1], [0, 0, 1, 1], [], []>} : vector<17x17xf32>, vector<17x8xf32>, vector<17x8xf32> -> vector<17x8xf32>
    %c0_131 = arith.constant 0 : index
    %c24_132 = arith.constant 24 : index
    %276 = vector.load %arg19[%c0_131, %c24_132] : memref<17x32xf32, #tpu.memory_space<vmem>>, vector<17x8xf32>
    tpu.vector_store %arg19[%c0_131, %c24_132], %275 {strides = array<i32>} : memref<17x32xf32, #tpu.memory_space<vmem>>, vector<17x8xf32>,
    %c0_133 = arith.constant 0 : index
    %c0_134 = arith.constant 0 : index
    %277 = vector.load %arg19[%c0_133, %c0_134] : memref<17x32xf32, #tpu.memory_space<vmem>>, vector<17x32xf32>
    %278 = arith.addf %186, %277 : vector<17x32xf32>
    %c1_135 = arith.constant 1 : index
    %c0_136 = arith.constant 0 : index
    %c0_137 = arith.constant 0 : index
    %279 = vector.load %arg8[%c1_135, %c0_136, %c0_137] : memref<2x1x32xf32, #tpu.memory_space<vmem>>, vector<1x1x32xf32>
    %280 = vector.shape_cast %279 : vector<1x1x32xf32> to vector<1x32xf32>
    %c1_138 = arith.constant 1 : index
    %c0_139 = arith.constant 0 : index
    %c0_140 = arith.constant 0 : index
    %281 = vector.load %arg9[%c1_138, %c0_139, %c0_140] : memref<2x1x32xf32, #tpu.memory_space<vmem>>, vector<1x1x32xf32>
    %282 = vector.shape_cast %281 : vector<1x1x32xf32> to vector<1x32xf32>
    %cst_141 = arith.constant dense<0.000000e+00> : vector<17xf32>
    %283 = vector.multi_reduction <add>, %278, %cst_141 [1] : vector<17x32xf32> to vector<17xf32>
    %284 = vector.shape_cast %283 : vector<17xf32> to vector<17x1xf32>
    %cst_142 = arith.constant 3.200000e+01 : f32
    %285 = vector.broadcast %cst_142 : f32 to vector<17x1xf32>
    %286 = arith.divf %284, %285 : vector<17x1xf32>
    %287 = vector.broadcast %286 : vector<17x1xf32> to vector<17x32xf32>
    %288 = arith.subf %278, %287 : vector<17x32xf32>
    %289 = arith.mulf %288, %288 : vector<17x32xf32>
    %cst_143 = arith.constant dense<0.000000e+00> : vector<17xf32>
    %290 = vector.multi_reduction <add>, %289, %cst_143 [1] : vector<17x32xf32> to vector<17xf32>
    %291 = vector.shape_cast %290 : vector<17xf32> to vector<17x1xf32>
    %cst_144 = arith.constant 3.200000e+01 : f32
    %292 = vector.broadcast %cst_144 : f32 to vector<17x1xf32>
    %293 = arith.divf %291, %292 : vector<17x1xf32>
    %294 = vector.broadcast %286 : vector<17x1xf32> to vector<17x32xf32>
    %295 = arith.subf %278, %294 : vector<17x32xf32>
    %cst_145 = arith.constant 9.99999974E-6 : f32
    %296 = vector.broadcast %cst_145 : f32 to vector<17x1xf32>
    %297 = arith.addf %293, %296 : vector<17x1xf32>
    %298 = math.rsqrt %297 : vector<17x1xf32>
    %299 = vector.broadcast %298 : vector<17x1xf32> to vector<17x32xf32>
    %300 = arith.mulf %295, %299 : vector<17x32xf32>
    %301 = vector.broadcast %280 : vector<1x32xf32> to vector<17x32xf32>
    %302 = arith.mulf %300, %301 : vector<17x32xf32>
    %303 = vector.broadcast %282 : vector<1x32xf32> to vector<17x32xf32>
    %304 = arith.addf %302, %303 : vector<17x32xf32>
    %c1_146 = arith.constant 1 : index
    %c0_147 = arith.constant 0 : index
    %c0_148 = arith.constant 0 : index
    %305 = vector.load %arg10[%c1_146, %c0_147, %c0_148] : memref<2x32x128xf32, #tpu.memory_space<vmem>>, vector<1x32x128xf32>
    %306 = vector.shape_cast %305 : vector<1x32x128xf32> to vector<32x128xf32>
    %cst_149 = arith.constant dense<0.000000e+00> : vector<17x128xf32>
    %307 = tpu.matmul %304, %306, %cst_149 {dimension_numbers = #tpu.dot_dimension_numbers<[1], [0], [0], [1], [0, 0, 1, 1], [], []>} : vector<17x32xf32>, vector<32x128xf32>, vector<17x128xf32> -> vector<17x128xf32>
    %c1_150 = arith.constant 1 : index
    %c0_151 = arith.constant 0 : index
    %c0_152 = arith.constant 0 : index
    %308 = vector.load %arg11[%c1_150, %c0_151, %c0_152] : memref<2x1x128xf32, #tpu.memory_space<vmem>>, vector<1x1x128xf32>
    %309 = vector.shape_cast %308 : vector<1x1x128xf32> to vector<1x128xf32>
    %310 = vector.broadcast %309 : vector<1x128xf32> to vector<17x128xf32>
    %311 = arith.addf %307, %310 : vector<17x128xf32>
    %cst_153 = arith.constant 0.707106769 : f32
    %312 = vector.broadcast %cst_153 : f32 to vector<17x128xf32>
    %313 = arith.mulf %311, %312 : vector<17x128xf32>
    %cst_154 = arith.constant 0.000000e+00 : f32
    %314 = vector.broadcast %cst_154 : f32 to vector<17x128xf32>
    %315 = arith.cmpf oge, %313, %314 : vector<17x128xf32>
    %cst_155 = arith.constant 1.000000e+00 : f32
    %cst_156 = arith.constant -1.000000e+00 : f32
    %316 = vector.broadcast %cst_155 : f32 to vector<17x128xf32>
    %317 = vector.broadcast %cst_156 : f32 to vector<17x128xf32>
    %318 = arith.select %315, %316, %317 : vector<17x128xi1>, vector<17x128xf32>
    %319 = math.absf %313 : vector<17x128xf32>
    %cst_157 = arith.constant 0.327591091 : f32
    %320 = vector.broadcast %cst_157 : f32 to vector<17x128xf32>
    %321 = arith.mulf %320, %319 : vector<17x128xf32>
    %cst_158 = arith.constant 1.000000e+00 : f32
    %322 = vector.broadcast %cst_158 : f32 to vector<17x128xf32>
    %323 = arith.addf %322, %321 : vector<17x128xf32>
    %cst_159 = arith.constant 1.000000e+00 : f32
    %324 = vector.broadcast %cst_159 : f32 to vector<17x128xf32>
    %325 = arith.divf %324, %323 : vector<17x128xf32>
    %cst_160 = arith.constant 1.06140542 : f32
    %326 = vector.broadcast %cst_160 : f32 to vector<17x128xf32>
    %327 = arith.mulf %326, %325 : vector<17x128xf32>
    %cst_161 = arith.constant -1.45315206 : f32
    %328 = vector.broadcast %cst_161 : f32 to vector<17x128xf32>
    %329 = arith.addf %327, %328 : vector<17x128xf32>
    %330 = arith.mulf %329, %325 : vector<17x128xf32>
    %cst_162 = arith.constant 1.42141378 : f32
    %331 = vector.broadcast %cst_162 : f32 to vector<17x128xf32>
    %332 = arith.addf %330, %331 : vector<17x128xf32>
    %333 = arith.mulf %332, %325 : vector<17x128xf32>
    %cst_163 = arith.constant -0.284496725 : f32
    %334 = vector.broadcast %cst_163 : f32 to vector<17x128xf32>
    %335 = arith.addf %333, %334 : vector<17x128xf32>
    %336 = arith.mulf %335, %325 : vector<17x128xf32>
    %cst_164 = arith.constant 0.254829586 : f32
    %337 = vector.broadcast %cst_164 : f32 to vector<17x128xf32>
    %338 = arith.addf %336, %337 : vector<17x128xf32>
    %339 = arith.mulf %338, %325 : vector<17x128xf32>
    %cst_165 = arith.constant 0.000000e+00 : f32
    %340 = vector.broadcast %cst_165 : f32 to vector<17x128xf32>
    %341 = arith.subf %340, %319 : vector<17x128xf32>
    %342 = arith.mulf %341, %319 : vector<17x128xf32>
    %343 = math.exp %342 : vector<17x128xf32>
    %344 = arith.mulf %339, %343 : vector<17x128xf32>
    %cst_166 = arith.constant 1.000000e+00 : f32
    %345 = vector.broadcast %cst_166 : f32 to vector<17x128xf32>
    %346 = arith.subf %345, %344 : vector<17x128xf32>
    %347 = arith.mulf %318, %346 : vector<17x128xf32>
    %cst_167 = arith.constant 5.000000e-01 : f32
    %348 = vector.broadcast %cst_167 : f32 to vector<17x128xf32>
    %349 = arith.mulf %348, %311 : vector<17x128xf32>
    %cst_168 = arith.constant 1.000000e+00 : f32
    %350 = vector.broadcast %cst_168 : f32 to vector<17x128xf32>
    %351 = arith.addf %350, %347 : vector<17x128xf32>
    %352 = arith.mulf %349, %351 : vector<17x128xf32>
    %c1_169 = arith.constant 1 : index
    %c0_170 = arith.constant 0 : index
    %c0_171 = arith.constant 0 : index
    %353 = vector.load %arg12[%c1_169, %c0_170, %c0_171] : memref<2x128x32xf32, #tpu.memory_space<vmem>>, vector<1x128x32xf32>
    %354 = vector.shape_cast %353 : vector<1x128x32xf32> to vector<128x32xf32>
    %cst_172 = arith.constant dense<0.000000e+00> : vector<17x32xf32>
    %355 = tpu.matmul %352, %354, %cst_172 {dimension_numbers = #tpu.dot_dimension_numbers<[1], [0], [0], [1], [0, 0, 1, 1], [], []>} : vector<17x128xf32>, vector<128x32xf32>, vector<17x32xf32> -> vector<17x32xf32>
    %c1_173 = arith.constant 1 : index
    %c0_174 = arith.constant 0 : index
    %c0_175 = arith.constant 0 : index
    %356 = vector.load %arg13[%c1_173, %c0_174, %c0_175] : memref<2x1x32xf32, #tpu.memory_space<vmem>>, vector<1x1x32xf32>
    %357 = vector.shape_cast %356 : vector<1x1x32xf32> to vector<1x32xf32>
    %358 = vector.broadcast %357 : vector<1x32xf32> to vector<17x32xf32>
    %359 = arith.addf %355, %358 : vector<17x32xf32>
    %360 = arith.addf %278, %359 : vector<17x32xf32>
    %361 = vector.extract_strided_slice %360 {offsets = [0, 0], sizes = [1, 32], strides = [1, 1]} : vector<17x32xf32> to vector<1x32xf32>
    %c0_176 = arith.constant 0 : index
    %c0_177 = arith.constant 0 : index
    %362 = vector.load %arg14[%c0_176, %c0_177] : memref<1x32xf32, #tpu.memory_space<vmem>>, vector<1x32xf32>
    %c0_178 = arith.constant 0 : index
    %c0_179 = arith.constant 0 : index
    %363 = vector.load %arg15[%c0_178, %c0_179] : memref<1x32xf32, #tpu.memory_space<vmem>>, vector<1x32xf32>
    %cst_180 = arith.constant dense<0.000000e+00> : vector<1xf32>
    %364 = vector.multi_reduction <add>, %361, %cst_180 [1] : vector<1x32xf32> to vector<1xf32>
    %365 = vector.shape_cast %364 : vector<1xf32> to vector<1x1xf32>
    %cst_181 = arith.constant 3.200000e+01 : f32
    %366 = vector.broadcast %cst_181 : f32 to vector<1x1xf32>
    %367 = arith.divf %365, %366 : vector<1x1xf32>
    %368 = vector.broadcast %367 : vector<1x1xf32> to vector<1x32xf32>
    %369 = arith.subf %361, %368 : vector<1x32xf32>
    %370 = arith.mulf %369, %369 : vector<1x32xf32>
    %cst_182 = arith.constant dense<0.000000e+00> : vector<1xf32>
    %371 = vector.multi_reduction <add>, %370, %cst_182 [1] : vector<1x32xf32> to vector<1xf32>
    %372 = vector.shape_cast %371 : vector<1xf32> to vector<1x1xf32>
    %cst_183 = arith.constant 3.200000e+01 : f32
    %373 = vector.broadcast %cst_183 : f32 to vector<1x1xf32>
    %374 = arith.divf %372, %373 : vector<1x1xf32>
    %375 = vector.broadcast %367 : vector<1x1xf32> to vector<1x32xf32>
    %376 = arith.subf %361, %375 : vector<1x32xf32>
    %cst_184 = arith.constant 9.99999974E-6 : f32
    %377 = vector.broadcast %cst_184 : f32 to vector<1x1xf32>
    %378 = arith.addf %374, %377 : vector<1x1xf32>
    %379 = math.rsqrt %378 : vector<1x1xf32>
    %380 = vector.broadcast %379 : vector<1x1xf32> to vector<1x32xf32>
    %381 = arith.mulf %376, %380 : vector<1x32xf32>
    %382 = arith.mulf %381, %362 : vector<1x32xf32>
    %383 = arith.addf %382, %363 : vector<1x32xf32>
    %c0_185 = arith.constant 0 : index
    %c0_186 = arith.constant 0 : index
    %384 = vector.load %arg16[%c0_185, %c0_186] : memref<32x128xf32, #tpu.memory_space<vmem>>, vector<32x128xf32>
    %cst_187 = arith.constant dense<0.000000e+00> : vector<1x128xf32>
    %385 = tpu.matmul %383, %384, %cst_187 {dimension_numbers = #tpu.dot_dimension_numbers<[1], [0], [0], [1], [0, 0, 1, 1], [], []>} : vector<1x32xf32>, vector<32x128xf32>, vector<1x128xf32> -> vector<1x128xf32>
    %c0_188 = arith.constant 0 : index
    %c0_189 = arith.constant 0 : index
    %386 = vector.load %arg17[%c0_188, %c0_189] : memref<1x128xf32, #tpu.memory_space<vmem>>, vector<1x128xf32>
    %387 = arith.addf %385, %386 : vector<1x128xf32>
    %c0_190 = arith.constant 0 : index
    %c0_191 = arith.constant 0 : index
    %c0_192 = arith.constant 0 : index
    %388 = vector.load %arg18[%c0_190, %c0_191, %c0_192] : memref<1x1x128xf32, #tpu.memory_space<vmem>>, vector<1x1x128xf32>
    %389 = vector.shape_cast %388 : vector<1x1x128xf32> to vector<1x128xf32>
    %390 = vector.shape_cast %387 : vector<1x128xf32> to vector<1x1x128xf32>
    tpu.vector_store %arg18[%c0_190, %c0_191, %c0_192], %390 {strides = array<i32>} : memref<1x1x128xf32, #tpu.memory_space<vmem>>, vector<1x1x128xf32>,
    return
  }
  func.func @transform_0(%arg0: i32) -> (i32, i32, i32) {
    %c0_i32 = arith.constant 0 : i32
    %c0_i32_0 = arith.constant 0 : i32
    %c0_i32_1 = arith.constant 0 : i32
    return %arg0, %c0_i32, %c0_i32_0 : i32, i32, i32
  }
  func.func @transform_1(%arg0: i32) -> (i32, i32) {
    %c0_i32 = arith.constant 0 : i32
    %c0_i32_0 = arith.constant 0 : i32
    %c0_i32_1 = arith.constant 0 : i32
    return %c0_i32, %c0_i32_0 : i32, i32
  }
  func.func @transform_2(%arg0: i32) -> (i32, i32) {
    %c0_i32 = arith.constant 0 : i32
    %c0_i32_0 = arith.constant 0 : i32
    %c0_i32_1 = arith.constant 0 : i32
    return %c0_i32, %c0_i32_0 : i32, i32
  }
  func.func @transform_3(%arg0: i32) -> (i32, i32) {
    %c0_i32 = arith.constant 0 : i32
    %c0_i32_0 = arith.constant 0 : i32
    %c0_i32_1 = arith.constant 0 : i32
    return %c0_i32, %c0_i32_0 : i32, i32
  }
  func.func @transform_4(%arg0: i32) -> (i32, i32) {
    %c0_i32 = arith.constant 0 : i32
    %c0_i32_0 = arith.constant 0 : i32
    %c0_i32_1 = arith.constant 0 : i32
    return %c0_i32, %c0_i32_0 : i32, i32
  }
  func.func @transform_5(%arg0: i32) -> (i32, i32, i32) {
    %c0_i32 = arith.constant 0 : i32
    %c0_i32_0 = arith.constant 0 : i32
    %c0_i32_1 = arith.constant 0 : i32
    %c0_i32_2 = arith.constant 0 : i32
    return %c0_i32, %c0_i32_0, %c0_i32_1 : i32, i32, i32
  }
  func.func @transform_6(%arg0: i32) -> (i32, i32, i32) {
    %c0_i32 = arith.constant 0 : i32
    %c0_i32_0 = arith.constant 0 : i32
    %c0_i32_1 = arith.constant 0 : i32
    %c0_i32_2 = arith.constant 0 : i32
    return %c0_i32, %c0_i32_0, %c0_i32_1 : i32, i32, i32
  }
  func.func @transform_7(%arg0: i32) -> (i32, i32, i32) {
    %c0_i32 = arith.constant 0 : i32
    %c0_i32_0 = arith.constant 0 : i32
    %c0_i32_1 = arith.constant 0 : i32
    %c0_i32_2 = arith.constant 0 : i32
    return %c0_i32, %c0_i32_0, %c0_i32_1 : i32, i32, i32
  }
  func.func @transform_8(%arg0: i32) -> (i32, i32, i32) {
    %c0_i32 = arith.constant 0 : i32
    %c0_i32_0 = arith.constant 0 : i32
    %c0_i32_1 = arith.constant 0 : i32
    %c0_i32_2 = arith.constant 0 : i32
    return %c0_i32, %c0_i32_0, %c0_i32_1 : i32, i32, i32
  }
  func.func @transform_9(%arg0: i32) -> (i32, i32, i32) {
    %c0_i32 = arith.constant 0 : i32
    %c0_i32_0 = arith.constant 0 : i32
    %c0_i32_1 = arith.constant 0 : i32
    %c0_i32_2 = arith.constant 0 : i32
    return %c0_i32, %c0_i32_0, %c0_i32_1 : i32, i32, i32
  }
  func.func @transform_10(%arg0: i32) -> (i32, i32, i32) {
    %c0_i32 = arith.constant 0 : i32
    %c0_i32_0 = arith.constant 0 : i32
    %c0_i32_1 = arith.constant 0 : i32
    %c0_i32_2 = arith.constant 0 : i32
    return %c0_i32, %c0_i32_0, %c0_i32_1 : i32, i32, i32
  }
  func.func @transform_11(%arg0: i32) -> (i32, i32, i32) {
    %c0_i32 = arith.constant 0 : i32
    %c0_i32_0 = arith.constant 0 : i32
    %c0_i32_1 = arith.constant 0 : i32
    %c0_i32_2 = arith.constant 0 : i32
    return %c0_i32, %c0_i32_0, %c0_i32_1 : i32, i32, i32
  }
  func.func @transform_12(%arg0: i32) -> (i32, i32, i32) {
    %c0_i32 = arith.constant 0 : i32
    %c0_i32_0 = arith.constant 0 : i32
    %c0_i32_1 = arith.constant 0 : i32
    %c0_i32_2 = arith.constant 0 : i32
    return %c0_i32, %c0_i32_0, %c0_i32_1 : i32, i32, i32
  }
  func.func @transform_13(%arg0: i32) -> (i32, i32) {
    %c0_i32 = arith.constant 0 : i32
    %c0_i32_0 = arith.constant 0 : i32
    %c0_i32_1 = arith.constant 0 : i32
    return %c0_i32, %c0_i32_0 : i32, i32
  }
  func.func @transform_14(%arg0: i32) -> (i32, i32) {
    %c0_i32 = arith.constant 0 : i32
    %c0_i32_0 = arith.constant 0 : i32
    %c0_i32_1 = arith.constant 0 : i32
    return %c0_i32, %c0_i32_0 : i32, i32
  }
  func.func @transform_15(%arg0: i32) -> (i32, i32) {
    %c0_i32 = arith.constant 0 : i32
    %c0_i32_0 = arith.constant 0 : i32
    %c0_i32_1 = arith.constant 0 : i32
    return %c0_i32, %c0_i32_0 : i32, i32
  }
  func.func @transform_16(%arg0: i32) -> (i32, i32) {
    %c0_i32 = arith.constant 0 : i32
    %c0_i32_0 = arith.constant 0 : i32
    %c0_i32_1 = arith.constant 0 : i32
    return %c0_i32, %c0_i32_0 : i32, i32
  }
  func.func @transform_17(%arg0: i32) -> (i32, i32, i32) {
    %c0_i32 = arith.constant 0 : i32
    %c0_i32_0 = arith.constant 0 : i32
    %c0_i32_1 = arith.constant 0 : i32
    return %arg0, %c0_i32, %c0_i32_0 : i32, i32, i32
  }
}

</mosaic_0001>

<bundles_post_ra>
// kernel: discriminator_forward.1
= control target key start
LH: loop header
LB: loop body
LE: loop exit
PB: predicated region body
PF: predicated region fallthrough
CT: control target
= control target key end

     0   :  { %s4443_s24 = smov 0   ;;  %s5398_s0 = inlined_call_operand.vmem [shape: f32[2,16,48], index: 0, kind: input, shape index: {}]   ;;  %s5399_s1 = inlined_call_operand.vmem [shape: f32[48,32], index: 1, kind: input, shape index: {}]   ;;  %s5400_s2 = inlined_call_operand.vmem [shape: f32[1,32], index: 2, kind: input, shape index: {}]   ;;  %s5401_s3 = inlined_call_operand.vmem [shape: f32[1,32], index: 3, kind: input, shape index: {}]   ;;  %s5402_s4 = inlined_call_operand.vmem [shape: f32[17,32], index: 4, kind: input, shape index: {}]   ;;  %s5403_s5 = inlined_call_operand.vmem [shape: f32[2,1,32], index: 5, kind: input, shape index: {}]   ;;  %s5404_s6 = inlined_call_operand.vmem [shape: f32[2,1,32], index: 6, kind: input, shape index: {}]   ;;  %s5405_s7 = inlined_call_operand.vmem [shape: f32[2,1,32], index: 7, kind: input, shape index: {}]   ;;  %s5406_s8 = inlined_call_operand.vmem [shape: f32[2,1,32], index: 8, kind: input, shape index: {}]   ;;  %s5407_s9 = inlined_call_operand.vmem [shape: f32[2,32,128], index: 9, kind: input, shape index: {}]   ;;  %s5408_s10 = inlined_call_operand.vmem [shape: f32[2,1,128], index: 10, kind: input, shape index: {}]   ;;  %s5409_s11 = inlined_call_operand.vmem [shape: f32[2,128,32], index: 11, kind: input, shape index: {}]   ;;  %s5410_s12 = inlined_call_operand.vmem [shape: f32[2,1,32], index: 12, kind: input, shape index: {}]   ;;  %s5411_s13 = inlined_call_operand.vmem [shape: f32[1,32], index: 13, kind: input, shape index: {}]   ;;  %s5412_s14 = inlined_call_operand.vmem [shape: f32[1,32], index: 14, kind: input, shape index: {}]   ;;  %s5413_s15 = inlined_call_operand.vmem [shape: f32[32,128], index: 15, kind: input, shape index: {}]   ;;  %s5414_s16 = inlined_call_operand.vmem [shape: f32[1,128], index: 16, kind: input, shape index: {}]   ;;  %s5415_s17 = inlined_call_operand.vmem [shape: f32[2,1,128], index: 17, kind: output, shape index: {}]  }
   0x1   :  { %5422 = sst [smem:[#allocation3_spill]] %s5398_s0 }
   0x2   :  { %5423 = sst [smem:[#allocation4_spill]] %s5399_s1 }
   0x3 LB: > { %s3492_s25 = sadd.s32 4294967295, %s4342_s24   ;;  %p3496_p0 = scmp.ge.s32.totalorder %s4342_s24, 1  ;;  %s4342_s24 = sphi %s4443_s24, %s27_s24  }
   0x4   : > { %p487_p1 = scmp.lt.s32.totalorder %s4342_s24, 3 }
   0x6   : > { %p488_p2 = pnand %p3496_p0, %p487_p1 }
   0x7   : > { %s5424_s28 = sld [smem:[#allocation4_spill]] (!%p488_p2)  ;;  %p537_p3 = scmp.lt.s32.totalorder (!%p488_p2), %s3492_s25, 1 }
   0x8   : > { %491 = sbr.rel (%p488_p2) target bundleno = 5264 (0x1490), region = 88  ;;  %s5425_s23 = sld [smem:[#allocation3_spill]] (!%p488_p2) }
   0x9   : > { %s4346_s1 = smov (!%p488_p2), 120   ;;  %s4348_s21 = smov (!%p488_p2), 104  }
   0xa   : > { %s4349_s22 = smov (!%p488_p2), 8  }
   0xd   : > { %v552_v0 = vld [vmem:[%s5424_s28 + $0x28] sm:$0xff]  ;;  %v551_v1 = vld [vmem:[%s5424_s28 + $0x20] sm:$0xff]  ;;  %v550_v2 = vld [vmem:[%s5424_s28 + $0x18] sm:$0xff]  ;;  %s5430_s25 = smov (!%p537_p3, %s3492_s25), 1  ;;  %vm560_vm0 = vcmask 392192   ;;  %vm643_vm1 = vcmask 253952  }
   0xe   : > { %3791 = vmatprep.subr.mxu1 %v552_v0  ;;  %v549_v3 = vld [vmem:[%s5424_s28 + $0x10] sm:$0xff]  ;;  %s3629_s20 = sshll.u32 %s5430_s25, 4  ;;  %v548_v4 = vld [vmem:[%s5424_s28 + $0x8] sm:$0xff]  ;;  %v547_v6 = vld [vmem:[%s5424_s28] sm:$0xff]  ;;  %vm645_vm2 = vcmask 261120   ;;  %v4344_v41 = vmov 0.0   ;;  %s544_s19 = scalar_lea.vmem %s5415_s17, %s5430_s25 }
   0xf   : > { %3792 = vmatpush3.msra.mxu1 %v552_v0  ;;  %s541_s26 = scalar_lea.vmem %s5425_s23, %s3629_s20  ;;  %v642_v8 = vld [vmem:[%s5401_s3] sm:$0x1]  ;;  %v653_v14 = vld [vmem:[%s5402_s4 + $0x10] sm:$0x1]  ;;  %v652_v17 = vld [vmem:[%s5402_s4 + $0x8] sm:$0xff]  ;;  %3821 = vmatprep.subr.mxu0 %v4344_v41  ;;  %vm4345_vm3 = vmmov 0  }
  0x10   : > { %3793 = vmatprep.subr.mxu1 %v551_v1  ;;  %v545_v5 = vld [vmem:[%s541_s26] sm:$0xff]  ;;  %v546_v7 = vld [vmem:[%s541_s26 + $0x8] sm:$0xff]  ;;  %644 = vst.msk [vmem:[#allocation2] sm:$0x1] %vm643_vm1, %v642_v8  ;;  %3827 = vmatprep.mubr.msk.f32.mxu0 %vm4345_vm3, %v4344_v41  ;;  %vm717_vm4 = vcmask 64512   ;;  %vm854_vm5 = vcmask 1040384  }
  0x11   : > { %3794 = vmatpush3.msra.mxu1 %v551_v1  ;;  %3803 = vmatprep.mubr.msk.f32.mxu1 %vm560_vm0, %v545_v5  ;;  %v3499_v9 = vld [vmem:[%s5400_s2] ss:$0 sm:$0xff]  ;;  %s4347_s20 = smov 112   ;;  %vm810_vm6 = vcmask 138240   ;;  %vm817_vm7 = vcmask 131072   ;;  %vm939_vm8 = vcmask 57344  }
  0x12   : > { %3795 = vmatprep.subr.mxu1 %v550_v2  ;;  %v651_v16 = vld [vmem:[%s5402_s4] sm:$0xff]  ;;  %s5419_s23 = smov 16   ;;  %s5417_s26 = smov 24   ;;  %vm1174_vm9 = vcmask 130112   ;;  %vm1412_vm10 = vcmask 195712   ;;  %vm1650_vm11 = vcmask 261312  }
  0x13   : > { %3796 = vmatpush3.msra.mxu1 %v550_v2  ;;  %v3502_v52 = vld [vmem:[%s5403_s5] ss:$0 sm:$0xff]  ;;  %vm1177_vm12 = vcmask 122944   ;;  %vm1415_vm13 = vcmask 188544   ;;  %vm5421_vm14 = vcmask 254144  }
  0x14   : > { %3797 = vmatprep.subr.mxu1 %v549_v3  ;;  %v3503_v54 = vld [vmem:[%s5404_s6] ss:$0 sm:$0xff] }
  0x15   : > { %3798 = vmatpush3.msra.mxu1 %v549_v3 }
  0x16   : > { %3799 = vmatprep.subr.mxu1 %v548_v4 }
  0x17   : > { %3800 = vmatpush3.msra.mxu1 %v548_v4 }
  0x18   : > { %3801 = vmatprep.subr.mxu1 %v547_v6 }
  0x19   : > { %3802 = vmatpush3.msra.mxu1 %v547_v6 }
  0x1a   : > { %3804 = vmatmul.mubr.msk.f32.vlgmr.msra.gmra.mxu1 %vm560_vm0, %v546_v7  ;;  %3806 = vmatprep.subr.mxu1 %v4344_v41 }
  0x1b   : > { %3812 = vmatprep.mubr.msk.f32.mxu1 %vm4345_vm3, %v4344_v41 }
  0xda   : > { %v3805_v10 = vpop.f32.mrf.mxu1 }
  0xdb   : > { %v639_v11 = vadd.f32 %v3805_v10, %v3499_v9 }
  0xdc   : > { %v633_v12 = vpop.f32.mrf.mxu1 }
  0xdd   : > { %647 = vst.msk [vmem:[#allocation2 + $0x9] sm:$0xff] %vm645_vm2, %v639_v11  ;;  %v634_v13 = vadd.f32 %v3499_v9, %v633_v12 }
  0xdf   : > { %646 = vst.msk [vmem:[#allocation2 + $0x1] sm:$0xff] %vm645_vm2, %v634_v13 }
  0xe4   : > { %v650_v15 = vld [vmem:[#allocation2 + $0x10] sm:$0x1] }
  0xe5   : > { %v4493_v18 = vadd.f32 %v653_v14, %v650_v15 }
  0xe6   : > { %v648_v19 = vld [vmem:[#allocation2] sm:$0xff]  ;;  %v649_v20 = vld [vmem:[#allocation2 + $0x8] sm:$0xff] }
  0xe7   : > { %v665_v21 = vsel %vm643_vm1, %v4493_v18, 0.0  ;;  %v4497_v22 = vadd.f32 %v651_v16, %v648_v19  ;;  %v4499_v23 = vadd.f32 %v652_v17, %v649_v20 }
  0xe8   : > { %666 = vadd.xlane.f32.xlu0 %v665_v21 }
  0xe9   : > { %v659_v24 = vsel %vm645_vm2, %v4497_v22, 0.0  ;;  %v662_v25 = vsel %vm645_vm2, %v4499_v23, 0.0 }
  0xea   : > { %660 = vadd.xlane.f32.xlu1 %v659_v24 }
  0xec   : > { %663 = vadd.xlane.f32.xlu0 %v662_v25 }
 0x171   : > { %v667_v26 = vpop.xlane.xlu0 %666 }
 0x172   : > { %v671_v27 = vmul.f32 0.03125, %v667_v26 }
 0x173   : > { %v661_v28 = vpop.xlane.xlu1 %660 }
 0x174   : > { %v674_v29 = vsub.f32 %v4493_v18, %v671_v27  ;;  %v669_v30 = vmul.f32 0.03125, %v661_v28 }
 0x175   : > { %v664_v31 = vpop.xlane.xlu0 %663 }
 0x176   : > { %v672_v32 = vsub.f32 %v4497_v22, %v669_v30  ;;  %v670_v33 = vmul.f32 0.03125, %v664_v31  ;;  %v677_v34 = vmul.f32 %v674_v29, %v674_v29 }
 0x178   : > { %v673_v35 = vsub.f32 %v4499_v23, %v670_v33  ;;  %v684_v36 = vsel %vm643_vm1, %v677_v34, 0.0  ;;  %v675_v37 = vmul.f32 %v672_v32, %v672_v32 }
 0x179   : > { %685 = vadd.xlane.f32.xlu1 %v684_v36 }
 0x17a   : > { %v676_v38 = vmul.f32 %v673_v35, %v673_v35  ;;  %v678_v40 = vsel %vm645_vm2, %v675_v37, 0.0 }
 0x17c   : > { %v681_v39 = vsel %vm645_vm2, %v676_v38, 0.0 }
 0x17d   : > { %682 = vadd.xlane.f32.xlu0 %v681_v39  ;;  %679 = vadd.xlane.f32.xlu1 %v678_v40 }
 0x202   : > { %v686_v42 = vpop.xlane.xlu1 %685 }
 0x203   : > { %v689_v43 = vmul.f32 0.03125, %v686_v42 }
 0x205   : > { %v692_v44 = vadd.f32 1e-05, %v689_v43 }
 0x206   : > { %v683_v45 = vpop.xlane.xlu0 %682  ;;  %v680_v46 = vpop.xlane.xlu1 %679 }
 0x207   : > { %4190 = vrsqrt.f32 %v692_v44  ;;  %v688_v47 = vmul.f32 0.03125, %v683_v45  ;;  %v687_v48 = vmul.f32 0.03125, %v680_v46 }
 0x209   : > { %v691_v49 = vadd.f32 1e-05, %v688_v47  ;;  %v690_v50 = vadd.f32 1e-05, %v687_v48 }
 0x20b   : > { %4192 = vrsqrt.f32 %v691_v49 }
 0x20c   : > { %4194 = vrsqrt.f32 %v690_v50 }
 0x214   : > { %v4191_v51 = vpop.eup %4190 }
 0x215   : > { %v698_v53 = vmul.f32 %v4191_v51, %v674_v29 }
 0x217   : > { %v707_v55 = vmul.f32 %v3502_v52, %v698_v53 }
 0x218   : > { %v4193_v56 = vpop.eup %4192 }
 0x219   : > { %v4195_v57 = vpop.eup %4194  ;;  %v697_v58 = vmul.f32 %v4193_v56, %v673_v35  ;;  %v716_v59 = vadd.f32 %v3503_v54, %v707_v55 }
 0x21a   : > { %v696_v60 = vmul.f32 %v4195_v57, %v672_v32 }
 0x21b   : > { %v706_v61 = vmul.f32 %v3502_v52, %v697_v58  ;;  %945 = vrot.lane.b32.xlu0 %v716_v59, %s4346_s1  ;;  %3807 = vmatpush3.xpose.msk.msra.mxu1 %vm717_vm4, %v716_v59 }
 0x21c   : > { %v705_v62 = vmul.f32 %v3502_v52, %v696_v60  ;;  %3822 = vmatpush3.msk.msra.mxu0 %vm854_vm5, %v716_v59  ;;  %3808 = vmatprep.subr.mxu1 %v4344_v41 }
 0x21d   : > { %3823 = vmatprep.subr.mxu0 %v4344_v41  ;;  %v715_v63 = vadd.f32 %v3503_v54, %v706_v61 }
 0x21e   : > { %v714_v0 = vadd.f32 %v3503_v54, %v705_v62 }
 0x21f   : > { %943 = vrot.lane.b32.xlu1 %v715_v63, %s4346_s1  ;;  %1181 = vrot.lane.b32.xlu0 %v715_v63, %s4347_s20 }
 0x220   : > { %3809 = vmatpush3.xpose.msk.msra.mxu1 %vm717_vm4, %v715_v63  ;;  %3824 = vmatpush3.msra.mxu0 %v715_v63 }
 0x221   : > { %3825 = vmatprep.subr.mxu0 %v4344_v41  ;;  %3810 = vmatprep.subr.mxu1 %v4344_v41 }
 0x222   : > { %3826 = vmatpush3.msra.mxu0 %v714_v0 }
 0x223   : > { %1421 = vrot.lane.b32.xlu0 %v716_v59, %s4348_s21  ;;  %941 = vrot.lane.b32.xlu1 %v714_v0, %s4346_s1 }
 0x224   : > { %3811 = vmatpush3.xpose.msk.msra.mxu1 %vm717_vm4, %v714_v0  ;;  %3851 = vmatprep.subr.mxu0 %v4344_v41 }
 0x225   : > { %3836 = vmatprep.subr.mxu1 %v4344_v41 }
 0x227   : > { %3813 = vmatmul.mubr.msk.f32.vlgmr.msra.gmra.mxu1 %vm717_vm4, %v714_v0  ;;  %1417 = vrot.lane.b32.xlu0 %v714_v0, %s4348_s21 }
 0x228   : > { %1183 = vrot.lane.b32.xlu1 %v716_v59, %s4347_s20  ;;  %3815 = vmatprep.mubr.msk.f32.mxu1 %vm4345_vm3, %v4344_v41 }
 0x22b   : > { %3816 = vmatmul.mubr.msk.f32.gmra.mxu1 %vm717_vm4, %v715_v63 }
 0x22c   : > { %1179 = vrot.lane.b32.xlu1 %v714_v0, %s4347_s20  ;;  %3818 = vmatprep.mubr.msk.f32.mxu1 %vm4345_vm3, %v4344_v41 }
 0x22f   : > { %3819 = vmatmul.mubr.msk.f32.gmra.mxu1 %vm717_vm4, %v716_v59 }
 0x230   : > { %1419 = vrot.lane.b32.xlu1 %v715_v63, %s4348_s21  ;;  %3842 = vmatprep.mubr.msk.f32.mxu1 %vm4345_vm3, %v4344_v41 }
 0x28d   : > { %v4551_v1 = vpop.permute.xlu0 %945 }
 0x28e   : > { %3837 = vmatpush3.xpose.msk.msra.mxu1 %vm717_vm4, %v4551_v1 }
 0x28f   : > { %3838 = vmatprep.subr.mxu1 %v4344_v41 }
 0x291   : > { %v4556_v2 = vpop.permute.xlu1 %943  ;;  %v4577_v5 = vpop.permute.xlu0 %1181 }
 0x292   : > { %3839 = vmatpush3.xpose.msk.msra.mxu1 %vm717_vm4, %v4556_v2 }
 0x293   : > { %3840 = vmatprep.subr.mxu1 %v4344_v41 }
 0x295   : > { %v4561_v3 = vpop.permute.xlu1 %941  ;;  %v4593_v7 = vpop.permute.xlu0 %1421 }
 0x296   : > { %3841 = vmatpush3.xpose.msk.msra.mxu1 %vm717_vm4, %v4561_v3 }
 0x297   : > { %3866 = vmatprep.subr.mxu1 %v4344_v41 }
 0x299   : > { %3843 = vmatmul.mubr.msk.f32.vlgmr.msra.gmra.mxu1 %vm717_vm4, %v4561_v3  ;;  %v4611_v9 = vpop.permute.xlu0 %1417 }
 0x29a   : > { %v4568_v4 = vpop.permute.xlu1 %1183  ;;  %3845 = vmatprep.mubr.msk.f32.mxu1 %vm4345_vm3, %v4344_v41 }
 0x29b   : > { %3867 = vmatpush3.xpose.msk.msra.mxu1 %vm717_vm4, %v4568_v4 }
 0x29c   : > { %3868 = vmatprep.subr.mxu1 %v4344_v41 }
 0x29d   : > { %3846 = vmatmul.mubr.msk.f32.gmra.mxu1 %vm717_vm4, %v4556_v2 }
 0x29e   : > { %3848 = vmatprep.mubr.msk.f32.mxu1 %vm4345_vm3, %v4344_v41  ;;  %v4586_v6 = vpop.permute.xlu1 %1179 }
 0x29f   : > { %3869 = vmatpush3.xpose.msk.msra.mxu1 %vm717_vm4, %v4577_v5 }
 0x2a0   : > { %3870 = vmatprep.subr.mxu1 %v4344_v41 }
 0x2a1   : > { %3849 = vmatmul.mubr.msk.f32.gmra.mxu1 %vm717_vm4, %v4551_v1 }
 0x2a2   : > { %3872 = vmatprep.mubr.msk.f32.mxu1 %vm4345_vm3, %v4344_v41  ;;  %v4602_v8 = vpop.permute.xlu1 %1419 }
 0x2a3   : > { %3871 = vmatpush3.xpose.msk.msra.mxu1 %vm717_vm4, %v4586_v6 }
 0x2a4   : > { %3896 = vmatprep.subr.mxu1 %v4344_v41 }
 0x2a6   : > { %3873 = vmatmul.mubr.msk.f32.vlgmr.msra.gmra.mxu1 %vm717_vm4, %v4586_v6 }
 0x2a7   : > { %3897 = vmatpush3.xpose.msk.msra.mxu1 %vm717_vm4, %v4593_v7  ;;  %3875 = vmatprep.mubr.msk.f32.mxu1 %vm4345_vm3, %v4344_v41 }
 0x2a8   : > { %3898 = vmatprep.subr.mxu1 %v4344_v41 }
 0x2aa   : > { %3876 = vmatmul.mubr.msk.f32.gmra.mxu1 %vm717_vm4, %v4577_v5 }
 0x2ab   : > { %3899 = vmatpush3.xpose.msk.msra.mxu1 %vm717_vm4, %v4602_v8  ;;  %3878 = vmatprep.mubr.msk.f32.mxu1 %vm4345_vm3, %v4344_v41 }
 0x2ac   : > { %3900 = vmatprep.subr.mxu1 %v4344_v41 }
 0x2ae   : > { %3879 = vmatmul.mubr.msk.f32.gmra.mxu1 %vm717_vm4, %v4568_v4 }
 0x2af   : > { %3901 = vmatpush3.xpose.msk.msra.mxu1 %vm717_vm4, %v4611_v9  ;;  %3902 = vmatprep.mubr.msk.f32.mxu1 %vm4345_vm3, %v4344_v41 }
 0x2b0   : > { %3926 = vmatprep.subr.mxu1 %v4344_v41 }
 0x2b2   : > { %3903 = vmatmul.mubr.msk.f32.vlgmr.msra.gmra.mxu1 %vm717_vm4, %v4611_v9 }
 0x2b3   : > { %3905 = vmatprep.mubr.msk.f32.mxu1 %vm4345_vm3, %v4344_v41 }
 0x2b6   : > { %3906 = vmatmul.mubr.msk.f32.gmra.mxu1 %vm717_vm4, %v4602_v8 }
 0x2b7   : > { %3908 = vmatprep.mubr.msk.f32.mxu1 %vm4345_vm3, %v4344_v41 }
 0x2ba   : > { %3909 = vmatmul.mubr.msk.f32.gmra.mxu1 %vm717_vm4, %v4593_v7 }
 0x2bb   : > { %3934 = vmatprep.mubr.msk.f32.mxu1 %vm4345_vm3, %v4344_v41 }
 0x2e7   : > { %v793_v10 = vpop.f32.mrf.mxu1 }
 0x2e8   : > { %v807_v11 = vmul.f32 0.17677669, %v793_v10 }
 0x2e9   : > { %v3814_v12 = vpop.f32.mrf.mxu1 }
 0x2ea   : > { %v811_v13 = vsel %vm810_vm6, %v807_v11, -inf }
 0x2eb   : > { %812 = vmax.xlane.f32.xlu1 %v811_v13  ;;  %v798_v14 = vpop.f32.mrf.mxu1 }
 0x2ec   : > { %v808_v15 = vmul.f32 0.17677669, %v798_v14 }
 0x2ed   : > { %v3817_v16 = vpop.f32.mrf.mxu1 }
 0x2ee   : > { %v814_v17 = vsel %vm810_vm6, %v808_v15, -inf }
 0x2ef   : > { %815 = vmax.xlane.f32.xlu0 %v814_v17  ;;  %v803_v19 = vpop.f32.mrf.mxu1 }
 0x2f0   : > { %v809_v20 = vmul.f32 0.17677669, %v803_v19 }
 0x2f1   : > { %v3820_v21 = vpop.f32.mrf.mxu1 }
 0x2f2   : > { %v818_v24 = vsel %vm817_vm7, %v809_v20, -inf }
 0x2f3   : > { %819 = vmax.xlane.f32.xlu0 %v818_v24 }
 0x359   : > { %v1019_v25 = vpop.f32.mrf.mxu1 }
 0x35a   : > { %v4635_v26 = vmul.f32 0.17677669, %v1019_v25 }
 0x35b   : > { %v3844_v27 = vpop.f32.mrf.mxu1 }
 0x35c   : > { %v1036_v28 = vsel %vm810_vm6, %v4635_v26, -inf }
 0x35d   : > { %1037 = vmax.xlane.f32.xlu0 %v1036_v28  ;;  %v1024_v29 = vpop.f32.mrf.mxu1 }
 0x35e   : > { %v4639_v30 = vmul.f32 0.17677669, %v1024_v29 }
 0x35f   : > { %v3847_v31 = vpop.f32.mrf.mxu1 }
 0x360   : > { %v1039_v32 = vsel %vm810_vm6, %v4639_v30, -inf }
 0x361   : > { %1040 = vmax.xlane.f32.xlu1 %v1039_v32  ;;  %v1029_v33 = vpop.f32.mrf.mxu1 }
 0x362   : > { %v4643_v34 = vmul.f32 0.17677669, %v1029_v33 }
 0x363   : > { %v3850_v35 = vpop.f32.mrf.mxu1 }
 0x364   : > { %v1042_v36 = vsel %vm817_vm7, %v4643_v34, -inf }
 0x365   : > { %1043 = vmax.xlane.f32.xlu0 %v1042_v36 }
 0x366   : > { %v1257_v37 = vpop.f32.mrf.mxu1 }
 0x367   : > { %v4647_v38 = vmul.f32 0.17677669, %v1257_v37 }
 0x368   : > { %v3874_v39 = vpop.f32.mrf.mxu1 }
 0x369   : > { %v1274_v40 = vsel %vm810_vm6, %v4647_v38, -inf }
 0x36a   : > { %1275 = vmax.xlane.f32.xlu1 %v1274_v40  ;;  %v1262_v42 = vpop.f32.mrf.mxu1 }
 0x36b   : > { %v4651_v43 = vmul.f32 0.17677669, %v1262_v42 }
 0x36c   : > { %v3877_v44 = vpop.f32.mrf.mxu1 }
 0x36d   : > { %v1277_v45 = vsel %vm810_vm6, %v4651_v43, -inf }
 0x36e   : > { %1278 = vmax.xlane.f32.xlu0 %v1277_v45  ;;  %v1267_v46 = vpop.f32.mrf.mxu1 }
 0x36f   : > { %v4655_v47 = vmul.f32 0.17677669, %v1267_v46 }
 0x370   : > { %v3880_v48 = vpop.f32.mrf.mxu1 }
 0x371   : > { %v1280_v49 = vsel %vm817_vm7, %v4655_v47, -inf }
 0x372   : > { %1281 = vmax.xlane.f32.xlu1 %v1280_v49  ;;  %v1495_v50 = vpop.f32.mrf.mxu1 }
 0x373   : > { %v4659_v51 = vmul.f32 0.17677669, %v1495_v50 }
 0x374   : > { %v3904_v52 = vpop.f32.mrf.mxu1  ;;  %v813_v53 = vpop.xlane.xlu1 %812 }
 0x375   : > { %v821_v54 = vsub.f32 %v807_v11, %v813_v53  ;;  %v1512_v55 = vsel %vm810_vm6, %v4659_v51, -inf }
 0x376   : > { %1513 = vmax.xlane.f32.xlu0 %v1512_v55  ;;  %v1500_v56 = vpop.f32.mrf.mxu1 }
 0x377   : > { %v824_v57 = vmul.f32 1.442695, %v821_v54  ;;  %v4663_v58 = vmul.f32 0.17677669, %v1500_v56 }
 0x378   : > { %v816_v59 = vpop.xlane.xlu0 %815  ;;  %v3907_v60 = vpop.f32.mrf.mxu1 }
 0x379   : > { %4196 = vpow2.f32 %v824_v57  ;;  %v822_v61 = vsub.f32 %v808_v15, %v816_v59  ;;  %v1515_v62 = vsel %vm810_vm6, %v4663_v58, -inf }
 0x37a   : > { %1516 = vmax.xlane.f32.xlu1 %v1515_v62  ;;  %v1505_v63 = vpop.f32.mrf.mxu1 }
 0x37b   : > { %v826_v0 = vmul.f32 1.442695, %v822_v61  ;;  %v4667_v10 = vmul.f32 0.17677669, %v1505_v63 }
 0x37c   : > { %v820_v11 = vpop.xlane.xlu0 %819  ;;  %v3910_v12 = vpop.f32.mrf.mxu1 }
 0x37d   : > { %4198 = vpow2.f32 %v826_v0  ;;  %v823_v13 = vsub.f32 %v809_v20, %v820_v11  ;;  %v1518_v14 = vsel %vm817_vm7, %v4667_v10, -inf }
 0x37e   : > { %1519 = vmax.xlane.f32.xlu0 %v1518_v14 }
 0x37f   : > { %v828_v16 = vmul.f32 1.442695, %v823_v13 }
 0x381   : > { %4200 = vpow2.f32 %v828_v16 }
 0x386   : > { %v4671_v17 = vpop.eup %4196 }
 0x387   : > { %v830_v15 = vsel %vm810_vm6, %v4671_v17, 0.0 }
 0x388   : > { %831 = vadd.xlane.f32.xlu1 %v830_v15 }
 0x38a   : > { %v4675_v19 = vpop.eup %4198 }
 0x38b   : > { %v833_v21 = vsel %vm810_vm6, %v4675_v19, 0.0 }
 0x38c   : > { %834 = vadd.xlane.f32.xlu0 %v833_v21 }
 0x38e   : > { %v4679_v24 = vpop.eup %4200 }
 0x38f   : > { %v836_v20 = vsel %vm817_vm7, %v4679_v24, 0.0 }
 0x390   : > { %837 = vadd.xlane.f32.xlu1 %v836_v20 }
 0x3e6   : > { %v1038_v25 = vpop.xlane.xlu0 %1037 }
 0x3e7   : > { %v1045_v27 = vsub.f32 %v4635_v26, %v1038_v25 }
 0x3e9   : > { %v1048_v28 = vmul.f32 1.442695, %v1045_v27 }
 0x3ea   : > { %v1041_v29 = vpop.xlane.xlu1 %1040 }
 0x3eb   : > { %4202 = vpow2.f32 %v1048_v28  ;;  %v1046_v31 = vsub.f32 %v4639_v30, %v1041_v29 }
 0x3ed   : > { %v1050_v32 = vmul.f32 1.442695, %v1046_v31 }
 0x3ee   : > { %v1044_v33 = vpop.xlane.xlu0 %1043 }
 0x3ef   : > { %4204 = vpow2.f32 %v1050_v32  ;;  %v1047_v35 = vsub.f32 %v4643_v34, %v1044_v33 }
 0x3f1   : > { %v1052_v36 = vmul.f32 1.442695, %v1047_v35 }
 0x3f3   : > { %4206 = vpow2.f32 %v1052_v36  ;;  %v1276_v37 = vpop.xlane.xlu1 %1275 }
 0x3f4   : > { %v1283_v39 = vsub.f32 %v4647_v38, %v1276_v37 }
 0x3f6   : > { %v1286_v40 = vmul.f32 1.442695, %v1283_v39 }
 0x3f7   : > { %v1279_v42 = vpop.xlane.xlu0 %1278 }
 0x3f8   : > { %v4687_v44 = vpop.eup %4202  ;;  %4208 = vpow2.f32 %v1286_v40  ;;  %v1284_v26 = vsub.f32 %v4651_v43, %v1279_v42 }
 0x3f9   : > { %v1054_v30 = vsel %vm810_vm6, %v4687_v44, 0.0 }
 0x3fa   : > { %v1288_v45 = vmul.f32 1.442695, %v1284_v26  ;;  %1055 = vadd.xlane.f32.xlu0 %v1054_v30 }
 0x3fb   : > { %v1282_v46 = vpop.xlane.xlu1 %1281 }
 0x3fc   : > { %v4692_v48 = vpop.eup %4204  ;;  %4210 = vpow2.f32 %v1288_v45  ;;  %v1285_v34 = vsub.f32 %v4655_v47, %v1282_v46 }
 0x3fd   : > { %v1057_v38 = vsel %vm810_vm6, %v4692_v48, 0.0 }
 0x3fe   : > { %v1290_v49 = vmul.f32 1.442695, %v1285_v34  ;;  %1058 = vadd.xlane.f32.xlu1 %v1057_v38 }
 0x3ff   : > { %v1514_v50 = vpop.xlane.xlu0 %1513 }
 0x400   : > { %v4697_v52 = vpop.eup %4206  ;;  %4212 = vpow2.f32 %v1290_v49  ;;  %v1521_v43 = vsub.f32 %v4659_v51, %v1514_v50 }
 0x401   : > { %v1060_v53 = vsel %vm817_vm7, %v4697_v52, 0.0 }
 0x402   : > { %v1524_v54 = vmul.f32 1.442695, %v1521_v43  ;;  %1061 = vadd.xlane.f32.xlu0 %v1060_v53 }
 0x403   : > { %v1517_v55 = vpop.xlane.xlu1 %1516 }
 0x404   : > { %4214 = vpow2.f32 %v1524_v54  ;;  %v1522_v47 = vsub.f32 %v4663_v58, %v1517_v55 }
 0x405   : > { %v4703_v56 = vpop.eup %4208 }
 0x406   : > { %v1526_v57 = vmul.f32 1.442695, %v1522_v47  ;;  %v1292_v59 = vsel %vm810_vm6, %v4703_v56, 0.0 }
 0x407   : > { %v1520_v60 = vpop.xlane.xlu0 %1519  ;;  %1293 = vadd.xlane.f32.xlu1 %v1292_v59 }
 0x408   : > { %4216 = vpow2.f32 %v1526_v57  ;;  %v1523_v51 = vsub.f32 %v4667_v10, %v1520_v60 }
 0x409   : > { %v4708_v61 = vpop.eup %4210 }
 0x40a   : > { %v1528_v62 = vmul.f32 1.442695, %v1523_v51  ;;  %v1295_v63 = vsel %vm810_vm6, %v4708_v61, 0.0 }
 0x40b   : > { %1296 = vadd.xlane.f32.xlu0 %v1295_v63 }
 0x40c   : > { %4218 = vpow2.f32 %v1528_v62 }
 0x40d   : > { %v4712_v58 = vpop.eup %4212 }
 0x40e   : > { %v1298_v0 = vsel %vm817_vm7, %v4712_v58, 0.0 }
 0x40f   : > { %1299 = vadd.xlane.f32.xlu1 %v1298_v0 }
 0x411   : > { %v4716_v11 = vpop.eup %4214  ;;  %v832_v12 = vpop.xlane.xlu1 %831 }
 0x412   : > { %4220 = vrcp.f32 %v832_v12  ;;  %v1530_v10 = vsel %vm810_vm6, %v4716_v11, 0.0 }
 0x413   : > { %1531 = vadd.xlane.f32.xlu0 %v1530_v10 }
 0x415   : > { %v4720_v13 = vpop.eup %4216  ;;  %v835_v14 = vpop.xlane.xlu0 %834 }
 0x416   : > { %4222 = vrcp.f32 %v835_v14  ;;  %v1533_v16 = vsel %vm810_vm6, %v4720_v13, 0.0 }
 0x417   : > { %1534 = vadd.xlane.f32.xlu1 %v1533_v16 }
 0x419   : > { %v4724_v15 = vpop.eup %4218  ;;  %v838_v21 = vpop.xlane.xlu1 %837 }
 0x41a   : > { %4224 = vrcp.f32 %v838_v21  ;;  %v1536_v20 = vsel %vm817_vm7, %v4724_v15, 0.0 }
 0x41b   : > { %1537 = vadd.xlane.f32.xlu0 %v1536_v20 }
 0x41f   : > { %v4221_v25 = vpop.eup %4220 }
 0x420   : > { %v842_v27 = vmul.f32 %v4221_v25, %v4671_v17 }
 0x422   : > { %3828 = vmatmul.mubr.msk.f32.vlgmr.msra.gmra.mxu0 %vm810_vm6, %v842_v27 }
 0x423   : > { %v4223_v28 = vpop.eup %4222  ;;  %3852 = vmatpush3.msk.msra.mxu0 %vm854_vm5, %v4551_v1  ;;  %3830 = vmatprep.mubr.msk.f32.mxu0 %vm4345_vm3, %v4344_v41 }
 0x424   : > { %3853 = vmatprep.subr.mxu0 %v4344_v41  ;;  %v843_v29 = vmul.f32 %v4223_v28, %v4675_v19 }
 0x425   : > { %3854 = vmatpush3.msra.mxu0 %v4556_v2 }
 0x426   : > { %3855 = vmatprep.subr.mxu0 %v4344_v41  ;;  %3831 = vmatmul.mubr.msk.f32.gmra.mxu0 %vm810_vm6, %v843_v29 }
 0x427   : > { %v4225_v17 = vpop.eup %4224  ;;  %3856 = vmatpush3.msra.mxu0 %v4561_v3  ;;  %3833 = vmatprep.mubr.msk.f32.mxu0 %vm4345_vm3, %v4344_v41 }
 0x428   : > { %v844_v1 = vmul.f32 %v4225_v17, %v4679_v24  ;;  %3881 = vmatprep.subr.mxu0 %v4344_v41 }
 0x42a   : > { %3834 = vmatmul.mubr.msk.f32.gmra.mxu0 %vm810_vm6, %v844_v1 }
 0x42b   : > { %3857 = vmatprep.mubr.msk.f32.mxu0 %vm4345_vm3, %v4344_v41 }
 0x483   : > { %v1056_v2 = vpop.xlane.xlu0 %1055 }
 0x484   : > { %4226 = vrcp.f32 %v1056_v2 }
 0x487   : > { %v1059_v19 = vpop.xlane.xlu1 %1058 }
 0x488   : > { %4228 = vrcp.f32 %v1059_v19 }
 0x48b   : > { %v1062_v31 = vpop.xlane.xlu0 %1061 }
 0x48c   : > { %4230 = vrcp.f32 %v1062_v31 }
 0x490   : > { %v1294_v32 = vpop.xlane.xlu1 %1293 }
 0x491   : > { %v4227_v3 = vpop.eup %4226  ;;  %4232 = vrcp.f32 %v1294_v32 }
 0x492   : > { %v1066_v33 = vmul.f32 %v4227_v3, %v4687_v44 }
 0x494   : > { %v1297_v35 = vpop.xlane.xlu0 %1296  ;;  %3858 = vmatmul.mubr.msk.f32.vlgmr.msra.gmra.mxu0 %vm810_vm6, %v1066_v33 }
 0x495   : > { %v4229_v24 = vpop.eup %4228  ;;  %4234 = vrcp.f32 %v1297_v35  ;;  %3882 = vmatpush3.msk.msra.mxu0 %vm854_vm5, %v4568_v4  ;;  %3860 = vmatprep.mubr.msk.f32.mxu0 %vm4345_vm3, %v4344_v41 }
 0x496   : > { %3883 = vmatprep.subr.mxu0 %v4344_v41  ;;  %v1067_v36 = vmul.f32 %v4229_v24, %v4692_v48 }
 0x497   : > { %3884 = vmatpush3.msra.mxu0 %v4577_v5 }
 0x498   : > { %3885 = vmatprep.subr.mxu0 %v4344_v41  ;;  %v1300_v37 = vpop.xlane.xlu1 %1299  ;;  %3861 = vmatmul.mubr.msk.f32.gmra.mxu0 %vm810_vm6, %v1067_v36 }
 0x499   : > { %v4231_v39 = vpop.eup %4230  ;;  %4236 = vrcp.f32 %v1300_v37  ;;  %3886 = vmatpush3.msra.mxu0 %v4586_v6  ;;  %3863 = vmatprep.mubr.msk.f32.mxu0 %vm4345_vm3, %v4344_v41 }
 0x49a   : > { %v1068_v4 = vmul.f32 %v4231_v39, %v4697_v52  ;;  %3911 = vmatprep.subr.mxu0 %v4344_v41 }
 0x49c   : > { %v1532_v40 = vpop.xlane.xlu0 %1531  ;;  %3864 = vmatmul.mubr.msk.f32.gmra.mxu0 %vm810_vm6, %v1068_v4 }
 0x49d   : > { %4238 = vrcp.f32 %v1532_v40  ;;  %3887 = vmatprep.mubr.msk.f32.mxu0 %vm4345_vm3, %v4344_v41 }
 0x49e   : > { %v4233_v5 = vpop.eup %4232 }
 0x49f   : > { %v1304_v42 = vmul.f32 %v4233_v5, %v4703_v56 }
 0x4a0   : > { %v1535_v44 = vpop.xlane.xlu1 %1534 }
 0x4a1   : > { %4240 = vrcp.f32 %v1535_v44  ;;  %3888 = vmatmul.mubr.msk.f32.vlgmr.msra.gmra.mxu0 %vm810_vm6, %v1304_v42 }
 0x4a2   : > { %v4235_v6 = vpop.eup %4234  ;;  %3912 = vmatpush3.msk.msra.mxu0 %vm854_vm5, %v4593_v7  ;;  %3890 = vmatprep.mubr.msk.f32.mxu0 %vm4345_vm3, %v4344_v41 }
 0x4a3   : > { %3913 = vmatprep.subr.mxu0 %v4344_v41  ;;  %v1305_v26 = vmul.f32 %v4235_v6, %v4708_v61 }
 0x4a4   : > { %3914 = vmatpush3.msra.mxu0 %v4602_v8  ;;  %v1538_v30 = vpop.xlane.xlu0 %1537 }
 0x4a5   : > { %4242 = vrcp.f32 %v1538_v30  ;;  %3915 = vmatprep.subr.mxu0 %v4344_v41  ;;  %3891 = vmatmul.mubr.msk.f32.gmra.mxu0 %vm810_vm6, %v1305_v26 }
 0x4a6   : > { %v4237_v45 = vpop.eup %4236  ;;  %3916 = vmatpush3.msra.mxu0 %v4611_v9  ;;  %3893 = vmatprep.mubr.msk.f32.mxu0 %vm4345_vm3, %v4344_v41 }
 0x4a7   : > { %v1306_v7 = vmul.f32 %v4237_v45, %v4712_v58  ;;  %3943 = vmatprep.subr.mxu0 %v4344_v41 }
 0x4a9   : > { %3894 = vmatmul.mubr.msk.f32.gmra.mxu0 %vm810_vm6, %v1306_v7 }
 0x4aa   : > { %v4239_v46 = vpop.eup %4238  ;;  %3917 = vmatprep.mubr.msk.f32.mxu0 %vm4345_vm3, %v4344_v41 }
 0x4ab   : > { %v1542_v8 = vmul.f32 %v4239_v46, %v4716_v11  ;;  %v1723_v46 = vld [vmem:[%s5407_s9 + $0x18] sm:$0xff] }
 0x4ac   : > { %3927 = vmatpush3.msra.mxu1 %v1723_v46 }
 0x4ad   : > { %3918 = vmatmul.mubr.msk.f32.vlgmr.msra.gmra.mxu0 %vm810_vm6, %v1542_v8  ;;  %3928 = vmatprep.subr.mxu1 %v4344_v41  ;;  %v1722_v8 = vld [vmem:[%s5407_s9 + $0x10] sm:$0xff] }
 0x4ae   : > { %v4241_v48 = vpop.eup %4240  ;;  %3920 = vmatprep.mubr.msk.f32.mxu0 %vm4345_vm3, %v4344_v41  ;;  %3929 = vmatpush3.msra.mxu1 %v1722_v8 }
 0x4af   : > { %v1543_v9 = vmul.f32 %v4241_v48, %v4720_v13  ;;  %v1721_v48 = vld [vmem:[%s5407_s9 + $0x8] sm:$0xff]  ;;  %3930 = vmatprep.subr.mxu1 %v4344_v41 }
 0x4b0   : > { %3931 = vmatpush3.msra.mxu1 %v1721_v48 }
 0x4b1   : > { %3921 = vmatmul.mubr.msk.f32.gmra.mxu0 %vm810_vm6, %v1543_v9  ;;  %v1720_v9 = vld [vmem:[%s5407_s9] sm:$0xff]  ;;  %3932 = vmatprep.subr.mxu1 %v4344_v41 }
 0x4b2   : > { %v4243_v34 = vpop.eup %4242  ;;  %3923 = vmatprep.mubr.msk.f32.mxu0 %vm4345_vm3, %v4344_v41  ;;  %3933 = vmatpush3.msra.mxu1 %v1720_v9 }
 0x4b3   : > { %v1544_v38 = vmul.f32 %v4243_v34, %v4724_v15  ;;  %3984 = vmatprep.subr.mxu1 %v4344_v41 }
 0x4b5   : > { %3924 = vmatmul.mubr.msk.f32.gmra.mxu0 %vm810_vm6, %v1544_v38 }
 0x4b6   : > { %3975 = vmatprep.mubr.msk.f32.mxu0 %vm4345_vm3, %v4344_v41 }
 0x4e2   : > { %v923_v49 = vpop.f32.mrf.mxu0 }
 0x4e3   : > { %937 = vst.msk [vmem:[#allocation2] sm:$0xff] %vm717_vm4, %v923_v49 }
 0x4e4   : > { %v3829_v50 = vpop.f32.mrf.mxu0 }
 0x4e6   : > { %v928_v52 = vpop.f32.mrf.mxu0 }
 0x4e7   : > { %938 = vst.msk [vmem:[#allocation2 + $0x8] sm:$0xff] %vm717_vm4, %v928_v52 }
 0x4e8   : > { %v3832_v43 = vpop.f32.mrf.mxu0 }
 0x4ea   : > { %v933_v53 = vpop.f32.mrf.mxu0 }
 0x4eb   : > { %940 = vst.msk [vmem:[#allocation2 + $0x10] sm:$0x1] %vm939_vm8, %v933_v53 }
 0x4ec   : > { %v3835_v54 = vpop.f32.mrf.mxu0 }
 0x554   : > { %v1148_v55 = vpop.f32.mrf.mxu0 }
 0x555   : > { %1165 = vrot.lane.b32.xlu1 %v1148_v55, %s4349_s22 }
 0x556   : > { %v3859_v47 = vpop.f32.mrf.mxu0 }
 0x558   : > { %v1153_v56 = vpop.f32.mrf.mxu0 }
 0x559   : > { %1167 = vrot.lane.b32.xlu1 %v1153_v56, %s4349_s22  ;;  %v3544_v56 = vld [vmem:[%s5405_s7] ss:$0 sm:$0xff] }
 0x55a   : > { %v3862_v57 = vpop.f32.mrf.mxu0 }
 0x55c   : > { %v1158_v59 = vpop.f32.mrf.mxu0 }
 0x55e   : > { %v3865_v60 = vpop.f32.mrf.mxu0 }
 0x561   : > { %v1386_v51 = vpop.f32.mrf.mxu0 }
 0x562   : > { %1403 = vrot.lane.b32.xlu0 %v1386_v51, %s5419_s23 }
 0x563   : > { %v3889_v61 = vpop.f32.mrf.mxu0 }
 0x565   : > { %v1391_v62 = vpop.f32.mrf.mxu0 }
 0x566   : > { %1405 = vrot.lane.b32.xlu1 %v1391_v62, %s5419_s23 }
 0x567   : > { %v3892_v63 = vpop.f32.mrf.mxu0 }
 0x569   : > { %v1396_v58 = vpop.f32.mrf.mxu0 }
 0x56b   : > { %v3895_v0 = vpop.f32.mrf.mxu0 }
 0x56d   : > { %v1624_v11 = vpop.f32.mrf.mxu0 }
 0x56e   : > { %1641 = vrot.lane.b32.xlu1 %v1624_v11, %s5417_s26 }
 0x56f   : > { %v3919_v12 = vpop.f32.mrf.mxu0 }
 0x571   : > { %v1629_v10 = vpop.f32.mrf.mxu0 }
 0x572   : > { %1169 = vrot.lane.b32.xlu1 %v1158_v59, %s4349_s22  ;;  %1643 = vrot.lane.b32.xlu0 %v1629_v10, %s5417_s26  ;;  %v3545_v59 = vld [vmem:[%s5406_s8] ss:$0 sm:$0xff] }
 0x573   : > { %v3922_v13 = vpop.f32.mrf.mxu0 }
 0x574   : > { %v1916_v13 = vld [vmem:[%s5409_s11 + $0x78] sm:$0xff] }
 0x575   : > { %v1634_v14 = vpop.f32.mrf.mxu0  ;;  %3944 = vmatpush3.msra.mxu0 %v1916_v13 }
 0x576   : > { %1407 = vrot.lane.b32.xlu0 %v1396_v58, %s5419_s23  ;;  %1645 = vrot.lane.b32.xlu1 %v1634_v14, %s5417_s26  ;;  %v1915_v14 = vld [vmem:[%s5409_s11 + $0x70] sm:$0xff] }
 0x577   : > { %v3925_v16 = vpop.f32.mrf.mxu0  ;;  %3945 = vmatprep.subr.mxu0 %v4344_v41 }
 0x578   : > { %3946 = vmatpush3.msra.mxu0 %v1915_v14  ;;  %v1914_v16 = vld [vmem:[%s5409_s11 + $0x68] sm:$0xff] }
 0x579   : > { %3947 = vmatprep.subr.mxu0 %v4344_v41 }
 0x57a   : > { %3948 = vmatpush3.msra.mxu0 %v1914_v16 }
 0x57b   : > { %3949 = vmatprep.subr.mxu0 %v4344_v41 }
 0x5c7   : > { %v1166_v15 = vpop.permute.xlu1 %1165 }
 0x5c8   : > { %1175 = vst.msk [vmem:[#allocation2] sm:$0xff] %vm1174_vm9, %v1166_v15  ;;  %v1913_v15 = vld [vmem:[%s5409_s11 + $0x60] sm:$0xff] }
 0x5c9   : > { %3950 = vmatpush3.msra.mxu0 %v1913_v15 }
 0x5ca   : > { %3951 = vmatprep.subr.mxu0 %v4344_v41 }
 0x5cb   : > { %v1168_v21 = vpop.permute.xlu1 %1167 }
 0x5cc   : > { %1176 = vst.msk [vmem:[#allocation2 + $0x8] sm:$0xff] %vm1174_vm9, %v1168_v21  ;;  %v1912_v21 = vld [vmem:[%s5409_s11 + $0x58] sm:$0xff] }
 0x5cd   : > { %3952 = vmatpush3.msra.mxu0 %v1912_v21 }
 0x5ce   : > { %3953 = vmatprep.subr.mxu0 %v4344_v41 }
 0x5d4   : > { %v1404_v20 = vpop.permute.xlu0 %1403 }
 0x5d5   : > { %1413 = vst.msk [vmem:[#allocation2] sm:$0xff] %vm1412_vm10, %v1404_v20  ;;  %v1911_v20 = vld [vmem:[%s5409_s11 + $0x50] sm:$0xff] }
 0x5d6   : > { %3954 = vmatpush3.msra.mxu0 %v1911_v20 }
 0x5d7   : > { %3955 = vmatprep.subr.mxu0 %v4344_v41 }
 0x5d8   : > { %v1406_v25 = vpop.permute.xlu1 %1405 }
 0x5d9   : > { %1414 = vst.msk [vmem:[#allocation2 + $0x8] sm:$0xff] %vm1412_vm10, %v1406_v25  ;;  %v1910_v25 = vld [vmem:[%s5409_s11 + $0x48] sm:$0xff] }
 0x5da   : > { %3956 = vmatpush3.msra.mxu0 %v1910_v25 }
 0x5db   : > { %3957 = vmatprep.subr.mxu0 %v4344_v41 }
 0x5e0   : > { %v1642_v27 = vpop.permute.xlu1 %1641 }
 0x5e1   : > { %1651 = vst.msk [vmem:[#allocation2] sm:$0xff] %vm1650_vm11, %v1642_v27  ;;  %v1909_v27 = vld [vmem:[%s5409_s11 + $0x40] sm:$0xff] }
 0x5e2   : > { %3958 = vmatpush3.msra.mxu0 %v1909_v27 }
 0x5e3   : > { %3959 = vmatprep.subr.mxu0 %v4344_v41 }
 0x5e4   : > { %v1644_v28 = vpop.permute.xlu0 %1643  ;;  %v1170_v29 = vpop.permute.xlu1 %1169 }
 0x5e5   : > { %1652 = vst.msk [vmem:[#allocation2 + $0x8] sm:$0xff] %vm1650_vm11, %v1644_v28  ;;  %v1908_v28 = vld [vmem:[%s5409_s11 + $0x38] sm:$0xff] }
 0x5e6   : > { %1178 = vst.msk [vmem:[#allocation2 + $0x10] sm:$0x1] %vm1177_vm12, %v1170_v29  ;;  %3960 = vmatpush3.msra.mxu0 %v1908_v28  ;;  %v1907_v29 = vld [vmem:[%s5409_s11 + $0x30] sm:$0xff] }
 0x5e7   : > { %3961 = vmatprep.subr.mxu0 %v4344_v41 }
 0x5e8   : > { %v1408_v17 = vpop.permute.xlu0 %1407  ;;  %v1646_v1 = vpop.permute.xlu1 %1645  ;;  %v1655_v2 = vld [vmem:[#allocation2] sm:$0xff]  ;;  %3962 = vmatpush3.msra.mxu0 %v1907_v29 }
 0x5e9   : > { %1416 = vst.msk [vmem:[#allocation2 + $0x10] sm:$0x1] %vm1415_vm13, %v1408_v17  ;;  %v4818_v19 = vadd.f32 %v1655_v2, %v4497_v22  ;;  %3963 = vmatprep.subr.mxu0 %v4344_v41  ;;  %v1906_v17 = vld [vmem:[%s5409_s11 + $0x28] sm:$0xff]  ;;  %v1904_v2 = vld [vmem:[%s5409_s11 + $0x18] sm:$0xff] }
 0x5ea   : > { %1654 = vst.msk [vmem:[#allocation2 + $0x10] sm:$0x1] %vm5421_vm14, %v1646_v1  ;;  %3964 = vmatpush3.msra.mxu0 %v1906_v17  ;;  %v1905_v1 = vld [vmem:[%s5409_s11 + $0x20] sm:$0xff] }
 0x5eb   : > { %v1663_v31 = vsel %vm645_vm2, %v4818_v19, 0.0  ;;  %3965 = vmatprep.subr.mxu0 %v4344_v41 }
 0x5ec   : > { %1664 = vadd.xlane.f32.xlu0 %v1663_v31  ;;  %v1656_v32 = vld [vmem:[#allocation2 + $0x8] sm:$0xff]  ;;  %3966 = vmatpush3.msra.mxu0 %v1905_v1  ;;  %v1903_v31 = vld [vmem:[%s5409_s11 + $0x10] sm:$0xff] }
 0x5ed   : > { %v4824_v3 = vadd.f32 %v1656_v32, %v4499_v23  ;;  %3967 = vmatprep.subr.mxu0 %v4344_v41  ;;  %v1902_v32 = vld [vmem:[%s5409_s11 + $0x8] sm:$0xff] }
 0x5ee   : > { %3968 = vmatpush3.msra.mxu0 %v1904_v2 }
 0x5ef   : > { %v1666_v33 = vsel %vm645_vm2, %v4824_v3, 0.0  ;;  %3969 = vmatprep.subr.mxu0 %v4344_v41 }
 0x5f0   : > { %1667 = vadd.xlane.f32.xlu1 %v1666_v33  ;;  %3970 = vmatpush3.msra.mxu0 %v1903_v31  ;;  %v1901_v33 = vld [vmem:[%s5409_s11] sm:$0xff] }
 0x5f1   : > { %v1657_v35 = vld [vmem:[#allocation2 + $0x10] sm:$0x1]  ;;  %3971 = vmatprep.subr.mxu0 %v4344_v41 }
 0x5f2   : > { %v4829_v24 = vadd.f32 %v1657_v35, %v4493_v18  ;;  %3972 = vmatpush3.msra.mxu0 %v1902_v32  ;;  %v3546_v35 = vld [vmem:[%s5408_s10] ss:$0 sm:$0xff] }
 0x5f3   : > { %3973 = vmatprep.subr.mxu0 %v4344_v41 }
 0x5f4   : > { %v1669_v22 = vsel %vm643_vm1, %v4829_v24, 0.0  ;;  %3974 = vmatpush3.msra.mxu0 %v1901_v33 }
 0x5f5   : > { %1670 = vadd.xlane.f32.xlu0 %v1669_v22  ;;  %4029 = vmatprep.subr.mxu0 %v4344_v41 }
 0x675   : > { %v1665_v36 = vpop.xlane.xlu0 %1664 }
 0x676   : > { %v1672_v37 = vmul.f32 0.03125, %v1665_v36 }
 0x678   : > { %v1675_v39 = vsub.f32 %v4818_v19, %v1672_v37 }
 0x679   : > { %v1668_v4 = vpop.xlane.xlu1 %1667 }
 0x67a   : > { %v1673_v40 = vmul.f32 0.03125, %v1668_v4  ;;  %v1678_v23 = vmul.f32 %v1675_v39, %v1675_v39 }
 0x67c   : > { %v1676_v5 = vsub.f32 %v4824_v3, %v1673_v40  ;;  %v1681_v42 = vsel %vm645_vm2, %v1678_v23, 0.0 }
 0x67d   : > { %1682 = vadd.xlane.f32.xlu0 %v1681_v42 }
 0x67e   : > { %v1671_v44 = vpop.xlane.xlu0 %1670  ;;  %v1679_v6 = vmul.f32 %v1676_v5, %v1676_v5 }
 0x67f   : > { %v1674_v18 = vmul.f32 0.03125, %v1671_v44 }
 0x680   : > { %v1684_v26 = vsel %vm645_vm2, %v1679_v6, 0.0 }
 0x681   : > { %v1677_v30 = vsub.f32 %v4829_v24, %v1674_v18  ;;  %1685 = vadd.xlane.f32.xlu0 %v1684_v26 }
 0x683   : > { %v1680_v45 = vmul.f32 %v1677_v30, %v1677_v30 }
 0x685   : > { %v1687_v7 = vsel %vm643_vm1, %v1680_v45, 0.0 }
 0x686   : > { %1688 = vadd.xlane.f32.xlu1 %v1687_v7 }
 0x706   : > { %v1683_v34 = vpop.xlane.xlu0 %1682 }
 0x707   : > { %v1690_v38 = vmul.f32 0.03125, %v1683_v34 }
 0x709   : > { %v1693_v49 = vadd.f32 1e-05, %v1690_v38 }
 0x70a   : > { %v1686_v50 = vpop.xlane.xlu0 %1685 }
 0x70b   : > { %4244 = vrsqrt.f32 %v1693_v49  ;;  %v1691_v52 = vmul.f32 0.03125, %v1686_v50 }
 0x70d   : > { %v1694_v43 = vadd.f32 1e-05, %v1691_v52 }
 0x70f   : > { %4246 = vrsqrt.f32 %v1694_v43  ;;  %v1689_v53 = vpop.xlane.xlu1 %1688 }
 0x710   : > { %v1692_v54 = vmul.f32 0.03125, %v1689_v53 }
 0x712   : > { %v1695_v55 = vadd.f32 1e-05, %v1692_v54 }
 0x714   : > { %4248 = vrsqrt.f32 %v1695_v55 }
 0x718   : > { %v4245_v47 = vpop.eup %4244 }
 0x719   : > { %v1699_v57 = vmul.f32 %v4245_v47, %v1675_v39 }
 0x71b   : > { %v1708_v60 = vmul.f32 %v3544_v56, %v1699_v57 }
 0x71c   : > { %v4247_v51 = vpop.eup %4246 }
 0x71d   : > { %v1717_v61 = vadd.f32 %v3545_v59, %v1708_v60  ;;  %v1700_v62 = vmul.f32 %v4247_v51, %v1676_v5 }
 0x71f   : > { %3935 = vmatmul.mubr.msk.f32.vlgmr.msra.gmra.mxu1 %vm645_vm2, %v1717_v61  ;;  %v1709_v63 = vmul.f32 %v3544_v56, %v1700_v62 }
 0x720   : > { %3937 = vmatprep.mubr.msk.f32.mxu1 %vm4345_vm3, %v4344_v41 }
 0x721   : > { %v4249_v58 = vpop.eup %4248  ;;  %v1718_v0 = vadd.f32 %v3545_v59, %v1709_v63 }
 0x722   : > { %v1701_v11 = vmul.f32 %v4249_v58, %v1677_v30 }
 0x723   : > { %3938 = vmatmul.mubr.msk.f32.gmra.mxu1 %vm645_vm2, %v1718_v0 }
 0x724   : > { %3940 = vmatprep.mubr.msk.f32.mxu1 %vm4345_vm3, %v4344_v41  ;;  %v1710_v12 = vmul.f32 %v3544_v56, %v1701_v11 }
 0x726   : > { %v1719_v10 = vadd.f32 %v3545_v59, %v1710_v12 }
 0x728   : > { %3941 = vmatmul.mubr.msk.f32.gmra.mxu1 %vm645_vm2, %v1719_v10 }
 0x729   : > { %3990 = vmatprep.mubr.msk.f32.mxu1 %vm4345_vm3, %v4344_v41 }
 0x7df   : > { %v1806_v22 = vpop.f32.mrf.mxu1 }
 0x7e0   : > { %v4937_v36 = vadd.f32 %v3546_v35, %v1806_v22 }
 0x7e1   : > { %v3936_v37 = vpop.f32.mrf.mxu1 }
 0x7e2   : > { %v4940_v39 = vmul.f32 0.70710677, %v4937_v36  ;;  %v4352_v37 = vmov -1.0  }
 0x7e3   : > { %v1811_v4 = vpop.f32.mrf.mxu1 }
 0x7e4   : > { %v1829_v40 = vand.u32 2147483647, %v4940_v39  ;;  %v4943_v23 = vadd.f32 %v3546_v35, %v1811_v4  ;;  %vm1823_vm15 = vcmp.ge.f32.partialorder %v4940_v39, 0.0 }
 0x7e5   : > { %v3939_v5 = vpop.f32.mrf.mxu1  ;;  %v1826_v4 = vsel %vm1823_vm15, 1.0, %v4352_v37 }
 0x7e6   : > { %v1832_v42 = vmul.f32 0.3275911, %v1829_v40  ;;  %v4946_v44 = vmul.f32 0.70710677, %v4943_v23  ;;  %v1871_v34 = vsub.f32 0.0, %v1829_v40 }
 0x7e8   : > { %v1835_v6 = vadd.f32 1.0, %v1832_v42  ;;  %v1830_v18 = vand.u32 2147483647, %v4946_v44  ;;  %v1816_v26 = vpop.f32.mrf.mxu1  ;;  %v1874_v49 = vmul.f32 %v1871_v34, %v1829_v40  ;;  %vm1824_vm0 = vcmp.ge.f32.partialorder %v4946_v44, 0.0 }
 0x7e9   : > { %v4949_v30 = vadd.f32 %v3546_v35, %v1816_v26  ;;  %v1827_v39 = vsel %vm1824_vm0, 1.0, %v4352_v37 }
 0x7ea   : > { %4250 = vrcp.f32 %v1835_v6  ;;  %v1833_v45 = vmul.f32 0.3275911, %v1830_v18  ;;  %v3942_v7 = vpop.f32.mrf.mxu1  ;;  %v1872_v50 = vsub.f32 0.0, %v1830_v18  ;;  %v1877_v53 = vmul.f32 1.442695, %v1874_v49 }
 0x7eb   : > { %v4952_v46 = vmul.f32 0.70710677, %v4949_v30 }
 0x7ec   : > { %v1836_v8 = vadd.f32 1.0, %v1833_v45  ;;  %v1875_v54 = vmul.f32 %v1872_v50, %v1830_v18  ;;  %v1892_v18 = vmul.f32 0.5, %v4937_v36 }
 0x7ed   : > { %v1831_v48 = vand.u32 2147483647, %v4952_v46  ;;  %vm1825_vm14 = vcmp.ge.f32.partialorder %v4952_v46, 0.0 }
 0x7ee   : > { %4252 = vrcp.f32 %v1836_v8  ;;  %v1879_v59 = vmul.f32 1.442695, %v1875_v54  ;;  %v1828_v36 = vsel %vm1825_vm14, 1.0, %v4352_v37 }
 0x7ef   : > { %v1834_v9 = vmul.f32 0.3275911, %v1831_v48  ;;  %v1873_v55 = vsub.f32 0.0, %v1831_v48 }
 0x7f1   : > { %v1837_v38 = vadd.f32 1.0, %v1834_v9  ;;  %v1876_v51 = vmul.f32 %v1873_v55, %v1831_v48  ;;  %v3550_v55 = vld [vmem:[%s5410_s12] ss:$0 sm:$0xff] }
 0x7f3   : > { %4254 = vrcp.f32 %v1837_v38  ;;  %v1881_v11 = vmul.f32 1.442695, %v1876_v51  ;;  %v1893_v38 = vmul.f32 0.5, %v4943_v23 }
 0x7f4   : > { %4256 = vpow2.f32 %v1877_v53 }
 0x7f5   : > { %4258 = vpow2.f32 %v1879_v59 }
 0x7f6   : > { %4260 = vpow2.f32 %v1881_v11 }
 0x7f7   : > { %v4251_v52 = vpop.eup %4250 }
 0x7f8   : > { %v1844_v43 = vmul.f32 1.0614054, %v4251_v52 }
 0x7fa   : > { %v1847_v47 = vadd.f32 -1.4531521, %v1844_v43  ;;  %v1894_v43 = vmul.f32 0.5, %v4949_v30 }
 0x7fb   : > { %v4253_v56 = vpop.eup %4252 }
 0x7fc   : > { %v1850_v57 = vmul.f32 %v4251_v52, %v1847_v47  ;;  %v1845_v60 = vmul.f32 1.0614054, %v4253_v56 }
 0x7fe   : > { %v1853_v61 = vadd.f32 1.4214138, %v1850_v57  ;;  %v1848_v62 = vadd.f32 -1.4531521, %v1845_v60 }
 0x800   : > { %v4255_v63 = vpop.eup %4254  ;;  %v1856_v58 = vmul.f32 %v4251_v52, %v1853_v61  ;;  %v1851_v0 = vmul.f32 %v4253_v56, %v1848_v62 }
 0x801   : > { %v1846_v12 = vmul.f32 1.0614054, %v4255_v63  ;;  %v4257_v17 = vpop.eup %4256 }
 0x802   : > { %v1859_v10 = vadd.f32 -0.28449672, %v1856_v58  ;;  %v1854_v13 = vadd.f32 1.4214138, %v1851_v0  ;;  %v4259_v22 = vpop.eup %4258 }
 0x803   : > { %v1849_v14 = vadd.f32 -1.4531521, %v1846_v12  ;;  %v4261_v8 = vpop.eup %4260 }
 0x804   : > { %v1862_v16 = vmul.f32 %v4251_v52, %v1859_v10  ;;  %v1857_v15 = vmul.f32 %v4253_v56, %v1854_v13 }
 0x805   : > { %v1852_v21 = vmul.f32 %v4255_v63, %v1849_v14 }
 0x806   : > { %v1865_v20 = vadd.f32 0.2548296, %v1862_v16  ;;  %v1860_v25 = vadd.f32 -0.28449672, %v1857_v15 }
 0x807   : > { %v1855_v27 = vadd.f32 1.4214138, %v1852_v21 }
 0x808   : > { %v1868_v28 = vmul.f32 %v4251_v52, %v1865_v20  ;;  %v1863_v29 = vmul.f32 %v4253_v56, %v1860_v25 }
 0x809   : > { %v1858_v1 = vmul.f32 %v4255_v63, %v1855_v27 }
 0x80a   : > { %v1883_v2 = vmul.f32 %v4257_v17, %v1868_v28  ;;  %v1866_v31 = vadd.f32 0.2548296, %v1863_v29 }
 0x80b   : > { %v1861_v32 = vadd.f32 -0.28449672, %v1858_v1 }
 0x80c   : > { %v1886_v33 = vsub.f32 1.0, %v1883_v2  ;;  %v1869_v35 = vmul.f32 %v4253_v56, %v1866_v31 }
 0x80d   : > { %v1864_v40 = vmul.f32 %v4255_v63, %v1861_v32 }
 0x80e   : > { %v1889_v5 = vmul.f32 %v1886_v33, %v1826_v4  ;;  %v1884_v42 = vmul.f32 %v4259_v22, %v1869_v35 }
 0x80f   : > { %v1867_v6 = vadd.f32 0.2548296, %v1864_v40 }
 0x810   : > { %v1895_v26 = vadd.f32 1.0, %v1889_v5  ;;  %v1887_v45 = vsub.f32 1.0, %v1884_v42 }
 0x811   : > { %v1870_v7 = vmul.f32 %v4255_v63, %v1867_v6 }
 0x812   : > { %v1898_v48 = vmul.f32 %v1895_v26, %v1892_v18  ;;  %v1890_v9 = vmul.f32 %v1887_v45, %v1827_v39  ;;  %v3553_v18 = vld [vmem:[%s5403_s5 + $0x1] ss:$0 sm:$0xff] }
 0x813   : > { %v1885_v34 = vmul.f32 %v4261_v8, %v1870_v7  ;;  %v3554_v39 = vld [vmem:[%s5404_s6 + $0x1] ss:$0 sm:$0xff] }
 0x814   : > { %3976 = vmatmul.mubr.f32.vlgmr.msra.gmra.mxu0 %v1898_v48  ;;  %v1896_v49 = vadd.f32 1.0, %v1890_v9 }
 0x815   : > { %3978 = vmatprep.mubr.msk.f32.mxu0 %vm4345_vm3, %v4344_v41  ;;  %v1888_v44 = vsub.f32 1.0, %v1885_v34 }
 0x816   : > { %v1899_v50 = vmul.f32 %v1896_v49, %v1893_v38 }
 0x817   : > { %v1891_v52 = vmul.f32 %v1888_v44, %v1828_v36 }
 0x818   : > { %3979 = vmatmul.mubr.f32.gmra.mxu0 %v1899_v50 }
 0x819   : > { %3981 = vmatprep.mubr.msk.f32.mxu0 %vm4345_vm3, %v4344_v41  ;;  %v1897_v46 = vadd.f32 1.0, %v1891_v52 }
 0x81b   : > { %v1900_v53 = vmul.f32 %v1897_v46, %v1894_v43 }
 0x81d   : > { %3982 = vmatmul.mubr.f32.gmra.mxu0 %v1900_v53 }
 0x81e   : > { %4035 = vmatprep.mubr.msk.f32.mxu0 %vm4345_vm3, %v4344_v41 }
 0x8d4   : > { %v1990_v23 = vpop.f32.mrf.mxu0 }
 0x8d5   : > { %v1991_v51 = vadd.f32 %v3550_v55, %v1990_v23 }
 0x8d6   : > { %v3977_v54 = vpop.f32.mrf.mxu0 }
 0x8d7   : > { %v4982_v58 = vadd.f32 %v1991_v51, %v4818_v19 }
 0x8d8   : > { %v1995_v47 = vpop.f32.mrf.mxu0 }
 0x8d9   : > { %v1996_v56 = vadd.f32 %v3550_v55, %v1995_v47 }
 0x8da   : > { %v3980_v57 = vpop.f32.mrf.mxu0 }
 0x8db   : > { %v4974_v30 = vadd.f32 %v1996_v56, %v4824_v3  ;;  %v2011_v3 = vsel %vm645_vm2, %v4982_v58, 0.0 }
 0x8dd   : > { %v2000_v59 = vpop.f32.mrf.mxu0  ;;  %v2014_v60 = vsel %vm645_vm2, %v4974_v30, 0.0 }
 0x8de   : > { %v2001_v61 = vadd.f32 %v3550_v55, %v2000_v59  ;;  %2015 = vadd.xlane.f32.xlu1 %v2014_v60 }
 0x8df   : > { %v3983_v62 = vpop.f32.mrf.mxu0 }
 0x8e0   : > { %v4979_v63 = vadd.f32 %v2001_v61, %v4829_v24 }
 0x8e2   : > { %v2017_v0 = vsel %vm643_vm1, %v4979_v63, 0.0 }
 0x8e3   : > { %2018 = vadd.xlane.f32.xlu0 %v2017_v0 }
 0x8e7   : > { %2012 = vadd.xlane.f32.xlu0 %v2011_v3 }
 0x967   : > { %v2016_v11 = vpop.xlane.xlu1 %2015 }
 0x968   : > { %v2021_v12 = vmul.f32 0.03125, %v2016_v11 }
 0x96a   : > { %v2024_v10 = vsub.f32 %v4974_v30, %v2021_v12 }
 0x96c   : > { %v2019_v13 = vpop.xlane.xlu0 %2018  ;;  %v2027_v14 = vmul.f32 %v2024_v10, %v2024_v10 }
 0x96d   : > { %v2022_v16 = vmul.f32 0.03125, %v2019_v13 }
 0x96e   : > { %v2032_v24 = vsel %vm645_vm2, %v2027_v14, 0.0 }
 0x96f   : > { %v2025_v19 = vsub.f32 %v4979_v63, %v2022_v16  ;;  %2033 = vadd.xlane.f32.xlu0 %v2032_v24 }
 0x970   : > { %v2013_v15 = vpop.xlane.xlu0 %2012 }
 0x971   : > { %v2020_v21 = vmul.f32 0.03125, %v2013_v15  ;;  %v2028_v20 = vmul.f32 %v2025_v19, %v2025_v19 }
 0x973   : > { %v2023_v25 = vsub.f32 %v4982_v58, %v2020_v21  ;;  %v2035_v27 = vsel %vm643_vm1, %v2028_v20, 0.0 }
 0x974   : > { %2036 = vadd.xlane.f32.xlu1 %v2035_v27 }
 0x975   : > { %v2026_v28 = vmul.f32 %v2023_v25, %v2023_v25 }
 0x977   : > { %v2029_v29 = vsel %vm645_vm2, %v2026_v28, 0.0 }
 0x978   : > { %2030 = vadd.xlane.f32.xlu1 %v2029_v29 }
 0x9f8   : > { %v2034_v17 = vpop.xlane.xlu0 %2033 }
 0x9f9   : > { %v2039_v1 = vmul.f32 0.03125, %v2034_v17 }
 0x9fb   : > { %v2042_v2 = vadd.f32 1e-05, %v2039_v1 }
 0x9fd   : > { %v2037_v31 = vpop.xlane.xlu1 %2036  ;;  %4262 = vrsqrt.f32 %v2042_v2 }
 0x9fe   : > { %v2040_v32 = vmul.f32 0.03125, %v2037_v31 }
 0xa00   : > { %v2043_v33 = vadd.f32 1e-05, %v2040_v32 }
 0xa01   : > { %v2031_v35 = vpop.xlane.xlu1 %2030 }
 0xa02   : > { %4264 = vrsqrt.f32 %v2043_v33  ;;  %v2038_v22 = vmul.f32 0.03125, %v2031_v35 }
 0xa04   : > { %v2041_v4 = vadd.f32 1e-05, %v2038_v22 }
 0xa06   : > { %4266 = vrsqrt.f32 %v2041_v4 }
 0xa0a   : > { %v4263_v40 = vpop.eup %4262 }
 0xa0b   : > { %v2048_v42 = vmul.f32 %v4263_v40, %v2024_v10 }
 0xa0d   : > { %v2057_v7 = vmul.f32 %v3553_v18, %v2048_v42 }
 0xa0f   : > { %v4265_v5 = vpop.eup %4264  ;;  %v2066_v34 = vadd.f32 %v3554_v39, %v2057_v7 }
 0xa10   : > { %v2049_v6 = vmul.f32 %v4265_v5, %v2025_v19 }
 0xa12   : > { %v2058_v26 = vmul.f32 %v3553_v18, %v2049_v6 }
 0xa13   : > { %v4267_v45 = vpop.eup %4266 }
 0xa14   : > { %v2047_v8 = vmul.f32 %v4267_v45, %v2023_v25  ;;  %v5000_v48 = vadd.f32 %v3554_v39, %v2058_v26 }
 0xa16   : > { %3985 = vmatpush3.xpose.msk.msra.mxu1 %vm717_vm4, %v5000_v48  ;;  %v2056_v9 = vmul.f32 %v3553_v18, %v2047_v8 }
 0xa17   : > { %3986 = vmatprep.subr.mxu1 %v4344_v41 }
 0xa18   : > { %v2065_v38 = vadd.f32 %v3554_v39, %v2056_v9 }
 0xa1a   : > { %3987 = vmatpush3.xpose.msk.msra.mxu1 %vm717_vm4, %v2066_v34 }
 0xa1b   : > { %3988 = vmatprep.subr.mxu1 %v4344_v41 }
 0xa1e   : > { %3989 = vmatpush3.xpose.msk.msra.mxu1 %vm717_vm4, %v2065_v38 }
 0xa1f   : > { %3999 = vmatprep.subr.mxu1 %v4344_v41 }
 0xa21   : > { %3991 = vmatmul.mubr.msk.f32.vlgmr.msra.gmra.mxu1 %vm717_vm4, %v2065_v38 }
 0xa22   : > { %4000 = vmatpush3.msk.msra.mxu1 %vm854_vm5, %v5000_v48  ;;  %3993 = vmatprep.mubr.msk.f32.mxu1 %vm4345_vm3, %v4344_v41 }
 0xa23   : > { %4001 = vmatprep.subr.mxu1 %v4344_v41 }
 0xa24   : > { %4002 = vmatpush3.msra.mxu1 %v2066_v34 }
 0xa25   : > { %3994 = vmatmul.mubr.msk.f32.gmra.mxu1 %vm717_vm4, %v2066_v34  ;;  %4003 = vmatprep.subr.mxu1 %v4344_v41 }
 0xa26   : > { %4004 = vmatpush3.msra.mxu1 %v2065_v38  ;;  %3996 = vmatprep.mubr.msk.f32.mxu1 %vm4345_vm3, %v4344_v41 }
 0xa27   : > { %4014 = vmatprep.subr.mxu1 %v4344_v41 }
 0xa29   : > { %3997 = vmatmul.mubr.msk.f32.gmra.mxu1 %vm717_vm4, %v5000_v48 }
 0xa2a   : > { %4005 = vmatprep.mubr.msk.f32.mxu1 %vm4345_vm3, %v4344_v41 }
 0xae1   : > { %v2143_v49 = vpop.f32.mrf.mxu1 }
 0xae2   : > { %v2157_v44 = vmul.f32 0.17677669, %v2143_v49 }
 0xae3   : > { %v3992_v36 = vpop.f32.mrf.mxu1 }
 0xae4   : > { %v2160_v50 = vsel %vm810_vm6, %v2157_v44, -inf }
 0xae5   : > { %2161 = vmax.xlane.f32.xlu0 %v2160_v50  ;;  %v2148_v52 = vpop.f32.mrf.mxu1 }
 0xae6   : > { %v2158_v43 = vmul.f32 0.17677669, %v2148_v52 }
 0xae7   : > { %v3995_v46 = vpop.f32.mrf.mxu1 }
 0xae8   : > { %v2163_v53 = vsel %vm810_vm6, %v2158_v43, -inf }
 0xae9   : > { %2164 = vmax.xlane.f32.xlu1 %v2163_v53  ;;  %v2153_v23 = vpop.f32.mrf.mxu1 }
 0xaea   : > { %v2159_v54 = vmul.f32 0.17677669, %v2153_v23 }
 0xaeb   : > { %v3998_v55 = vpop.f32.mrf.mxu1 }
 0xaec   : > { %v2166_v47 = vsel %vm817_vm7, %v2159_v54, -inf }
 0xaed   : > { %2167 = vmax.xlane.f32.xlu0 %v2166_v47 }
 0xb6e   : > { %v2162_v56 = vpop.xlane.xlu0 %2161 }
 0xb6f   : > { %v2169_v57 = vsub.f32 %v2157_v44, %v2162_v56 }
 0xb71   : > { %v2172_v59 = vmul.f32 1.442695, %v2169_v57 }
 0xb72   : > { %v2165_v60 = vpop.xlane.xlu1 %2164 }
 0xb73   : > { %4268 = vpow2.f32 %v2172_v59  ;;  %v2170_v51 = vsub.f32 %v2158_v43, %v2165_v60 }
 0xb75   : > { %v2174_v61 = vmul.f32 1.442695, %v2170_v51 }
 0xb76   : > { %v2168_v12 = vpop.xlane.xlu0 %2167 }
 0xb77   : > { %4270 = vpow2.f32 %v2174_v61  ;;  %v2171_v10 = vsub.f32 %v2159_v54, %v2168_v12 }
 0xb79   : > { %v2176_v13 = vmul.f32 1.442695, %v2171_v10 }
 0xb7b   : > { %4272 = vpow2.f32 %v2176_v13 }
 0xb80   : > { %v4269_v62 = vpop.eup %4268 }
 0xb81   : > { %v2178_v0 = vsel %vm810_vm6, %v4269_v62, 0.0 }
 0xb82   : > { %2179 = vadd.xlane.f32.xlu1 %v2178_v0 }
 0xb84   : > { %v4271_v3 = vpop.eup %4270 }
 0xb85   : > { %v2181_v11 = vsel %vm810_vm6, %v4271_v3, 0.0 }
 0xb86   : > { %2182 = vadd.xlane.f32.xlu0 %v2181_v11 }
 0xb88   : > { %v4273_v14 = vpop.eup %4272 }
 0xb89   : > { %v2184_v16 = vsel %vm817_vm7, %v4273_v14, 0.0 }
 0xb93   : > { %2289 = vrot.lane.b32.xlu1 %v2066_v34, %s4346_s1 }
 0xb97   : > { %2287 = vrot.lane.b32.xlu1 %v2065_v38, %s4346_s1 }
 0xb9c   : > { %2291 = vrot.lane.b32.xlu0 %v5000_v48, %s4346_s1  ;;  %s5426_s1 = smov 16  }
 0xba0   : > { %2525 = vrot.lane.b32.xlu0 %v2066_v34, %s4347_s20 }
 0xba4   : > { %2763 = vrot.lane.b32.xlu0 %v5000_v48, %s4348_s21 }
 0xba8   : > { %2759 = vrot.lane.b32.xlu0 %v2065_v38, %s4348_s21 }
 0xbbb   : > { %2185 = vadd.xlane.f32.xlu1 %v2184_v16 }
 0xbcc   : > { %2527 = vrot.lane.b32.xlu1 %v5000_v48, %s4347_s20 }
 0xbd0   : > { %2523 = vrot.lane.b32.xlu1 %v2065_v38, %s4347_s20  ;;  %s5427_s20 = smov 24  }
 0xbd4   : > { %2761 = vrot.lane.b32.xlu1 %v2066_v34, %s4348_s21 }
 0xc0b   : > { %v2180_v24 = vpop.xlane.xlu1 %2179 }
 0xc0c   : > { %4274 = vrcp.f32 %v2180_v24 }
 0xc0f   : > { %v2183_v19 = vpop.xlane.xlu0 %2182  ;;  %v2290_v15 = vpop.permute.xlu1 %2289 }
 0xc10   : > { %4276 = vrcp.f32 %v2183_v19 }
 0xc13   : > { %v2292_v21 = vpop.permute.xlu0 %2291  ;;  %v2288_v20 = vpop.permute.xlu1 %2287 }
 0xc14   : > { %4030 = vmatpush3.msk.msra.mxu0 %vm854_vm5, %v2292_v21 }
 0xc15   : > { %4031 = vmatprep.subr.mxu0 %v4344_v41 }
 0xc16   : > { %4032 = vmatpush3.msra.mxu0 %v2290_v15 }
 0xc17   : > { %4033 = vmatprep.subr.mxu0 %v4344_v41  ;;  %v5069_v32 = vpop.permute.xlu0 %2525 }
 0xc18   : > { %4034 = vmatpush3.msra.mxu0 %v2288_v20 }
 0xc19   : > { %v4275_v25 = vpop.eup %4274  ;;  %4059 = vmatprep.subr.mxu0 %v4344_v41 }
 0xc1a   : > { %v2190_v27 = vmul.f32 %v4275_v25, %v4269_v62 }
 0xc1b   : > { %v5085_v35 = vpop.permute.xlu0 %2763 }
 0xc1c   : > { %4006 = vmatmul.mubr.msk.f32.vlgmr.msra.gmra.mxu1 %vm810_vm6, %v2190_v27 }
 0xc1d   : > { %v4277_v28 = vpop.eup %4276  ;;  %4015 = vmatpush3.xpose.msk.msra.mxu1 %vm717_vm4, %v2292_v21  ;;  %4008 = vmatprep.mubr.msk.f32.mxu1 %vm4345_vm3, %v4344_v41 }
 0xc1e   : > { %4016 = vmatprep.subr.mxu1 %v4344_v41  ;;  %v2191_v29 = vmul.f32 %v4277_v28, %v4271_v3 }
 0xc1f   : > { %v5103_v4 = vpop.permute.xlu0 %2759 }
 0xc20   : > { %4009 = vmatmul.mubr.msk.f32.gmra.mxu1 %vm810_vm6, %v2191_v29 }
 0xc21   : > { %4017 = vmatpush3.xpose.msk.msra.mxu1 %vm717_vm4, %v2290_v15  ;;  %4011 = vmatprep.mubr.msk.f32.mxu1 %vm4345_vm3, %v4344_v41 }
 0xc22   : > { %4018 = vmatprep.subr.mxu1 %v4344_v41 }
 0xc25   : > { %4019 = vmatpush3.xpose.msk.msra.mxu1 %vm717_vm4, %v2288_v20 }
 0xc26   : > { %4044 = vmatprep.subr.mxu1 %v4344_v41 }
 0xc44   : > { %v2186_v17 = vpop.xlane.xlu1 %2185 }
 0xc45   : > { %4278 = vrcp.f32 %v2186_v17 }
 0xc48   : > { %v5061_v31 = vpop.permute.xlu1 %2527 }
 0xc4c   : > { %v5077_v33 = vpop.permute.xlu1 %2523 }
 0xc50   : > { %v5094_v22 = vpop.permute.xlu1 %2761 }
 0xc52   : > { %v4279_v1 = vpop.eup %4278 }
 0xc53   : > { %v2192_v2 = vmul.f32 %v4279_v1, %v4273_v14 }
 0xc55   : > { %4012 = vmatmul.mubr.msk.f32.gmra.mxu1 %vm810_vm6, %v2192_v2 }
 0xc56   : > { %4020 = vmatprep.mubr.msk.f32.mxu1 %vm4345_vm3, %v4344_v41 }
 0xc59   : > { %4021 = vmatmul.mubr.msk.f32.vlgmr.msra.gmra.mxu1 %vm717_vm4, %v2288_v20 }
 0xc5a   : > { %4045 = vmatpush3.xpose.msk.msra.mxu1 %vm717_vm4, %v5061_v31  ;;  %4023 = vmatprep.mubr.msk.f32.mxu1 %vm4345_vm3, %v4344_v41 }
 0xc5b   : > { %4046 = vmatprep.subr.mxu1 %v4344_v41 }
 0xc5d   : > { %4024 = vmatmul.mubr.msk.f32.gmra.mxu1 %vm717_vm4, %v2290_v15 }
 0xc5e   : > { %4047 = vmatpush3.xpose.msk.msra.mxu1 %vm717_vm4, %v5069_v32  ;;  %4026 = vmatprep.mubr.msk.f32.mxu1 %vm4345_vm3, %v4344_v41 }
 0xc5f   : > { %4048 = vmatprep.subr.mxu1 %v4344_v41 }
 0xc61   : > { %4027 = vmatmul.mubr.msk.f32.gmra.mxu1 %vm717_vm4, %v2292_v21 }
 0xc62   : > { %4049 = vmatpush3.xpose.msk.msra.mxu1 %vm717_vm4, %v5077_v33  ;;  %4050 = vmatprep.mubr.msk.f32.mxu1 %vm4345_vm3, %v4344_v41 }
 0xc63   : > { %4074 = vmatprep.subr.mxu1 %v4344_v41 }
 0xc65   : > { %4051 = vmatmul.mubr.msk.f32.vlgmr.msra.gmra.mxu1 %vm717_vm4, %v5077_v33 }
 0xc66   : > { %4075 = vmatpush3.xpose.msk.msra.mxu1 %vm717_vm4, %v5085_v35  ;;  %4053 = vmatprep.mubr.msk.f32.mxu1 %vm4345_vm3, %v4344_v41 }
 0xc67   : > { %4076 = vmatprep.subr.mxu1 %v4344_v41 }
 0xc69   : > { %4054 = vmatmul.mubr.msk.f32.gmra.mxu1 %vm717_vm4, %v5069_v32 }
 0xc6a   : > { %4077 = vmatpush3.xpose.msk.msra.mxu1 %vm717_vm4, %v5094_v22  ;;  %4056 = vmatprep.mubr.msk.f32.mxu1 %vm4345_vm3, %v4344_v41 }
 0xc6b   : > { %4078 = vmatprep.subr.mxu1 %v4344_v41 }
 0xc6d   : > { %4057 = vmatmul.mubr.msk.f32.gmra.mxu1 %vm717_vm4, %v5061_v31 }
 0xc6e   : > { %4079 = vmatpush3.xpose.msk.msra.mxu1 %vm717_vm4, %v5103_v4  ;;  %4080 = vmatprep.mubr.msk.f32.mxu1 %vm4345_vm3, %v4344_v41 }
 0xc6f   : > { %4104 = vmatprep.subr.mxu1 %v4344_v41 }
 0xc71   : > { %4081 = vmatmul.mubr.msk.f32.vlgmr.msra.gmra.mxu1 %vm717_vm4, %v5103_v4 }
 0xc72   : > { %4083 = vmatprep.mubr.msk.f32.mxu1 %vm4345_vm3, %v4344_v41 }
 0xc75   : > { %4084 = vmatmul.mubr.msk.f32.gmra.mxu1 %vm717_vm4, %v5094_v22 }
 0xc76   : > { %4086 = vmatprep.mubr.msk.f32.mxu1 %vm4345_vm3, %v4344_v41 }
 0xc79   : > { %4087 = vmatmul.mubr.msk.f32.gmra.mxu1 %vm717_vm4, %v5085_v35 }
 0xc7a   : > { %4112 = vmatprep.mubr.msk.f32.mxu1 %vm4345_vm3, %v4344_v41 }
 0xcdc   : > { %v2270_v40 = vpop.f32.mrf.mxu1 }
 0xcdd   : > { %2284 = vst.msk [vmem:[#allocation2] sm:$0xff] %vm717_vm4, %v2270_v40 }
 0xcde   : > { %v4007_v5 = vpop.f32.mrf.mxu1 }
 0xce0   : > { %v2275_v42 = vpop.f32.mrf.mxu1 }
 0xce1   : > { %2285 = vst.msk [vmem:[#allocation2 + $0x8] sm:$0xff] %vm717_vm4, %v2275_v42  ;;  %vm5428_vm4 = vcmask 254144  }
 0xce2   : > { %v4010_v6 = vpop.f32.mrf.mxu1 }
 0xd15   : > { %v2280_v18 = vpop.f32.mrf.mxu1 }
 0xd16   : > { %2286 = vst.msk [vmem:[#allocation2 + $0x10] sm:$0x1] %vm939_vm8, %v2280_v18 }
 0xd17   : > { %v4013_v26 = vpop.f32.mrf.mxu1 }
 0xd19   : > { %v2365_v45 = vpop.f32.mrf.mxu1 }
 0xd1a   : > { %v2379_v39 = vmul.f32 0.17677669, %v2365_v45 }
 0xd1b   : > { %v4022_v7 = vpop.f32.mrf.mxu1 }
 0xd1c   : > { %v2382_v8 = vsel %vm810_vm6, %v2379_v39, -inf }
 0xd1d   : > { %2383 = vmax.xlane.f32.xlu1 %v2382_v8  ;;  %v2370_v48 = vpop.f32.mrf.mxu1 }
 0xd1e   : > { %v2380_v9 = vmul.f32 0.17677669, %v2370_v48 }
 0xd1f   : > { %v4025_v34 = vpop.f32.mrf.mxu1 }
 0xd20   : > { %v2385_v38 = vsel %vm810_vm6, %v2380_v9, -inf }
 0xd21   : > { %2386 = vmax.xlane.f32.xlu0 %v2385_v38  ;;  %v2375_v49 = vpop.f32.mrf.mxu1 }
 0xd22   : > { %v2381_v44 = vmul.f32 0.17677669, %v2375_v49 }
 0xd23   : > { %v4028_v36 = vpop.f32.mrf.mxu1 }
 0xd24   : > { %v2388_v50 = vsel %vm817_vm7, %v2381_v44, -inf }
 0xd25   : > { %2389 = vmax.xlane.f32.xlu0 %v2388_v50  ;;  %v2601_v52 = vpop.f32.mrf.mxu1 }
 0xd26   : > { %v2615_v43 = vmul.f32 0.17677669, %v2601_v52 }
 0xd27   : > { %v4052_v46 = vpop.f32.mrf.mxu1 }
 0xd28   : > { %v2618_v53 = vsel %vm810_vm6, %v2615_v43, -inf }
 0xd29   : > { %2619 = vmax.xlane.f32.xlu0 %v2618_v53  ;;  %v2606_v23 = vpop.f32.mrf.mxu1 }
 0xd2a   : > { %v2616_v54 = vmul.f32 0.17677669, %v2606_v23 }
 0xd2b   : > { %v4055_v55 = vpop.f32.mrf.mxu1 }
 0xd2c   : > { %v2621_v47 = vsel %vm810_vm6, %v2616_v54, -inf }
 0xd2d   : > { %2622 = vmax.xlane.f32.xlu1 %v2621_v47  ;;  %v2611_v56 = vpop.f32.mrf.mxu1 }
 0xd2e   : > { %v2617_v57 = vmul.f32 0.17677669, %v2611_v56 }
 0xd2f   : > { %v4058_v59 = vpop.f32.mrf.mxu1 }
 0xd30   : > { %v2624_v60 = vsel %vm817_vm7, %v2617_v57, -inf }
 0xd31   : > { %2625 = vmax.xlane.f32.xlu0 %v2624_v60  ;;  %v2837_v51 = vpop.f32.mrf.mxu1 }
 0xd32   : > { %v2851_v61 = vmul.f32 0.17677669, %v2837_v51 }
 0xd33   : > { %v4082_v62 = vpop.f32.mrf.mxu1 }
 0xd34   : > { %v2854_v0 = vsel %vm810_vm6, %v2851_v61, -inf }
 0xd35   : > { %2855 = vmax.xlane.f32.xlu1 %v2854_v0  ;;  %v2842_v3 = vpop.f32.mrf.mxu1 }
 0xd36   : > { %v5139_v50 = vmul.f32 0.17677669, %v2842_v3 }
 0xd37   : > { %v4085_v11 = vpop.f32.mrf.mxu1 }
 0xd38   : > { %v2857_v23 = vsel %vm810_vm6, %v5139_v50, -inf }
 0xd39   : > { %v2847_v12 = vpop.f32.mrf.mxu1 }
 0xd3a   : > { %v5142_v46 = vmul.f32 0.17677669, %v2847_v12 }
 0xd3b   : > { %v4088_v10 = vpop.f32.mrf.mxu1 }
 0xda6   : > { %v2384_v13 = vpop.xlane.xlu1 %2383 }
 0xda7   : > { %v2391_v14 = vsub.f32 %v2379_v39, %v2384_v13 }
 0xda9   : > { %v2394_v16 = vmul.f32 1.442695, %v2391_v14 }
 0xdaa   : > { %v2387_v24 = vpop.xlane.xlu0 %2386 }
 0xdab   : > { %4280 = vpow2.f32 %v2394_v16  ;;  %v2392_v19 = vsub.f32 %v2380_v9, %v2387_v24 }
 0xdad   : > { %v2396_v15 = vmul.f32 1.442695, %v2392_v19 }
 0xdae   : > { %v2390_v21 = vpop.xlane.xlu0 %2389 }
 0xdaf   : > { %4282 = vpow2.f32 %v2396_v15  ;;  %v2393_v20 = vsub.f32 %v2381_v44, %v2390_v21 }
 0xdb1   : > { %v2398_v25 = vmul.f32 1.442695, %v2393_v20 }
 0xdb2   : > { %v2620_v27 = vpop.xlane.xlu0 %2619 }
 0xdb3   : > { %4284 = vpow2.f32 %v2398_v25  ;;  %v2627_v28 = vsub.f32 %v2615_v43, %v2620_v27 }
 0xdb5   : > { %v2630_v29 = vmul.f32 1.442695, %v2627_v28 }
 0xdb6   : > { %v2623_v17 = vpop.xlane.xlu1 %2622 }
 0xdb7   : > { %4286 = vpow2.f32 %v2630_v29  ;;  %v2628_v1 = vsub.f32 %v2616_v54, %v2623_v17  ;;  %v2860_v54 = vsel %vm817_vm7, %v5142_v46, -inf }
 0xdb8   : > { %v4281_v2 = vpop.eup %4280 }
 0xdb9   : > { %v2632_v40 = vmul.f32 1.442695, %v2628_v1  ;;  %v2400_v5 = vsel %vm810_vm6, %v4281_v2, 0.0 }
 0xdba   : > { %2401 = vadd.xlane.f32.xlu0 %v2400_v5  ;;  %v2626_v42 = vpop.xlane.xlu0 %2625 }
 0xdbb   : > { %4288 = vpow2.f32 %v2632_v40  ;;  %v2629_v6 = vsub.f32 %v2617_v57, %v2626_v42 }
 0xdbc   : > { %v4283_v18 = vpop.eup %4282 }
 0xdbd   : > { %v2634_v26 = vmul.f32 1.442695, %v2629_v6  ;;  %v2403_v45 = vsel %vm810_vm6, %v4283_v18, 0.0 }
 0xdbe   : > { %2404 = vadd.xlane.f32.xlu1 %v2403_v45  ;;  %v2856_v39 = vpop.xlane.xlu1 %2855 }
 0xdbf   : > { %4290 = vpow2.f32 %v2634_v26  ;;  %v2863_v7 = vsub.f32 %v2851_v61, %v2856_v39 }
 0xdc0   : > { %v4285_v8 = vpop.eup %4284 }
 0xdc1   : > { %v2866_v48 = vmul.f32 1.442695, %v2863_v7  ;;  %v2406_v9 = vsel %vm817_vm7, %v4285_v8, 0.0 }
 0xdc2   : > { %2407 = vadd.xlane.f32.xlu0 %v2406_v9 }
 0xdc3   : > { %4292 = vpow2.f32 %v2866_v48 }
 0xdc4   : > { %v4287_v34 = vpop.eup %4286 }
 0xdc5   : > { %v2636_v38 = vsel %vm810_vm6, %v4287_v34, 0.0 }
 0xdc6   : > { %2637 = vadd.xlane.f32.xlu1 %v2636_v38 }
 0xdc8   : > { %v4289_v49 = vpop.eup %4288 }
 0xdc9   : > { %v2639_v44 = vsel %vm810_vm6, %v4289_v49, 0.0 }
 0xdca   : > { %2640 = vadd.xlane.f32.xlu0 %v2639_v44 }
 0xdcc   : > { %v4291_v36 = vpop.eup %4290 }
 0xdcd   : > { %v2642_v52 = vsel %vm817_vm7, %v4291_v36, 0.0 }
 0xdce   : > { %2643 = vadd.xlane.f32.xlu1 %v2642_v52 }
 0xdd0   : > { %v4293_v43 = vpop.eup %4292 }
 0xdd1   : > { %v2872_v53 = vsel %vm810_vm6, %v4293_v43, 0.0 }
 0xdd2   : > { %2873 = vadd.xlane.f32.xlu0 %v2872_v53  ;;  %2858 = vmax.xlane.f32.xlu1 %v2857_v23 }
 0xdd6   : > { %2861 = vmax.xlane.f32.xlu0 %v2860_v54 }
 0xe43   : > { %v2402_v55 = vpop.xlane.xlu0 %2401 }
 0xe44   : > { %4294 = vrcp.f32 %v2402_v55 }
 0xe47   : > { %v2405_v47 = vpop.xlane.xlu1 %2404 }
 0xe48   : > { %4296 = vrcp.f32 %v2405_v47 }
 0xe4b   : > { %v2408_v56 = vpop.xlane.xlu0 %2407 }
 0xe4c   : > { %4298 = vrcp.f32 %v2408_v56 }
 0xe4f   : > { %v2638_v57 = vpop.xlane.xlu1 %2637 }
 0xe50   : > { %4300 = vrcp.f32 %v2638_v57  ;;  %v3602_v57 = vld [vmem:[%s5407_s9 + $0x38] sm:$0xff] }
 0xe51   : > { %v4295_v59 = vpop.eup %4294  ;;  %4105 = vmatpush3.msra.mxu1 %v3602_v57 }
 0xe52   : > { %v2412_v60 = vmul.f32 %v4295_v59, %v4281_v2  ;;  %4106 = vmatprep.subr.mxu1 %v4344_v41  ;;  %v3601_v59 = vld [vmem:[%s5407_s9 + $0x30] sm:$0xff] }
 0xe53   : > { %v2641_v51 = vpop.xlane.xlu0 %2640  ;;  %4107 = vmatpush3.msra.mxu1 %v3601_v59 }
 0xe54   : > { %4302 = vrcp.f32 %v2641_v51  ;;  %4036 = vmatmul.mubr.msk.f32.vlgmr.msra.gmra.mxu0 %vm810_vm6, %v2412_v60  ;;  %v3600_v60 = vld [vmem:[%s5407_s9 + $0x28] sm:$0xff]  ;;  %4108 = vmatprep.subr.mxu1 %v4344_v41  ;;  %v3599_v51 = vld [vmem:[%s5407_s9 + $0x20] sm:$0xff] }
 0xe55   : > { %v4297_v61 = vpop.eup %4296  ;;  %4060 = vmatpush3.msk.msra.mxu0 %vm854_vm5, %v5061_v31  ;;  %4038 = vmatprep.mubr.msk.f32.mxu0 %vm4345_vm3, %v4344_v41 }
 0xe56   : > { %4061 = vmatprep.subr.mxu0 %v4344_v41  ;;  %v2413_v62 = vmul.f32 %v4297_v61, %v4283_v18  ;;  %4109 = vmatpush3.msra.mxu1 %v3600_v60 }
 0xe57   : > { %4062 = vmatpush3.msra.mxu0 %v5069_v32  ;;  %v2644_v0 = vpop.xlane.xlu1 %2643  ;;  %4110 = vmatprep.subr.mxu1 %v4344_v41 }
 0xe58   : > { %4063 = vmatprep.subr.mxu0 %v4344_v41  ;;  %4304 = vrcp.f32 %v2644_v0  ;;  %4039 = vmatmul.mubr.msk.f32.gmra.mxu0 %vm810_vm6, %v2413_v62 }
 0xe59   : > { %v4299_v3 = vpop.eup %4298  ;;  %4064 = vmatpush3.msra.mxu0 %v5077_v33  ;;  %4041 = vmatprep.mubr.msk.f32.mxu0 %vm4345_vm3, %v4344_v41 }
 0xe5a   : > { %v2414_v31 = vmul.f32 %v4299_v3, %v4285_v8  ;;  %4089 = vmatprep.subr.mxu0 %v4344_v41  ;;  %4111 = vmatpush3.msra.mxu1 %v3599_v51 }
 0xe5b   : > { %v2874_v11 = vpop.xlane.xlu0 %2873  ;;  %v2859_v27 = vpop.xlane.xlu1 %2858 }
 0xe5c   : > { %4306 = vrcp.f32 %v2874_v11  ;;  %4042 = vmatmul.mubr.msk.f32.gmra.mxu0 %vm810_vm6, %v2414_v31  ;;  %v2864_v17 = vsub.f32 %v5139_v50, %v2859_v27 }
 0xe5d   : > { %v4301_v32 = vpop.eup %4300  ;;  %4065 = vmatprep.mubr.msk.f32.mxu0 %vm4345_vm3, %v4344_v41 }
 0xe5e   : > { %v2648_v12 = vmul.f32 %v4301_v32, %v4287_v34  ;;  %v2868_v5 = vmul.f32 1.442695, %v2864_v17  ;;  %v3620_v17 = vld [vmem:[%s5409_s11 + $0xe0] sm:$0xff] }
 0xe5f   : > { %v2862_v1 = vpop.xlane.xlu0 %2861 }
 0xe60   : > { %4066 = vmatmul.mubr.msk.f32.vlgmr.msra.gmra.mxu0 %vm810_vm6, %v2648_v12  ;;  %v2865_v42 = vsub.f32 %v5142_v46, %v2862_v1  ;;  %4308 = vpow2.f32 %v2868_v5  ;;  %v3619_v1 = vld [vmem:[%s5409_s11 + $0xd8] sm:$0xff]  ;;  %v3616_v5 = vld [vmem:[%s5409_s11 + $0xc0] sm:$0xff] }
 0xe61   : > { %v4303_v10 = vpop.eup %4302  ;;  %4090 = vmatpush3.msk.msra.mxu0 %vm854_vm5, %v5085_v35  ;;  %4068 = vmatprep.mubr.msk.f32.mxu0 %vm4345_vm3, %v4344_v41 }
 0xe62   : > { %4091 = vmatprep.subr.mxu0 %v4344_v41  ;;  %v2649_v33 = vmul.f32 %v4303_v10, %v4289_v49  ;;  %v2870_v26 = vmul.f32 1.442695, %v2865_v42  ;;  %v3615_v42 = vld [vmem:[%s5409_s11 + $0xb8] sm:$0xff] }
 0xe63   : > { %4092 = vmatpush3.msra.mxu0 %v5094_v22 }
 0xe64   : > { %4093 = vmatprep.subr.mxu0 %v4344_v41  ;;  %4069 = vmatmul.mubr.msk.f32.gmra.mxu0 %vm810_vm6, %v2649_v33  ;;  %4310 = vpow2.f32 %v2870_v26  ;;  %v5236_v33 = vld [vmem:[%s5405_s7 + $0x1] ss:$0 sm:$0xff] }
 0xe65   : > { %v4305_v13 = vpop.eup %4304  ;;  %4094 = vmatpush3.msra.mxu0 %v5103_v4  ;;  %4071 = vmatprep.mubr.msk.f32.mxu0 %vm4345_vm3, %v4344_v41  ;;  %v3612_v26 = vld [vmem:[%s5409_s11 + $0xa0] sm:$0xff] }
 0xe66   : > { %v2650_v14 = vmul.f32 %v4305_v13, %v4291_v36  ;;  %4121 = vmatprep.subr.mxu0 %v4344_v41 }
 0xe68   : > { %4072 = vmatmul.mubr.msk.f32.gmra.mxu0 %vm810_vm6, %v2650_v14  ;;  %v5241_v14 = vld [vmem:[%s5406_s8 + $0x1] ss:$0 sm:$0xff] }
 0xe69   : > { %v4307_v35 = vpop.eup %4306  ;;  %4095 = vmatprep.mubr.msk.f32.mxu0 %vm4345_vm3, %v4344_v41 }
 0xe6a   : > { %v2884_v22 = vmul.f32 %v4307_v35, %v4293_v43 }
 0xe6c   : > { %4096 = vmatmul.mubr.msk.f32.vlgmr.msra.gmra.mxu0 %vm810_vm6, %v2884_v22 }
 0xe6d   : > { %4098 = vmatprep.mubr.msk.f32.mxu0 %vm4345_vm3, %v4344_v41  ;;  %v4309_v45 = vpop.eup %4308 }
 0xe6e   : > { %v2875_v39 = vsel %vm810_vm6, %v4309_v45, 0.0 }
 0xe71   : > { %v4311_v7 = vpop.eup %4310 }
 0xe72   : > { %v2878_v8 = vsel %vm817_vm7, %v4311_v7, 0.0 }
 0xf14   : > { %v2494_v16 = vpop.f32.mrf.mxu0 }
 0xf15   : > { %2511 = vrot.lane.b32.xlu1 %v2494_v16, %s4349_s22 }
 0xf16   : > { %v4037_v4 = vpop.f32.mrf.mxu0 }
 0xf18   : > { %v2499_v24 = vpop.f32.mrf.mxu0 }
 0xf1a   : > { %v4040_v19 = vpop.f32.mrf.mxu0 }
 0xf1c   : > { %v5185_v15 = vpop.f32.mrf.mxu0 }
 0xf1e   : > { %v4043_v21 = vpop.f32.mrf.mxu0 }
 0xf20   : > { %v2730_v20 = vpop.f32.mrf.mxu0 }
 0xf21   : > { %2747 = vrot.lane.b32.xlu0 %v2730_v20, %s5426_s1 }
 0xf22   : > { %v4067_v25 = vpop.f32.mrf.mxu0 }
 0xf24   : > { %v2735_v28 = vpop.f32.mrf.mxu0 }
 0xf26   : > { %v4070_v29 = vpop.f32.mrf.mxu0 }
 0xf27   : > { %v3623_v29 = vld [vmem:[%s5409_s11 + $0xf8] sm:$0xff] }
 0xf28   : > { %v2740_v2 = vpop.f32.mrf.mxu0  ;;  %4122 = vmatpush3.msra.mxu0 %v3623_v29 }
 0xf29   : > { %4123 = vmatprep.subr.mxu0 %v4344_v41 }
 0xf2a   : > { %v4073_v40 = vpop.f32.mrf.mxu0 }
 0xf2b   : > { %v3617_v40 = vld [vmem:[%s5409_s11 + $0xc8] sm:$0xff] }
 0xf2c   : > { %v2966_v6 = vpop.f32.mrf.mxu0 }
 0xf2d   : > { %2983 = vrot.lane.b32.xlu1 %v2966_v6, %s5427_s20  ;;  %v3614_v6 = vld [vmem:[%s5409_s11 + $0xb0] sm:$0xff] }
 0xf2e   : > { %v4097_v18 = vpop.f32.mrf.mxu0 }
 0xf2f   : > { %v3613_v18 = vld [vmem:[%s5409_s11 + $0xa8] sm:$0xff] }
 0xf40   : > { %2876 = vadd.xlane.f32.xlu0 %v2875_v39  ;;  %v3610_v39 = vld [vmem:[%s5409_s11 + $0x90] sm:$0xff] }
 0xf44   : > { %2879 = vadd.xlane.f32.xlu0 %v2878_v8  ;;  %v3608_v8 = vld [vmem:[%s5409_s11 + $0x80] sm:$0xff] }
 0xf5a   : > { %2513 = vrot.lane.b32.xlu0 %v2499_v24, %s4349_s22 }
 0xf5e   : > { %2751 = vrot.lane.b32.xlu0 %v2740_v2, %s5426_s1  ;;  %v3618_v2 = vld [vmem:[%s5409_s11 + $0xd0] sm:$0xff] }
 0xf87   : > { %v2512_v48 = vpop.permute.xlu1 %2511 }
 0xf88   : > { %2520 = vst.msk [vmem:[#allocation2] sm:$0xff] %vm1174_vm9, %v2512_v48  ;;  %v5329_v48 = vld [vmem:[%s5408_s10 + $0x1] ss:$0 sm:$0xff] }
 0xf93   : > { %v2748_v9 = vpop.permute.xlu0 %2747 }
 0xf94   : > { %2756 = vst.msk [vmem:[#allocation2] sm:$0xff] %vm1412_vm10, %v2748_v9 }
 0xf9f   : > { %v2984_v34 = vpop.permute.xlu1 %2983 }
 0xfa0   : > { %2992 = vst.msk [vmem:[#allocation2] sm:$0xff] %vm1650_vm11, %v2984_v34 }
 0xfa7   : > { %v2995_v38 = vld [vmem:[#allocation2] sm:$0xff] }
 0xfa8   : > { %v5199_v49 = vadd.f32 %v2995_v38, %v4982_v58 }
 0xfaa   : > { %v3005_v44 = vsel %vm645_vm2, %v5199_v49, 0.0 }
 0xfab   : > { %3006 = vadd.xlane.f32.xlu1 %v3005_v44 }
 0xfc9   : > { %v2877_v36 = vpop.xlane.xlu0 %2876 }
 0xfca   : > { %4312 = vrcp.f32 %v2877_v36 }
 0xfcd   : > { %v2880_v50 = vpop.xlane.xlu0 %2879 }
 0xfce   : > { %4314 = vrcp.f32 %v2880_v50 }
 0xfd1   : > { %v2514_v52 = vpop.permute.xlu0 %2513 }
 0xfd2   : > { %2521 = vst.msk [vmem:[#allocation2 + $0x8] sm:$0xff] %vm1174_vm9, %v2514_v52 }
 0xfd5   : > { %v2752_v24 = vpop.permute.xlu0 %2751 }
 0xfd7   : > { %v4313_v43 = vpop.eup %4312 }
 0xfd8   : > { %v2885_v46 = vmul.f32 %v4313_v43, %v4309_v45  ;;  %v3611_v45 = vld [vmem:[%s5409_s11 + $0x98] sm:$0xff] }
 0xfda   : > { %4099 = vmatmul.mubr.msk.f32.gmra.mxu0 %vm810_vm6, %v2885_v46 }
 0xfdb   : > { %v4315_v53 = vpop.eup %4314  ;;  %4101 = vmatprep.mubr.msk.f32.mxu0 %vm4345_vm3, %v4344_v41 }
 0xfdc   : > { %v2886_v58 = vmul.f32 %v4315_v53, %v4311_v7  ;;  %v3609_v7 = vld [vmem:[%s5409_s11 + $0x88] sm:$0xff] }
 0xfde   : > { %4102 = vmatmul.mubr.msk.f32.gmra.mxu0 %vm810_vm6, %v2886_v58 }
 0xfdf   : > { %4153 = vmatprep.mubr.msk.f32.mxu0 %vm4345_vm3, %v4344_v41 }
0x1034   : > { %v3007_v23 = vpop.xlane.xlu1 %3006 }
0x1035   : > { %v3014_v54 = vmul.f32 0.03125, %v3007_v23 }
0x1037   : > { %v3017_v55 = vsub.f32 %v5199_v49, %v3014_v54 }
0x1039   : > { %v3020_v47 = vmul.f32 %v3017_v55, %v3017_v55 }
0x103b   : > { %v3023_v56 = vsel %vm645_vm2, %v3020_v47, 0.0 }
0x103c   : > { %3024 = vadd.xlane.f32.xlu1 %v3023_v56 }
0x104d   : > { %2749 = vrot.lane.b32.xlu1 %v2735_v28, %s5426_s1 }
0x109a   : > { %v2971_v61 = vpop.f32.mrf.mxu0 }
0x109b   : > { %2985 = vrot.lane.b32.xlu1 %v2971_v61, %s5427_s20 }
0x109c   : > { %v4100_v62 = vpop.f32.mrf.mxu0 }
0x109e   : > { %v2976_v0 = vpop.f32.mrf.mxu0 }
0x109f   : > { %2515 = vrot.lane.b32.xlu1 %v5185_v15, %s4349_s22 }
0x10a0   : > { %v4103_v3 = vpop.f32.mrf.mxu0 }
0x10a3   : > { %2987 = vrot.lane.b32.xlu1 %v2976_v0, %s5427_s20 }
0x10c5   : > { %v3025_v31 = vpop.xlane.xlu1 %3024 }
0x10c6   : > { %v3032_v11 = vmul.f32 0.03125, %v3025_v31 }
0x10c8   : > { %v3035_v32 = vadd.f32 1e-05, %v3032_v11 }
0x10c9   : > { %v2750_v12 = vpop.permute.xlu1 %2749 }
0x10ca   : > { %4316 = vrsqrt.f32 %v3035_v32  ;;  %2757 = vst.msk [vmem:[#allocation2 + $0x8] sm:$0xff] %vm1412_vm10, %v2750_v12 }
0x10d7   : > { %v4317_v10 = vpop.eup %4316 }
0x10d8   : > { %v3041_v13 = vmul.f32 %v4317_v10, %v3017_v55 }
0x10da   : > { %v3050_v35 = vmul.f32 %v5236_v33, %v3041_v13 }
0x10dc   : > { %v3059_v22 = vadd.f32 %v5241_v14, %v3050_v35 }
0x10de   : > { %4113 = vmatmul.mubr.msk.f32.vlgmr.msra.gmra.mxu1 %vm645_vm2, %v3059_v22 }
0x10df   : > { %4115 = vmatprep.mubr.msk.f32.mxu1 %vm4345_vm3, %v4344_v41 }
0x110d   : > { %v2986_v16 = vpop.permute.xlu1 %2985 }
0x110e   : > { %2993 = vst.msk [vmem:[#allocation2 + $0x8] sm:$0xff] %vm1650_vm11, %v2986_v16 }
0x1111   : > { %v2516_v4 = vpop.permute.xlu1 %2515 }
0x1112   : > { %2522 = vst.msk [vmem:[#allocation2 + $0x10] sm:$0x1] %vm1177_vm12, %v2516_v4 }
0x1113   : > { %2758 = vst.msk [vmem:[#allocation2 + $0x10] sm:$0x1] %vm1415_vm13, %v2752_v24 }
0x1115   : > { %v2988_v19 = vpop.permute.xlu1 %2987  ;;  %v2996_v15 = vld [vmem:[#allocation2 + $0x8] sm:$0xff] }
0x1116   : > { %2994 = vst.msk [vmem:[#allocation2 + $0x10] sm:$0x1] %vm5428_vm4, %v2988_v19  ;;  %v5253_v21 = vadd.f32 %v2996_v15, %v4974_v30  ;;  %v3622_v30 = vld [vmem:[%s5409_s11 + $0xf0] sm:$0xff] }
0x1117   : > { %4124 = vmatpush3.msra.mxu0 %v3622_v30 }
0x1118   : > { %v3008_v20 = vsel %vm645_vm2, %v5253_v21, 0.0  ;;  %4125 = vmatprep.subr.mxu0 %v4344_v41 }
0x1119   : > { %3009 = vadd.xlane.f32.xlu0 %v3008_v20 }
0x111d   : > { %v2997_v25 = vld [vmem:[#allocation2 + $0x10] sm:$0x1] }
0x111e   : > { %v5258_v27 = vadd.f32 %v2997_v25, %v4979_v63  ;;  %v3621_v63 = vld [vmem:[%s5409_s11 + $0xe8] sm:$0xff] }
0x111f   : > { %4126 = vmatpush3.msra.mxu0 %v3621_v63 }
0x1120   : > { %v3011_v28 = vsel %vm643_vm1, %v5258_v27, 0.0  ;;  %4127 = vmatprep.subr.mxu0 %v4344_v41 }
0x1121   : > { %3012 = vadd.xlane.f32.xlu1 %v3011_v28  ;;  %4128 = vmatpush3.msra.mxu0 %v3620_v17 }
0x1122   : > { %4129 = vmatprep.subr.mxu0 %v4344_v41 }
0x1123   : > { %4130 = vmatpush3.msra.mxu0 %v3619_v1 }
0x1124   : > { %4131 = vmatprep.subr.mxu0 %v4344_v41 }
0x1125   : > { %4132 = vmatpush3.msra.mxu0 %v3618_v2 }
0x1126   : > { %4133 = vmatprep.subr.mxu0 %v4344_v41 }
0x1127   : > { %4134 = vmatpush3.msra.mxu0 %v3617_v40 }
0x1128   : > { %4135 = vmatprep.subr.mxu0 %v4344_v41 }
0x1129   : > { %4136 = vmatpush3.msra.mxu0 %v3616_v5 }
0x112a   : > { %4137 = vmatprep.subr.mxu0 %v4344_v41 }
0x112b   : > { %4138 = vmatpush3.msra.mxu0 %v3615_v42 }
0x112c   : > { %4139 = vmatprep.subr.mxu0 %v4344_v41 }
0x112d   : > { %4140 = vmatpush3.msra.mxu0 %v3614_v6 }
0x112e   : > { %4141 = vmatprep.subr.mxu0 %v4344_v41 }
0x112f   : > { %4142 = vmatpush3.msra.mxu0 %v3613_v18  ;;  %v3625_v18 = vld [vmem:[%s5410_s12 + $0x1] ss:$0 sm:$0xff] }
0x1130   : > { %4143 = vmatprep.subr.mxu0 %v4344_v41 }
0x1131   : > { %4144 = vmatpush3.msra.mxu0 %v3612_v26 }
0x1132   : > { %4145 = vmatprep.subr.mxu0 %v4344_v41 }
0x1133   : > { %4146 = vmatpush3.msra.mxu0 %v3611_v45 }
0x1134   : > { %4147 = vmatprep.subr.mxu0 %v4344_v41 }
0x1135   : > { %4148 = vmatpush3.msra.mxu0 %v3610_v39 }
0x1136   : > { %4149 = vmatprep.subr.mxu0 %v4344_v41 }
0x1137   : > { %4150 = vmatpush3.msra.mxu0 %v3609_v7 }
0x1138   : > { %4151 = vmatprep.subr.mxu0 %v4344_v41 }
0x1139   : > { %4152 = vmatpush3.msra.mxu0 %v3608_v8 }
0x113a   : > { %4162 = vmatprep.subr.mxu0 %v4344_v41 }
0x119e   : > { %v3150_v9 = vpop.f32.mrf.mxu1 }
0x119f   : > { %v3151_v34 = vadd.f32 %v5329_v48, %v3150_v9 }
0x11a0   : > { %v4114_v38 = vpop.f32.mrf.mxu1 }
0x11a1   : > { %v3164_v44 = vmul.f32 0.70710677, %v3151_v34  ;;  %v3236_v19 = vmul.f32 0.5, %v3151_v34 }
0x11a2   : > { %v3010_v36 = vpop.xlane.xlu0 %3009 }
0x11a3   : > { %v3173_v50 = vand.u32 2147483647, %v3164_v44  ;;  %v3015_v52 = vmul.f32 0.03125, %v3010_v36  ;;  %vm3167_vm5 = vcmp.ge.f32.partialorder %v3164_v44, 0.0 }
0x11a4   : > { %v3170_v4 = vsel %vm3167_vm5, 1.0, %v4352_v37 }
0x11a5   : > { %v3176_v43 = vmul.f32 0.3275911, %v3173_v50  ;;  %v3018_v46 = vsub.f32 %v5253_v21, %v3015_v52  ;;  %v3215_v56 = vsub.f32 0.0, %v3173_v50 }
0x11a7   : > { %v3179_v53 = vadd.f32 1.0, %v3176_v43  ;;  %v3021_v58 = vmul.f32 %v3018_v46, %v3018_v46  ;;  %v3218_v60 = vmul.f32 %v3215_v56, %v3173_v50 }
0x11a9   : > { %4318 = vrcp.f32 %v3179_v53  ;;  %v3026_v23 = vsel %vm645_vm2, %v3021_v58, 0.0  ;;  %v3221_v62 = vmul.f32 1.442695, %v3218_v60 }
0x11aa   : > { %v3013_v54 = vpop.xlane.xlu1 %3012  ;;  %3027 = vadd.xlane.f32.xlu0 %v3026_v23 }
0x11ab   : > { %v3016_v55 = vmul.f32 0.03125, %v3013_v54  ;;  %4320 = vpow2.f32 %v3221_v62 }
0x11ad   : > { %v3019_v47 = vsub.f32 %v5258_v27, %v3016_v55 }
0x11af   : > { %v3022_v57 = vmul.f32 %v3019_v47, %v3019_v47 }
0x11b1   : > { %v3029_v59 = vsel %vm643_vm1, %v3022_v57, 0.0 }
0x11b2   : > { %3030 = vadd.xlane.f32.xlu0 %v3029_v59 }
0x11b6   : > { %v4319_v51 = vpop.eup %4318 }
0x11b7   : > { %v3188_v61 = vmul.f32 1.0614054, %v4319_v51 }
0x11b8   : > { %v4321_v35 = vpop.eup %4320 }
0x11b9   : > { %v3191_v0 = vadd.f32 -1.4531521, %v3188_v61 }
0x11bb   : > { %v3194_v3 = vmul.f32 %v4319_v51, %v3191_v0 }
0x11bd   : > { %v3197_v31 = vadd.f32 1.4214138, %v3194_v3 }
0x11bf   : > { %v3200_v11 = vmul.f32 %v4319_v51, %v3197_v31 }
0x11c1   : > { %v3203_v32 = vadd.f32 -0.28449672, %v3200_v11 }
0x11c3   : > { %v3206_v12 = vmul.f32 %v4319_v51, %v3203_v32 }
0x11c5   : > { %v3209_v10 = vadd.f32 0.2548296, %v3206_v12 }
0x11c7   : > { %v3212_v13 = vmul.f32 %v4319_v51, %v3209_v10 }
0x11c9   : > { %v3227_v22 = vmul.f32 %v4321_v35, %v3212_v13 }
0x11cb   : > { %v3230_v16 = vsub.f32 1.0, %v3227_v22 }
0x11cd   : > { %v3233_v24 = vmul.f32 %v3230_v16, %v3170_v4 }
0x11cf   : > { %v3239_v15 = vadd.f32 1.0, %v3233_v24 }
0x11d1   : > { %v3242_v21 = vmul.f32 %v3239_v15, %v3236_v19 }
0x11d3   : > { %4154 = vmatmul.mubr.f32.vlgmr.msra.gmra.mxu0 %v3242_v21 }
0x11d4   : > { %4156 = vmatprep.mubr.msk.f32.mxu0 %vm4345_vm3, %v4344_v41 }
0x1233   : > { %v3028_v20 = vpop.xlane.xlu0 %3027 }
0x1234   : > { %v3033_v25 = vmul.f32 0.03125, %v3028_v20 }
0x1236   : > { %v3036_v27 = vadd.f32 1e-05, %v3033_v25 }
0x1238   : > { %4322 = vrsqrt.f32 %v3036_v27 }
0x123b   : > { %v3031_v28 = vpop.xlane.xlu0 %3030 }
0x123c   : > { %v3034_v29 = vmul.f32 0.03125, %v3031_v28 }
0x123e   : > { %v3037_v30 = vadd.f32 1e-05, %v3034_v29 }
0x1240   : > { %4324 = vrsqrt.f32 %v3037_v30 }
0x1245   : > { %v4323_v63 = vpop.eup %4322 }
0x1246   : > { %v3042_v17 = vmul.f32 %v4323_v63, %v3018_v46 }
0x1248   : > { %v3051_v1 = vmul.f32 %v5236_v33, %v3042_v17 }
0x124a   : > { %v3060_v2 = vadd.f32 %v5241_v14, %v3051_v1 }
0x124c   : > { %4116 = vmatmul.mubr.msk.f32.gmra.mxu1 %vm645_vm2, %v3060_v2 }
0x124d   : > { %v4325_v40 = vpop.eup %4324  ;;  %4118 = vmatprep.mubr.msk.f32.mxu1 %vm4345_vm3, %v4344_v41 }
0x124e   : > { %v3043_v5 = vmul.f32 %v4325_v40, %v3019_v47 }
0x1250   : > { %v3052_v42 = vmul.f32 %v5236_v33, %v3043_v5 }
0x1252   : > { %v3061_v6 = vadd.f32 %v5241_v14, %v3052_v42 }
0x1254   : > { %4119 = vmatmul.mubr.msk.f32.gmra.mxu1 %vm645_vm2, %v3061_v6 }
0x1293   : > { %v3336_v26 = vpop.f32.mrf.mxu0 }
0x1294   : > { %v3337_v45 = vadd.f32 %v3625_v18, %v3336_v26 }
0x1295   : > { %v4155_v39 = vpop.f32.mrf.mxu0 }
0x1296   : > { %v3348_v7 = vadd.f32 %v3337_v45, %v5199_v49 }
0x1298   : > { %v3351_v8 = vsel %vm643_vm1, %v3348_v7, 0.0 }
0x1299   : > { %3352 = vadd.xlane.f32.xlu0 %v3351_v8 }
0x130c   : > { %v3155_v9 = vpop.f32.mrf.mxu1 }
0x130d   : > { %v3156_v34 = vadd.f32 %v5329_v48, %v3155_v9  ;;  %v3368_v9 = vld [vmem:[%s5413_s15 + $0x10] sm:$0xff] }
0x130e   : > { %v4117_v33 = vpop.f32.mrf.mxu1 }
0x130f   : > { %v3165_v38 = vmul.f32 0.70710677, %v3156_v34  ;;  %v3237_v17 = vmul.f32 0.5, %v3156_v34  ;;  %v3366_v34 = vld [vmem:[%s5413_s15] sm:$0xff] }
0x1311   : > { %v3174_v14 = vand.u32 2147483647, %v3165_v38  ;;  %vm3168_vm6 = vcmp.ge.f32.partialorder %v3165_v38, 0.0 }
0x1312   : > { %v3171_v29 = vsel %vm3168_vm6, 1.0, %v4352_v37 }
0x1313   : > { %v3177_v44 = vmul.f32 0.3275911, %v3174_v14  ;;  %v3216_v49 = vsub.f32 0.0, %v3174_v14 }
0x1314   : > { %v3160_v36 = vpop.f32.mrf.mxu1 }
0x1315   : > { %v3180_v50 = vadd.f32 1.0, %v3177_v44  ;;  %v3161_v52 = vadd.f32 %v5329_v48, %v3160_v36  ;;  %v3219_v54 = vmul.f32 %v3216_v49, %v3174_v14  ;;  %v3349_v36 = vld [vmem:[%s5411_s13] sm:$0x1] }
0x1316   : > { %v4120_v43 = vpop.f32.mrf.mxu1 }
0x1317   : > { %4326 = vrcp.f32 %v3180_v50  ;;  %v3166_v46 = vmul.f32 0.70710677, %v3161_v52  ;;  %v3223_v57 = vmul.f32 1.442695, %v3219_v54  ;;  %v3238_v45 = vmul.f32 0.5, %v3161_v52 }
0x1318   : > { %v3350_v52 = vld [vmem:[%s5412_s14] sm:$0x1] }
0x1319   : > { %v3175_v53 = vand.u32 2147483647, %v3166_v46 }
0x131b   : > { %v3178_v58 = vmul.f32 0.3275911, %v3175_v53  ;;  %v3217_v59 = vsub.f32 0.0, %v3175_v53 }
0x131d   : > { %v3181_v23 = vadd.f32 1.0, %v3178_v58  ;;  %v3220_v62 = vmul.f32 %v3217_v59, %v3175_v53 }
0x131f   : > { %4328 = vrcp.f32 %v3181_v23  ;;  %v3225_v32 = vmul.f32 1.442695, %v3220_v62  ;;  %v3370_v23 = vld [vmem:[%s5414_s16] sm:$0x1] }
0x1320   : > { %4330 = vpow2.f32 %v3223_v57 }
0x1321   : > { %4332 = vpow2.f32 %v3225_v32 }
0x1322   : > { %v3353_v55 = vpop.xlane.xlu0 %3352 }
0x1323   : > { %v3354_v47 = vmul.f32 0.03125, %v3353_v55 }
0x1324   : > { %v4327_v56 = vpop.eup %4326 }
0x1325   : > { %v5354_v60 = vsub.f32 %v3348_v7, %v3354_v47  ;;  %v3189_v51 = vmul.f32 1.0614054, %v4327_v56  ;;  %v3369_v7 = vld [vmem:[%s5413_s15 + $0x18] sm:$0xff] }
0x1326   : > { %4163 = vmatpush3.msra.mxu0 %v3369_v7 }
0x1327   : > { %v3356_v48 = vmul.f32 %v5354_v60, %v5354_v60  ;;  %v3192_v61 = vadd.f32 -1.4531521, %v3189_v51  ;;  %4164 = vmatprep.subr.mxu0 %v4344_v41 }
0x1328   : > { %4165 = vmatpush3.msra.mxu0 %v3368_v9 }
0x1329   : > { %v3357_v0 = vsel %vm643_vm1, %v3356_v48, 0.0  ;;  %v3195_v3 = vmul.f32 %v4327_v56, %v3192_v61  ;;  %vm3169_vm1 = vcmp.ge.f32.partialorder %v3166_v46, 0.0  ;;  %4166 = vmatprep.subr.mxu0 %v4344_v41 }
0x132a   : > { %3358 = vadd.xlane.f32.xlu1 %v3357_v0  ;;  %v3172_v18 = vsel %vm3169_vm1, 1.0, %v4352_v37  ;;  %v3367_v37 = vld [vmem:[%s5413_s15 + $0x8] sm:$0xff] }
0x132b   : > { %v3198_v31 = vadd.f32 1.4214138, %v3195_v3  ;;  %4167 = vmatpush3.msra.mxu0 %v3367_v37 }
0x132c   : > { %v4329_v11 = vpop.eup %4328  ;;  %4168 = vmatprep.subr.mxu0 %v4344_v41 }
0x132d   : > { %v3201_v12 = vmul.f32 %v4327_v56, %v3198_v31  ;;  %v3190_v10 = vmul.f32 1.0614054, %v4329_v11  ;;  %v4331_v21 = vpop.eup %4330  ;;  %4169 = vmatpush3.msra.mxu0 %v3366_v34 }
0x132e   : > { %v4333_v40 = vpop.eup %4332 }
0x132f   : > { %v3204_v13 = vadd.f32 -0.28449672, %v3201_v12  ;;  %v3193_v35 = vadd.f32 -1.4531521, %v3190_v10 }
0x1331   : > { %v3207_v22 = vmul.f32 %v4327_v56, %v3204_v13  ;;  %v3196_v16 = vmul.f32 %v4329_v11, %v3193_v35 }
0x1333   : > { %v3210_v4 = vadd.f32 0.2548296, %v3207_v22  ;;  %v3199_v24 = vadd.f32 1.4214138, %v3196_v16 }
0x1335   : > { %v3213_v19 = vmul.f32 %v4327_v56, %v3210_v4  ;;  %v3202_v15 = vmul.f32 %v4329_v11, %v3199_v24 }
0x1337   : > { %v3228_v20 = vmul.f32 %v4331_v21, %v3213_v19  ;;  %v3205_v25 = vadd.f32 -0.28449672, %v3202_v15 }
0x1339   : > { %v3231_v27 = vsub.f32 1.0, %v3228_v20  ;;  %v3208_v28 = vmul.f32 %v4329_v11, %v3205_v25 }
0x133b   : > { %v3234_v30 = vmul.f32 %v3231_v27, %v3171_v29  ;;  %v3211_v63 = vadd.f32 0.2548296, %v3208_v28 }
0x133d   : > { %v3240_v1 = vadd.f32 1.0, %v3234_v30  ;;  %v3214_v2 = vmul.f32 %v4329_v11, %v3211_v63 }
0x133f   : > { %v3243_v5 = vmul.f32 %v3240_v1, %v3237_v17  ;;  %v3229_v42 = vmul.f32 %v4333_v40, %v3214_v2 }
0x1341   : > { %4157 = vmatmul.mubr.f32.gmra.mxu0 %v3243_v5  ;;  %v3232_v6 = vsub.f32 1.0, %v3229_v42 }
0x1342   : > { %4159 = vmatprep.mubr.msk.f32.mxu0 %vm4345_vm3, %v4344_v41 }
0x1343   : > { %v3235_v26 = vmul.f32 %v3232_v6, %v3172_v18 }
0x1345   : > { %v3241_v39 = vadd.f32 1.0, %v3235_v26 }
0x1347   : > { %v3244_v8 = vmul.f32 %v3241_v39, %v3238_v45 }
0x1349   : > { %4160 = vmatmul.mubr.f32.gmra.mxu0 %v3244_v8 }
0x134a   : > { %4170 = vmatprep.mubr.msk.f32.mxu0 %vm4345_vm3, %v4344_v41 }
0x13b3   : > { %v3359_v33 = vpop.xlane.xlu1 %3358 }
0x13b4   : > { %v3360_v38 = vmul.f32 0.03125, %v3359_v33 }
0x13b6   : > { %v3361_v14 = vadd.f32 1e-05, %v3360_v38 }
0x13b8   : > { %4334 = vrsqrt.f32 %v3361_v14 }
0x13c5   : > { %v4335_v44 = vpop.eup %4334 }
0x13c6   : > { %v3363_v50 = vmul.f32 %v4335_v44, %v5354_v60 }
0x13c8   : > { %v3364_v43 = vmul.f32 %v3363_v50, %v3349_v36 }
0x13ca   : > { %v3365_v46 = vadd.f32 %v3364_v43, %v3350_v52 }
0x13cc   : > { %4171 = vmatmul.mubr.msk.f32.vlgmr.msra.gmra.mxu0 %vm645_vm2, %v3365_v46 }
0x1401   : > { %v3341_v41 = vpop.f32.mrf.mxu0 }
0x1403   : > { %v4158_v53 = vpop.f32.mrf.mxu0 }
0x1409   : > { %v3345_v58 = vpop.f32.mrf.mxu0 }
0x140b   : > { %v4161_v49 = vpop.f32.mrf.mxu0 }
0x148c   : > { %v3440_v54 = vpop.f32.mrf.mxu0 }
0x148d   : > { %v3441_v55 = vadd.f32 %v3440_v54, %v3370_v23 }
0x148e   : > { %v4172_v47 = vpop.f32.mrf.mxu0 }
0x148f   : > { %3444 = vst [vmem:[%s544_s19] sm:$0x1] %v3441_v55 }
0x1490 PF: > { %s27_s24 = sadd.s32 1, %s4342_s24  }
0x1491   : > { %p24_p4 = scmp.ge.s32.totalorder %s27_s24, 4  }
0x1493   :  { %26 = sbr.rel (!%p24_p4) target bundleno = 3 (0x3), region = 126 }

</bundles_post_ra>
